<compile_context>
chip_gen: v7x
topology: tpu7x:2x2x1
jax: 0.10.0
libtpu: 0.0.40
codegen_flags: <defaults>
</compile_context>

<pallas_src>
import jax
import jax.numpy as jnp
from jax import lax
from jax.experimental import pallas as pl
from jax.experimental.pallas import tpu as pltpu

# --- model sizes (small, consistent with the module's forward) -------------
EMBED = 16
HIDDEN = 32
N_LABEL = 8
BATCH = 2
SEQ = 8


def _sigmoid(v):
    # exact logistic expressed via tanh -> lowers to the EUP transcendental path
    return 0.5 * (jnp.tanh(0.5 * v) + 1.0)


# ---------------------------------------------------------------------------
# Single fused kernel: BiLSTM + classifier + softmax + CRF-style loss
# ---------------------------------------------------------------------------
def fused_rnn_crf_kernel(x_ref, labels_ref,
                         wihf_ref, wihb_ref, bf_ref, bb_ref, whh_ref,
                         w1_ref, b1_ref, w2_ref, b2_ref, w3_ref, b3_ref,
                         trans_ref,
                         loss_ref,
                         feats_ref):
    B, S, E = x_ref.shape
    H2 = whh_ref.shape[0]            # 2*H  (fwd|bwd state width)
    H = H2 // 2
    G = whh_ref.shape[1]             # 8*H = 4 gate chunks of width 2H
    L = trans_ref.shape[0]

    # ---------------- BiLSTM ----------------
    # Input projection hoisted out of the recurrence (bias folded in).
    # Gate-column layout is interleaved per gate:
    #   [ i_f i_b | f_f f_b | g_f g_b | o_f o_b ], each block width H.
    x_flat = x_ref[...].reshape(B * S, E)
    gxf = jnp.dot(x_flat, wihf_ref[...],
                  preferred_element_type=jnp.float32) + bf_ref[...]
    gxb = jnp.dot(x_flat, wihb_ref[...],
                  preferred_element_type=jnp.float32) + bb_ref[...]
    gxf = gxf.reshape(B, S, G)       # forward-gate columns filled, bwd cols 0
    gxb = gxb.reshape(B, S, G)       # backward-gate columns filled, fwd cols 0

    whh = whh_ref[...]               # (2H, 8H) block-diagonal recurrent weight

    # Both directions in ONE loop: step s handles forward time s and backward
    # time S-1-s with a single recurrent matmul per step.
    h = jnp.zeros((B, H2), jnp.float32)   # [h_fwd | h_bwd]
    c = jnp.zeros((B, H2), jnp.float32)   # [c_fwd | c_bwd]
    hs = []
    for s in range(S):                    # static unroll (S is small)
        gates = (gxf[:, s, :] + gxb[:, S - 1 - s, :]
                 + jnp.dot(h, whh, preferred_element_type=jnp.float32))
        i_g = _sigmoid(gates[:, 0 * H2:1 * H2])
        f_g = _sigmoid(gates[:, 1 * H2:2 * H2])
        g_g = jnp.tanh(gates[:, 2 * H2:3 * H2])
        o_g = _sigmoid(gates[:, 3 * H2:4 * H2])
        c = f_g * c + i_g * g_g
        h = o_g * jnp.tanh(c)
        hs.append(h)

    # Assemble (B, S, 2H) features in VMEM scratch: one lane-dense (B,2H)
    # store per timestep, no HBM writeback.
    lane = lax.broadcasted_iota(jnp.int32, (B, H2), 1)
    fwd_mask = lane < H
    for t in range(S):
        # forward half comes from step t, backward half from step S-1-t
        feats_ref[:, t, :] = jnp.where(fwd_mask, hs[t], hs[S - 1 - t])

    # ---------------- classifier MLP + softmax ----------------
    flat = feats_ref[...].reshape(B * S, H2)
    h1 = jnp.tanh(jnp.dot(flat, w1_ref[...],
                          preferred_element_type=jnp.float32) + b1_ref[...])
    # TODO(synk): nn.Dropout(0.5) has no deterministic forward semantics here;
    # treated as identity (eval-mode behavior).
    h2 = jnp.tanh(jnp.dot(h1, w2_ref[...],
                          preferred_element_type=jnp.float32) + b2_ref[...])
    logits = jnp.dot(h2, w3_ref[...],
                     preferred_element_type=jnp.float32) + b3_ref[...]
    mx = jnp.max(logits, axis=-1, keepdims=True)
    e = jnp.exp(logits - mx)
    probs_flat = e * pl.reciprocal(jnp.sum(e, axis=-1, keepdims=True),
                                   approx=True)
    probs = probs_flat.reshape(B, S, L)

    # ---------------- CRF-style loss ----------------
    labels = labels_ref[...]                       # (B, S) int32
    t_raw = trans_ref[...]                         # (L, L)
    tmax = jnp.max(t_raw, axis=1, keepdims=True)
    texp = jnp.exp(t_raw - tmax)
    T = texp / jnp.sum(texp, axis=1, keepdims=True)   # softmax(transition, dim=1)

    # ---- Pr: gold-path score (fully vectorized, no per-timestep loop) ----
    lab_oh = (labels[:, :, None]
              == lax.broadcasted_iota(jnp.int32, (B, S, L), 2)
              ).astype(jnp.float32)                           # (B, S, L)
    emit = jnp.sum(probs * lab_oh, axis=-1)                   # x[b,t,labels[b,t]]
    pr = jnp.sum(emit, axis=1, keepdims=True)                 # (B, 1)
    rows = jnp.dot(lab_oh.reshape(B * S, L), T,
                   preferred_element_type=jnp.float32
                   ).reshape(B, S, L)                         # T[labels[b,t], :]
    trans_pair = rows[:, :S - 1, :] * lab_oh[:, 1:, :]        # (B, S-1, L)
    pr = pr + jnp.sum(jnp.sum(trans_pair, axis=2), axis=1, keepdims=True)

    # ---- Ps: CRF "all paths" score (log-sum-exp recursion) ----
    pre = probs[:, 0, :] + T[0:1, :]                          # (B, L)
    for i in range(1, S):                                     # static unroll
        Z = pre[:, :, None] + T[None, :, :] + probs[:, i, :][:, None, :]
        m = jnp.max(Z, axis=1)                                # (B, L)
        pre = jnp.log(jnp.sum(jnp.exp(Z - m[:, None, :]), axis=1)) + m
    scores = pre + T[L - 1:L, :]                              # (B, L)
    m2 = jnp.max(scores, axis=1, keepdims=True)               # (B, 1)
    ps = jnp.log(jnp.sum(jnp.exp(scores - m2), axis=1, keepdims=True)) + m2

    loss_ref[...] = jnp.sum(ps - pr, axis=0, keepdims=True)   # (1, 1)


# ---------------------------------------------------------------------------
# Full forward: one pallas_call, no wrapper-side transposes
# ---------------------------------------------------------------------------
def rnn_forward(inputs, labels, p):
    vmem = pl.BlockSpec(memory_space=pltpu.MemorySpace.VMEM)
    loss = pl.pallas_call(
        fused_rnn_crf_kernel,
        out_shape=jax.ShapeDtypeStruct((1, 1), jnp.float32),
        in_specs=[vmem] * 14,
        out_specs=vmem,
        scratch_shapes=[pltpu.VMEM((BATCH, SEQ, 2 * HIDDEN), jnp.float32)],
    )(inputs, labels,
      p["wih_f"], p["wih_b"], p["b_f"], p["b_b"], p["whh"],
      p["w1"], p["b1"], p["w2"], p["b2"], p["w3"], p["b3"],
      p["transition"])
    return loss[0, 0]


# ---------------------------------------------------------------------------
# Deterministic parameter init (PyTorch shapes), then fuse for the kernel
# ---------------------------------------------------------------------------
def init_params(key):
    H, E, L = HIDDEN, EMBED, N_LABEL
    ks = jax.random.split(key, 16)

    def U(k, shape, scale):
        return jax.random.uniform(k, shape, jnp.float32, -scale, scale)

    s_lstm = 1.0 / float(H) ** 0.5
    # nn.LSTM(embed, hidden, bidirectional=True) parameters (PyTorch shapes)
    wih_f = U(ks[0], (4 * H, E), s_lstm)
    whh_f = U(ks[1], (4 * H, H), s_lstm)
    bih_f = U(ks[2], (4 * H,), s_lstm)
    bhh_f = U(ks[3], (4 * H,), s_lstm)
    wih_b = U(ks[4], (4 * H, E), s_lstm)
    whh_b = U(ks[5], (4 * H, H), s_lstm)
    bih_b = U(ks[6], (4 * H,), s_lstm)
    bhh_b = U(ks[7], (4 * H,), s_lstm)

    # classify: Linear(2H,64) -> Tanh -> Linear(64,32) -> Tanh -> Linear(32,L)
    s1 = 1.0 / float(2 * H) ** 0.5
    s2 = 1.0 / float(64) ** 0.5
    s3 = 1.0 / float(32) ** 0.5
    w1 = U(ks[8], (64, 2 * H), s1)
    b1 = U(ks[9], (64,), s1)
    w2 = U(ks[10], (32, 64), s2)
    b2 = U(ks[11], (32,), s2)
    w3 = U(ks[12], (L, 32), s3)
    b3 = U(ks[13], (L,), s3)

    transition = jax.random.uniform(ks[14], (L, L), jnp.float32, 0.0, 0.1)

    # ---- fuse LSTM weights for the merged-direction kernel ----
    def interleave_cols(a_f, a_b):
        # a_f, a_b: (..., 4H) with PyTorch gate blocks [i, f, g, o]
        # -> (..., 8H) with per-gate interleave [i_f i_b f_f f_b g_f g_b o_f o_b]
        parts = []
        for g in range(4):
            parts.append(a_f[..., g * H:(g + 1) * H])
            parts.append(a_b[..., g * H:(g + 1) * H])
        return jnp.concatenate(parts, axis=-1)

    z_e = jnp.zeros((E, 4 * H), jnp.float32)
    z_b = jnp.zeros((1, 4 * H), jnp.float32)
    z_h = jnp.zeros((H, 4 * H), jnp.float32)

    wih_f_fused = interleave_cols(wih_f.T, z_e)                  # (E, 8H)
    wih_b_fused = interleave_cols(z_e, wih_b.T)                  # (E, 8H)
    b_f_fused = interleave_cols((bih_f + bhh_f)[None, :], z_b)   # (1, 8H)
    b_b_fused = interleave_cols(z_b, (bih_b + bhh_b)[None, :])   # (1, 8H)
    whh_fused = interleave_cols(                                 # (2H, 8H)
        jnp.concatenate([whh_f.T, z_h], axis=0),   # rows = [h_fwd ; h_bwd]
        jnp.concatenate([z_h, whh_b.T], axis=0))   # block-diag per gate pair

    return {
        "wih_f": wih_f_fused, "wih_b": wih_b_fused,
        "b_f": b_f_fused, "b_b": b_b_fused, "whh": whh_fused,
        # classifier (transposed) + biases as (1, out)
        "w1": w1.T, "b1": b1.reshape(1, 64),
        "w2": w2.T, "b2": b2.reshape(1, 32),
        "w3": w3.T, "b3": b3.reshape(1, L),
        "transition": transition,
    }


if __name__ == "__main__":
    key = jax.random.PRNGKey(0)
    k_in, k_lab, k_par = jax.random.split(key, 3)
    inputs = jax.random.normal(k_in, (BATCH, SEQ, EMBED), jnp.float32)
    labels = jax.random.randint(k_lab, (BATCH, SEQ), 0, N_LABEL, jnp.int32)
    params = init_params(k_par)

    loss = jax.jit(rnn_forward)(inputs, labels, params)
    loss = jax.block_until_ready(loss)
    assert bool(jnp.isfinite(loss)), "loss is not finite"
    print("KERNEL_OK")
</pallas_src>

<mosaic_0001>
module attributes {stable_mosaic.version = 11 : i64} {
  func.func @fused_rnn_crf_kernel(%arg0: memref<2x8x16xf32, #tpu.memory_space<vmem>>, %arg1: memref<2x8xi32, #tpu.memory_space<vmem>>, %arg2: memref<16x256xf32, #tpu.memory_space<vmem>>, %arg3: memref<16x256xf32, #tpu.memory_space<vmem>>, %arg4: memref<1x256xf32, #tpu.memory_space<vmem>>, %arg5: memref<1x256xf32, #tpu.memory_space<vmem>>, %arg6: memref<64x256xf32, #tpu.memory_space<vmem>>, %arg7: memref<64x64xf32, #tpu.memory_space<vmem>>, %arg8: memref<1x64xf32, #tpu.memory_space<vmem>>, %arg9: memref<64x32xf32, #tpu.memory_space<vmem>>, %arg10: memref<1x32xf32, #tpu.memory_space<vmem>>, %arg11: memref<32x8xf32, #tpu.memory_space<vmem>>, %arg12: memref<1x8xf32, #tpu.memory_space<vmem>>, %arg13: memref<8x8xf32, #tpu.memory_space<vmem>>, %arg14: memref<1x1xf32, #tpu.memory_space<vmem>>, %arg15: memref<2x8x64xf32, #tpu.memory_space<vmem>>) attributes {dimension_semantics = [], scalar_prefetch = 0 : i64, scratch_operands = 1 : i64, tpu.core_type = #tpu.core_type<tc>} {
    %c0 = arith.constant 0 : index
    %c0_0 = arith.constant 0 : index
    %c0_1 = arith.constant 0 : index
    %0 = vector.load %arg0[%c0, %c0_0, %c0_1] : memref<2x8x16xf32, #tpu.memory_space<vmem>>, vector<2x8x16xf32>
    %1 = vector.shape_cast %0 : vector<2x8x16xf32> to vector<16x16xf32>
    %c0_2 = arith.constant 0 : index
    %c0_3 = arith.constant 0 : index
    %2 = vector.load %arg2[%c0_2, %c0_3] : memref<16x256xf32, #tpu.memory_space<vmem>>, vector<16x256xf32>
    %cst = arith.constant dense<0.000000e+00> : vector<16x256xf32>
    %3 = tpu.matmul %1, %2, %cst {dimension_numbers = #tpu.dot_dimension_numbers<[1], [0], [0], [1], [0, 0, 1, 1], [], []>} : vector<16x16xf32>, vector<16x256xf32>, vector<16x256xf32> -> vector<16x256xf32>
    %c0_4 = arith.constant 0 : index
    %c0_5 = arith.constant 0 : index
    %4 = vector.load %arg4[%c0_4, %c0_5] : memref<1x256xf32, #tpu.memory_space<vmem>>, vector<1x256xf32>
    %5 = vector.broadcast %4 : vector<1x256xf32> to vector<16x256xf32>
    %6 = arith.addf %3, %5 : vector<16x256xf32>
    %c0_6 = arith.constant 0 : index
    %c0_7 = arith.constant 0 : index
    %7 = vector.load %arg3[%c0_6, %c0_7] : memref<16x256xf32, #tpu.memory_space<vmem>>, vector<16x256xf32>
    %cst_8 = arith.constant dense<0.000000e+00> : vector<16x256xf32>
    %8 = tpu.matmul %1, %7, %cst_8 {dimension_numbers = #tpu.dot_dimension_numbers<[1], [0], [0], [1], [0, 0, 1, 1], [], []>} : vector<16x16xf32>, vector<16x256xf32>, vector<16x256xf32> -> vector<16x256xf32>
    %c0_9 = arith.constant 0 : index
    %c0_10 = arith.constant 0 : index
    %9 = vector.load %arg5[%c0_9, %c0_10] : memref<1x256xf32, #tpu.memory_space<vmem>>, vector<1x256xf32>
    %10 = vector.broadcast %9 : vector<1x256xf32> to vector<16x256xf32>
    %11 = arith.addf %8, %10 : vector<16x256xf32>
    %12 = vector.shape_cast %6 : vector<16x256xf32> to vector<2x8x256xf32>
    %13 = vector.shape_cast %11 : vector<16x256xf32> to vector<2x8x256xf32>
    %c0_11 = arith.constant 0 : index
    %c0_12 = arith.constant 0 : index
    %14 = vector.load %arg6[%c0_11, %c0_12] : memref<64x256xf32, #tpu.memory_space<vmem>>, vector<64x256xf32>
    %cst_13 = arith.constant 0.000000e+00 : f32
    %15 = vector.broadcast %cst_13 : f32 to vector<2x64xf32>
    %cst_14 = arith.constant 0.000000e+00 : f32
    %16 = vector.broadcast %cst_14 : f32 to vector<2x64xf32>
    %17 = vector.extract_strided_slice %12 {offsets = [0, 0, 0], sizes = [2, 1, 256], strides = [1, 1, 1]} : vector<2x8x256xf32> to vector<2x1x256xf32>
    %18 = vector.shape_cast %17 : vector<2x1x256xf32> to vector<2x256xf32>
    %19 = vector.extract_strided_slice %13 {offsets = [0, 7, 0], sizes = [2, 1, 256], strides = [1, 1, 1]} : vector<2x8x256xf32> to vector<2x1x256xf32>
    %20 = vector.shape_cast %19 : vector<2x1x256xf32> to vector<2x256xf32>
    %21 = arith.addf %18, %20 : vector<2x256xf32>
    %cst_15 = arith.constant dense<0.000000e+00> : vector<2x256xf32>
    %22 = tpu.matmul %15, %14, %cst_15 {dimension_numbers = #tpu.dot_dimension_numbers<[1], [0], [0], [1], [0, 0, 1, 1], [], []>} : vector<2x64xf32>, vector<64x256xf32>, vector<2x256xf32> -> vector<2x256xf32>
    %23 = arith.addf %21, %22 : vector<2x256xf32>
    %24 = vector.extract_strided_slice %23 {offsets = [0, 0], sizes = [2, 64], strides = [1, 1]} : vector<2x256xf32> to vector<2x64xf32>
    %cst_16 = arith.constant 5.000000e-01 : f32
    %25 = vector.broadcast %cst_16 : f32 to vector<2x64xf32>
    %26 = arith.mulf %25, %24 : vector<2x64xf32>
    %27 = math.tanh %26 : vector<2x64xf32>
    %cst_17 = arith.constant 1.000000e+00 : f32
    %28 = vector.broadcast %cst_17 : f32 to vector<2x64xf32>
    %29 = arith.addf %27, %28 : vector<2x64xf32>
    %cst_18 = arith.constant 5.000000e-01 : f32
    %30 = vector.broadcast %cst_18 : f32 to vector<2x64xf32>
    %31 = arith.mulf %30, %29 : vector<2x64xf32>
    %32 = vector.extract_strided_slice %23 {offsets = [0, 64], sizes = [2, 64], strides = [1, 1]} : vector<2x256xf32> to vector<2x64xf32>
    %cst_19 = arith.constant 5.000000e-01 : f32
    %33 = vector.broadcast %cst_19 : f32 to vector<2x64xf32>
    %34 = arith.mulf %33, %32 : vector<2x64xf32>
    %35 = math.tanh %34 : vector<2x64xf32>
    %cst_20 = arith.constant 1.000000e+00 : f32
    %36 = vector.broadcast %cst_20 : f32 to vector<2x64xf32>
    %37 = arith.addf %35, %36 : vector<2x64xf32>
    %cst_21 = arith.constant 5.000000e-01 : f32
    %38 = vector.broadcast %cst_21 : f32 to vector<2x64xf32>
    %39 = arith.mulf %38, %37 : vector<2x64xf32>
    %40 = vector.extract_strided_slice %23 {offsets = [0, 128], sizes = [2, 64], strides = [1, 1]} : vector<2x256xf32> to vector<2x64xf32>
    %41 = math.tanh %40 : vector<2x64xf32>
    %42 = vector.extract_strided_slice %23 {offsets = [0, 192], sizes = [2, 64], strides = [1, 1]} : vector<2x256xf32> to vector<2x64xf32>
    %cst_22 = arith.constant 5.000000e-01 : f32
    %43 = vector.broadcast %cst_22 : f32 to vector<2x64xf32>
    %44 = arith.mulf %43, %42 : vector<2x64xf32>
    %45 = math.tanh %44 : vector<2x64xf32>
    %cst_23 = arith.constant 1.000000e+00 : f32
    %46 = vector.broadcast %cst_23 : f32 to vector<2x64xf32>
    %47 = arith.addf %45, %46 : vector<2x64xf32>
    %cst_24 = arith.constant 5.000000e-01 : f32
    %48 = vector.broadcast %cst_24 : f32 to vector<2x64xf32>
    %49 = arith.mulf %48, %47 : vector<2x64xf32>
    %50 = arith.mulf %39, %16 : vector<2x64xf32>
    %51 = arith.mulf %31, %41 : vector<2x64xf32>
    %52 = arith.addf %50, %51 : vector<2x64xf32>
    %53 = math.tanh %52 : vector<2x64xf32>
    %54 = arith.mulf %49, %53 : vector<2x64xf32>
    %55 = vector.extract_strided_slice %12 {offsets = [0, 1, 0], sizes = [2, 1, 256], strides = [1, 1, 1]} : vector<2x8x256xf32> to vector<2x1x256xf32>
    %56 = vector.shape_cast %55 : vector<2x1x256xf32> to vector<2x256xf32>
    %57 = vector.extract_strided_slice %13 {offsets = [0, 6, 0], sizes = [2, 1, 256], strides = [1, 1, 1]} : vector<2x8x256xf32> to vector<2x1x256xf32>
    %58 = vector.shape_cast %57 : vector<2x1x256xf32> to vector<2x256xf32>
    %59 = arith.addf %56, %58 : vector<2x256xf32>
    %cst_25 = arith.constant dense<0.000000e+00> : vector<2x256xf32>
    %60 = tpu.matmul %54, %14, %cst_25 {dimension_numbers = #tpu.dot_dimension_numbers<[1], [0], [0], [1], [0, 0, 1, 1], [], []>} : vector<2x64xf32>, vector<64x256xf32>, vector<2x256xf32> -> vector<2x256xf32>
    %61 = arith.addf %59, %60 : vector<2x256xf32>
    %62 = vector.extract_strided_slice %61 {offsets = [0, 0], sizes = [2, 64], strides = [1, 1]} : vector<2x256xf32> to vector<2x64xf32>
    %cst_26 = arith.constant 5.000000e-01 : f32
    %63 = vector.broadcast %cst_26 : f32 to vector<2x64xf32>
    %64 = arith.mulf %63, %62 : vector<2x64xf32>
    %65 = math.tanh %64 : vector<2x64xf32>
    %cst_27 = arith.constant 1.000000e+00 : f32
    %66 = vector.broadcast %cst_27 : f32 to vector<2x64xf32>
    %67 = arith.addf %65, %66 : vector<2x64xf32>
    %cst_28 = arith.constant 5.000000e-01 : f32
    %68 = vector.broadcast %cst_28 : f32 to vector<2x64xf32>
    %69 = arith.mulf %68, %67 : vector<2x64xf32>
    %70 = vector.extract_strided_slice %61 {offsets = [0, 64], sizes = [2, 64], strides = [1, 1]} : vector<2x256xf32> to vector<2x64xf32>
    %cst_29 = arith.constant 5.000000e-01 : f32
    %71 = vector.broadcast %cst_29 : f32 to vector<2x64xf32>
    %72 = arith.mulf %71, %70 : vector<2x64xf32>
    %73 = math.tanh %72 : vector<2x64xf32>
    %cst_30 = arith.constant 1.000000e+00 : f32
    %74 = vector.broadcast %cst_30 : f32 to vector<2x64xf32>
    %75 = arith.addf %73, %74 : vector<2x64xf32>
    %cst_31 = arith.constant 5.000000e-01 : f32
    %76 = vector.broadcast %cst_31 : f32 to vector<2x64xf32>
    %77 = arith.mulf %76, %75 : vector<2x64xf32>
    %78 = vector.extract_strided_slice %61 {offsets = [0, 128], sizes = [2, 64], strides = [1, 1]} : vector<2x256xf32> to vector<2x64xf32>
    %79 = math.tanh %78 : vector<2x64xf32>
    %80 = vector.extract_strided_slice %61 {offsets = [0, 192], sizes = [2, 64], strides = [1, 1]} : vector<2x256xf32> to vector<2x64xf32>
    %cst_32 = arith.constant 5.000000e-01 : f32
    %81 = vector.broadcast %cst_32 : f32 to vector<2x64xf32>
    %82 = arith.mulf %81, %80 : vector<2x64xf32>
    %83 = math.tanh %82 : vector<2x64xf32>
    %cst_33 = arith.constant 1.000000e+00 : f32
    %84 = vector.broadcast %cst_33 : f32 to vector<2x64xf32>
    %85 = arith.addf %83, %84 : vector<2x64xf32>
    %cst_34 = arith.constant 5.000000e-01 : f32
    %86 = vector.broadcast %cst_34 : f32 to vector<2x64xf32>
    %87 = arith.mulf %86, %85 : vector<2x64xf32>
    %88 = arith.mulf %77, %52 : vector<2x64xf32>
    %89 = arith.mulf %69, %79 : vector<2x64xf32>
    %90 = arith.addf %88, %89 : vector<2x64xf32>
    %91 = math.tanh %90 : vector<2x64xf32>
    %92 = arith.mulf %87, %91 : vector<2x64xf32>
    %93 = vector.extract_strided_slice %12 {offsets = [0, 2, 0], sizes = [2, 1, 256], strides = [1, 1, 1]} : vector<2x8x256xf32> to vector<2x1x256xf32>
    %94 = vector.shape_cast %93 : vector<2x1x256xf32> to vector<2x256xf32>
    %95 = vector.extract_strided_slice %13 {offsets = [0, 5, 0], sizes = [2, 1, 256], strides = [1, 1, 1]} : vector<2x8x256xf32> to vector<2x1x256xf32>
    %96 = vector.shape_cast %95 : vector<2x1x256xf32> to vector<2x256xf32>
    %97 = arith.addf %94, %96 : vector<2x256xf32>
    %cst_35 = arith.constant dense<0.000000e+00> : vector<2x256xf32>
    %98 = tpu.matmul %92, %14, %cst_35 {dimension_numbers = #tpu.dot_dimension_numbers<[1], [0], [0], [1], [0, 0, 1, 1], [], []>} : vector<2x64xf32>, vector<64x256xf32>, vector<2x256xf32> -> vector<2x256xf32>
    %99 = arith.addf %97, %98 : vector<2x256xf32>
    %100 = vector.extract_strided_slice %99 {offsets = [0, 0], sizes = [2, 64], strides = [1, 1]} : vector<2x256xf32> to vector<2x64xf32>
    %cst_36 = arith.constant 5.000000e-01 : f32
    %101 = vector.broadcast %cst_36 : f32 to vector<2x64xf32>
    %102 = arith.mulf %101, %100 : vector<2x64xf32>
    %103 = math.tanh %102 : vector<2x64xf32>
    %cst_37 = arith.constant 1.000000e+00 : f32
    %104 = vector.broadcast %cst_37 : f32 to vector<2x64xf32>
    %105 = arith.addf %103, %104 : vector<2x64xf32>
    %cst_38 = arith.constant 5.000000e-01 : f32
    %106 = vector.broadcast %cst_38 : f32 to vector<2x64xf32>
    %107 = arith.mulf %106, %105 : vector<2x64xf32>
    %108 = vector.extract_strided_slice %99 {offsets = [0, 64], sizes = [2, 64], strides = [1, 1]} : vector<2x256xf32> to vector<2x64xf32>
    %cst_39 = arith.constant 5.000000e-01 : f32
    %109 = vector.broadcast %cst_39 : f32 to vector<2x64xf32>
    %110 = arith.mulf %109, %108 : vector<2x64xf32>
    %111 = math.tanh %110 : vector<2x64xf32>
    %cst_40 = arith.constant 1.000000e+00 : f32
    %112 = vector.broadcast %cst_40 : f32 to vector<2x64xf32>
    %113 = arith.addf %111, %112 : vector<2x64xf32>
    %cst_41 = arith.constant 5.000000e-01 : f32
    %114 = vector.broadcast %cst_41 : f32 to vector<2x64xf32>
    %115 = arith.mulf %114, %113 : vector<2x64xf32>
    %116 = vector.extract_strided_slice %99 {offsets = [0, 128], sizes = [2, 64], strides = [1, 1]} : vector<2x256xf32> to vector<2x64xf32>
    %117 = math.tanh %116 : vector<2x64xf32>
    %118 = vector.extract_strided_slice %99 {offsets = [0, 192], sizes = [2, 64], strides = [1, 1]} : vector<2x256xf32> to vector<2x64xf32>
    %cst_42 = arith.constant 5.000000e-01 : f32
    %119 = vector.broadcast %cst_42 : f32 to vector<2x64xf32>
    %120 = arith.mulf %119, %118 : vector<2x64xf32>
    %121 = math.tanh %120 : vector<2x64xf32>
    %cst_43 = arith.constant 1.000000e+00 : f32
    %122 = vector.broadcast %cst_43 : f32 to vector<2x64xf32>
    %123 = arith.addf %121, %122 : vector<2x64xf32>
    %cst_44 = arith.constant 5.000000e-01 : f32
    %124 = vector.broadcast %cst_44 : f32 to vector<2x64xf32>
    %125 = arith.mulf %124, %123 : vector<2x64xf32>
    %126 = arith.mulf %115, %90 : vector<2x64xf32>
    %127 = arith.mulf %107, %117 : vector<2x64xf32>
    %128 = arith.addf %126, %127 : vector<2x64xf32>
    %129 = math.tanh %128 : vector<2x64xf32>
    %130 = arith.mulf %125, %129 : vector<2x64xf32>
    %131 = vector.extract_strided_slice %12 {offsets = [0, 3, 0], sizes = [2, 1, 256], strides = [1, 1, 1]} : vector<2x8x256xf32> to vector<2x1x256xf32>
    %132 = vector.shape_cast %131 : vector<2x1x256xf32> to vector<2x256xf32>
    %133 = vector.extract_strided_slice %13 {offsets = [0, 4, 0], sizes = [2, 1, 256], strides = [1, 1, 1]} : vector<2x8x256xf32> to vector<2x1x256xf32>
    %134 = vector.shape_cast %133 : vector<2x1x256xf32> to vector<2x256xf32>
    %135 = arith.addf %132, %134 : vector<2x256xf32>
    %cst_45 = arith.constant dense<0.000000e+00> : vector<2x256xf32>
    %136 = tpu.matmul %130, %14, %cst_45 {dimension_numbers = #tpu.dot_dimension_numbers<[1], [0], [0], [1], [0, 0, 1, 1], [], []>} : vector<2x64xf32>, vector<64x256xf32>, vector<2x256xf32> -> vector<2x256xf32>
    %137 = arith.addf %135, %136 : vector<2x256xf32>
    %138 = vector.extract_strided_slice %137 {offsets = [0, 0], sizes = [2, 64], strides = [1, 1]} : vector<2x256xf32> to vector<2x64xf32>
    %cst_46 = arith.constant 5.000000e-01 : f32
    %139 = vector.broadcast %cst_46 : f32 to vector<2x64xf32>
    %140 = arith.mulf %139, %138 : vector<2x64xf32>
    %141 = math.tanh %140 : vector<2x64xf32>
    %cst_47 = arith.constant 1.000000e+00 : f32
    %142 = vector.broadcast %cst_47 : f32 to vector<2x64xf32>
    %143 = arith.addf %141, %142 : vector<2x64xf32>
    %cst_48 = arith.constant 5.000000e-01 : f32
    %144 = vector.broadcast %cst_48 : f32 to vector<2x64xf32>
    %145 = arith.mulf %144, %143 : vector<2x64xf32>
    %146 = vector.extract_strided_slice %137 {offsets = [0, 64], sizes = [2, 64], strides = [1, 1]} : vector<2x256xf32> to vector<2x64xf32>
    %cst_49 = arith.constant 5.000000e-01 : f32
    %147 = vector.broadcast %cst_49 : f32 to vector<2x64xf32>
    %148 = arith.mulf %147, %146 : vector<2x64xf32>
    %149 = math.tanh %148 : vector<2x64xf32>
    %cst_50 = arith.constant 1.000000e+00 : f32
    %150 = vector.broadcast %cst_50 : f32 to vector<2x64xf32>
    %151 = arith.addf %149, %150 : vector<2x64xf32>
    %cst_51 = arith.constant 5.000000e-01 : f32
    %152 = vector.broadcast %cst_51 : f32 to vector<2x64xf32>
    %153 = arith.mulf %152, %151 : vector<2x64xf32>
    %154 = vector.extract_strided_slice %137 {offsets = [0, 128], sizes = [2, 64], strides = [1, 1]} : vector<2x256xf32> to vector<2x64xf32>
    %155 = math.tanh %154 : vector<2x64xf32>
    %156 = vector.extract_strided_slice %137 {offsets = [0, 192], sizes = [2, 64], strides = [1, 1]} : vector<2x256xf32> to vector<2x64xf32>
    %cst_52 = arith.constant 5.000000e-01 : f32
    %157 = vector.broadcast %cst_52 : f32 to vector<2x64xf32>
    %158 = arith.mulf %157, %156 : vector<2x64xf32>
    %159 = math.tanh %158 : vector<2x64xf32>
    %cst_53 = arith.constant 1.000000e+00 : f32
    %160 = vector.broadcast %cst_53 : f32 to vector<2x64xf32>
    %161 = arith.addf %159, %160 : vector<2x64xf32>
    %cst_54 = arith.constant 5.000000e-01 : f32
    %162 = vector.broadcast %cst_54 : f32 to vector<2x64xf32>
    %163 = arith.mulf %162, %161 : vector<2x64xf32>
    %164 = arith.mulf %153, %128 : vector<2x64xf32>
    %165 = arith.mulf %145, %155 : vector<2x64xf32>
    %166 = arith.addf %164, %165 : vector<2x64xf32>
    %167 = math.tanh %166 : vector<2x64xf32>
    %168 = arith.mulf %163, %167 : vector<2x64xf32>
    %169 = vector.extract_strided_slice %12 {offsets = [0, 4, 0], sizes = [2, 1, 256], strides = [1, 1, 1]} : vector<2x8x256xf32> to vector<2x1x256xf32>
    %170 = vector.shape_cast %169 : vector<2x1x256xf32> to vector<2x256xf32>
    %171 = vector.extract_strided_slice %13 {offsets = [0, 3, 0], sizes = [2, 1, 256], strides = [1, 1, 1]} : vector<2x8x256xf32> to vector<2x1x256xf32>
    %172 = vector.shape_cast %171 : vector<2x1x256xf32> to vector<2x256xf32>
    %173 = arith.addf %170, %172 : vector<2x256xf32>
    %cst_55 = arith.constant dense<0.000000e+00> : vector<2x256xf32>
    %174 = tpu.matmul %168, %14, %cst_55 {dimension_numbers = #tpu.dot_dimension_numbers<[1], [0], [0], [1], [0, 0, 1, 1], [], []>} : vector<2x64xf32>, vector<64x256xf32>, vector<2x256xf32> -> vector<2x256xf32>
    %175 = arith.addf %173, %174 : vector<2x256xf32>
    %176 = vector.extract_strided_slice %175 {offsets = [0, 0], sizes = [2, 64], strides = [1, 1]} : vector<2x256xf32> to vector<2x64xf32>
    %cst_56 = arith.constant 5.000000e-01 : f32
    %177 = vector.broadcast %cst_56 : f32 to vector<2x64xf32>
    %178 = arith.mulf %177, %176 : vector<2x64xf32>
    %179 = math.tanh %178 : vector<2x64xf32>
    %cst_57 = arith.constant 1.000000e+00 : f32
    %180 = vector.broadcast %cst_57 : f32 to vector<2x64xf32>
    %181 = arith.addf %179, %180 : vector<2x64xf32>
    %cst_58 = arith.constant 5.000000e-01 : f32
    %182 = vector.broadcast %cst_58 : f32 to vector<2x64xf32>
    %183 = arith.mulf %182, %181 : vector<2x64xf32>
    %184 = vector.extract_strided_slice %175 {offsets = [0, 64], sizes = [2, 64], strides = [1, 1]} : vector<2x256xf32> to vector<2x64xf32>
    %cst_59 = arith.constant 5.000000e-01 : f32
    %185 = vector.broadcast %cst_59 : f32 to vector<2x64xf32>
    %186 = arith.mulf %185, %184 : vector<2x64xf32>
    %187 = math.tanh %186 : vector<2x64xf32>
    %cst_60 = arith.constant 1.000000e+00 : f32
    %188 = vector.broadcast %cst_60 : f32 to vector<2x64xf32>
    %189 = arith.addf %187, %188 : vector<2x64xf32>
    %cst_61 = arith.constant 5.000000e-01 : f32
    %190 = vector.broadcast %cst_61 : f32 to vector<2x64xf32>
    %191 = arith.mulf %190, %189 : vector<2x64xf32>
    %192 = vector.extract_strided_slice %175 {offsets = [0, 128], sizes = [2, 64], strides = [1, 1]} : vector<2x256xf32> to vector<2x64xf32>
    %193 = math.tanh %192 : vector<2x64xf32>
    %194 = vector.extract_strided_slice %175 {offsets = [0, 192], sizes = [2, 64], strides = [1, 1]} : vector<2x256xf32> to vector<2x64xf32>
    %cst_62 = arith.constant 5.000000e-01 : f32
    %195 = vector.broadcast %cst_62 : f32 to vector<2x64xf32>
    %196 = arith.mulf %195, %194 : vector<2x64xf32>
    %197 = math.tanh %196 : vector<2x64xf32>
    %cst_63 = arith.constant 1.000000e+00 : f32
    %198 = vector.broadcast %cst_63 : f32 to vector<2x64xf32>
    %199 = arith.addf %197, %198 : vector<2x64xf32>
    %cst_64 = arith.constant 5.000000e-01 : f32
    %200 = vector.broadcast %cst_64 : f32 to vector<2x64xf32>
    %201 = arith.mulf %200, %199 : vector<2x64xf32>
    %202 = arith.mulf %191, %166 : vector<2x64xf32>
    %203 = arith.mulf %183, %193 : vector<2x64xf32>
    %204 = arith.addf %202, %203 : vector<2x64xf32>
    %205 = math.tanh %204 : vector<2x64xf32>
    %206 = arith.mulf %201, %205 : vector<2x64xf32>
    %207 = vector.extract_strided_slice %12 {offsets = [0, 5, 0], sizes = [2, 1, 256], strides = [1, 1, 1]} : vector<2x8x256xf32> to vector<2x1x256xf32>
    %208 = vector.shape_cast %207 : vector<2x1x256xf32> to vector<2x256xf32>
    %209 = vector.extract_strided_slice %13 {offsets = [0, 2, 0], sizes = [2, 1, 256], strides = [1, 1, 1]} : vector<2x8x256xf32> to vector<2x1x256xf32>
    %210 = vector.shape_cast %209 : vector<2x1x256xf32> to vector<2x256xf32>
    %211 = arith.addf %208, %210 : vector<2x256xf32>
    %cst_65 = arith.constant dense<0.000000e+00> : vector<2x256xf32>
    %212 = tpu.matmul %206, %14, %cst_65 {dimension_numbers = #tpu.dot_dimension_numbers<[1], [0], [0], [1], [0, 0, 1, 1], [], []>} : vector<2x64xf32>, vector<64x256xf32>, vector<2x256xf32> -> vector<2x256xf32>
    %213 = arith.addf %211, %212 : vector<2x256xf32>
    %214 = vector.extract_strided_slice %213 {offsets = [0, 0], sizes = [2, 64], strides = [1, 1]} : vector<2x256xf32> to vector<2x64xf32>
    %cst_66 = arith.constant 5.000000e-01 : f32
    %215 = vector.broadcast %cst_66 : f32 to vector<2x64xf32>
    %216 = arith.mulf %215, %214 : vector<2x64xf32>
    %217 = math.tanh %216 : vector<2x64xf32>
    %cst_67 = arith.constant 1.000000e+00 : f32
    %218 = vector.broadcast %cst_67 : f32 to vector<2x64xf32>
    %219 = arith.addf %217, %218 : vector<2x64xf32>
    %cst_68 = arith.constant 5.000000e-01 : f32
    %220 = vector.broadcast %cst_68 : f32 to vector<2x64xf32>
    %221 = arith.mulf %220, %219 : vector<2x64xf32>
    %222 = vector.extract_strided_slice %213 {offsets = [0, 64], sizes = [2, 64], strides = [1, 1]} : vector<2x256xf32> to vector<2x64xf32>
    %cst_69 = arith.constant 5.000000e-01 : f32
    %223 = vector.broadcast %cst_69 : f32 to vector<2x64xf32>
    %224 = arith.mulf %223, %222 : vector<2x64xf32>
    %225 = math.tanh %224 : vector<2x64xf32>
    %cst_70 = arith.constant 1.000000e+00 : f32
    %226 = vector.broadcast %cst_70 : f32 to vector<2x64xf32>
    %227 = arith.addf %225, %226 : vector<2x64xf32>
    %cst_71 = arith.constant 5.000000e-01 : f32
    %228 = vector.broadcast %cst_71 : f32 to vector<2x64xf32>
    %229 = arith.mulf %228, %227 : vector<2x64xf32>
    %230 = vector.extract_strided_slice %213 {offsets = [0, 128], sizes = [2, 64], strides = [1, 1]} : vector<2x256xf32> to vector<2x64xf32>
    %231 = math.tanh %230 : vector<2x64xf32>
    %232 = vector.extract_strided_slice %213 {offsets = [0, 192], sizes = [2, 64], strides = [1, 1]} : vector<2x256xf32> to vector<2x64xf32>
    %cst_72 = arith.constant 5.000000e-01 : f32
    %233 = vector.broadcast %cst_72 : f32 to vector<2x64xf32>
    %234 = arith.mulf %233, %232 : vector<2x64xf32>
    %235 = math.tanh %234 : vector<2x64xf32>
    %cst_73 = arith.constant 1.000000e+00 : f32
    %236 = vector.broadcast %cst_73 : f32 to vector<2x64xf32>
    %237 = arith.addf %235, %236 : vector<2x64xf32>
    %cst_74 = arith.constant 5.000000e-01 : f32
    %238 = vector.broadcast %cst_74 : f32 to vector<2x64xf32>
    %239 = arith.mulf %238, %237 : vector<2x64xf32>
    %240 = arith.mulf %229, %204 : vector<2x64xf32>
    %241 = arith.mulf %221, %231 : vector<2x64xf32>
    %242 = arith.addf %240, %241 : vector<2x64xf32>
    %243 = math.tanh %242 : vector<2x64xf32>
    %244 = arith.mulf %239, %243 : vector<2x64xf32>
    %245 = vector.extract_strided_slice %12 {offsets = [0, 6, 0], sizes = [2, 1, 256], strides = [1, 1, 1]} : vector<2x8x256xf32> to vector<2x1x256xf32>
    %246 = vector.shape_cast %245 : vector<2x1x256xf32> to vector<2x256xf32>
    %247 = vector.extract_strided_slice %13 {offsets = [0, 1, 0], sizes = [2, 1, 256], strides = [1, 1, 1]} : vector<2x8x256xf32> to vector<2x1x256xf32>
    %248 = vector.shape_cast %247 : vector<2x1x256xf32> to vector<2x256xf32>
    %249 = arith.addf %246, %248 : vector<2x256xf32>
    %cst_75 = arith.constant dense<0.000000e+00> : vector<2x256xf32>
    %250 = tpu.matmul %244, %14, %cst_75 {dimension_numbers = #tpu.dot_dimension_numbers<[1], [0], [0], [1], [0, 0, 1, 1], [], []>} : vector<2x64xf32>, vector<64x256xf32>, vector<2x256xf32> -> vector<2x256xf32>
    %251 = arith.addf %249, %250 : vector<2x256xf32>
    %252 = vector.extract_strided_slice %251 {offsets = [0, 0], sizes = [2, 64], strides = [1, 1]} : vector<2x256xf32> to vector<2x64xf32>
    %cst_76 = arith.constant 5.000000e-01 : f32
    %253 = vector.broadcast %cst_76 : f32 to vector<2x64xf32>
    %254 = arith.mulf %253, %252 : vector<2x64xf32>
    %255 = math.tanh %254 : vector<2x64xf32>
    %cst_77 = arith.constant 1.000000e+00 : f32
    %256 = vector.broadcast %cst_77 : f32 to vector<2x64xf32>
    %257 = arith.addf %255, %256 : vector<2x64xf32>
    %cst_78 = arith.constant 5.000000e-01 : f32
    %258 = vector.broadcast %cst_78 : f32 to vector<2x64xf32>
    %259 = arith.mulf %258, %257 : vector<2x64xf32>
    %260 = vector.extract_strided_slice %251 {offsets = [0, 64], sizes = [2, 64], strides = [1, 1]} : vector<2x256xf32> to vector<2x64xf32>
    %cst_79 = arith.constant 5.000000e-01 : f32
    %261 = vector.broadcast %cst_79 : f32 to vector<2x64xf32>
    %262 = arith.mulf %261, %260 : vector<2x64xf32>
    %263 = math.tanh %262 : vector<2x64xf32>
    %cst_80 = arith.constant 1.000000e+00 : f32
    %264 = vector.broadcast %cst_80 : f32 to vector<2x64xf32>
    %265 = arith.addf %263, %264 : vector<2x64xf32>
    %cst_81 = arith.constant 5.000000e-01 : f32
    %266 = vector.broadcast %cst_81 : f32 to vector<2x64xf32>
    %267 = arith.mulf %266, %265 : vector<2x64xf32>
    %268 = vector.extract_strided_slice %251 {offsets = [0, 128], sizes = [2, 64], strides = [1, 1]} : vector<2x256xf32> to vector<2x64xf32>
    %269 = math.tanh %268 : vector<2x64xf32>
    %270 = vector.extract_strided_slice %251 {offsets = [0, 192], sizes = [2, 64], strides = [1, 1]} : vector<2x256xf32> to vector<2x64xf32>
    %cst_82 = arith.constant 5.000000e-01 : f32
    %271 = vector.broadcast %cst_82 : f32 to vector<2x64xf32>
    %272 = arith.mulf %271, %270 : vector<2x64xf32>
    %273 = math.tanh %272 : vector<2x64xf32>
    %cst_83 = arith.constant 1.000000e+00 : f32
    %274 = vector.broadcast %cst_83 : f32 to vector<2x64xf32>
    %275 = arith.addf %273, %274 : vector<2x64xf32>
    %cst_84 = arith.constant 5.000000e-01 : f32
    %276 = vector.broadcast %cst_84 : f32 to vector<2x64xf32>
    %277 = arith.mulf %276, %275 : vector<2x64xf32>
    %278 = arith.mulf %267, %242 : vector<2x64xf32>
    %279 = arith.mulf %259, %269 : vector<2x64xf32>
    %280 = arith.addf %278, %279 : vector<2x64xf32>
    %281 = math.tanh %280 : vector<2x64xf32>
    %282 = arith.mulf %277, %281 : vector<2x64xf32>
    %283 = vector.extract_strided_slice %12 {offsets = [0, 7, 0], sizes = [2, 1, 256], strides = [1, 1, 1]} : vector<2x8x256xf32> to vector<2x1x256xf32>
    %284 = vector.shape_cast %283 : vector<2x1x256xf32> to vector<2x256xf32>
    %285 = vector.extract_strided_slice %13 {offsets = [0, 0, 0], sizes = [2, 1, 256], strides = [1, 1, 1]} : vector<2x8x256xf32> to vector<2x1x256xf32>
    %286 = vector.shape_cast %285 : vector<2x1x256xf32> to vector<2x256xf32>
    %287 = arith.addf %284, %286 : vector<2x256xf32>
    %cst_85 = arith.constant dense<0.000000e+00> : vector<2x256xf32>
    %288 = tpu.matmul %282, %14, %cst_85 {dimension_numbers = #tpu.dot_dimension_numbers<[1], [0], [0], [1], [0, 0, 1, 1], [], []>} : vector<2x64xf32>, vector<64x256xf32>, vector<2x256xf32> -> vector<2x256xf32>
    %289 = arith.addf %287, %288 : vector<2x256xf32>
    %290 = vector.extract_strided_slice %289 {offsets = [0, 0], sizes = [2, 64], strides = [1, 1]} : vector<2x256xf32> to vector<2x64xf32>
    %cst_86 = arith.constant 5.000000e-01 : f32
    %291 = vector.broadcast %cst_86 : f32 to vector<2x64xf32>
    %292 = arith.mulf %291, %290 : vector<2x64xf32>
    %293 = math.tanh %292 : vector<2x64xf32>
    %cst_87 = arith.constant 1.000000e+00 : f32
    %294 = vector.broadcast %cst_87 : f32 to vector<2x64xf32>
    %295 = arith.addf %293, %294 : vector<2x64xf32>
    %cst_88 = arith.constant 5.000000e-01 : f32
    %296 = vector.broadcast %cst_88 : f32 to vector<2x64xf32>
    %297 = arith.mulf %296, %295 : vector<2x64xf32>
    %298 = vector.extract_strided_slice %289 {offsets = [0, 64], sizes = [2, 64], strides = [1, 1]} : vector<2x256xf32> to vector<2x64xf32>
    %cst_89 = arith.constant 5.000000e-01 : f32
    %299 = vector.broadcast %cst_89 : f32 to vector<2x64xf32>
    %300 = arith.mulf %299, %298 : vector<2x64xf32>
    %301 = math.tanh %300 : vector<2x64xf32>
    %cst_90 = arith.constant 1.000000e+00 : f32
    %302 = vector.broadcast %cst_90 : f32 to vector<2x64xf32>
    %303 = arith.addf %301, %302 : vector<2x64xf32>
    %cst_91 = arith.constant 5.000000e-01 : f32
    %304 = vector.broadcast %cst_91 : f32 to vector<2x64xf32>
    %305 = arith.mulf %304, %303 : vector<2x64xf32>
    %306 = vector.extract_strided_slice %289 {offsets = [0, 128], sizes = [2, 64], strides = [1, 1]} : vector<2x256xf32> to vector<2x64xf32>
    %307 = math.tanh %306 : vector<2x64xf32>
    %308 = vector.extract_strided_slice %289 {offsets = [0, 192], sizes = [2, 64], strides = [1, 1]} : vector<2x256xf32> to vector<2x64xf32>
    %cst_92 = arith.constant 5.000000e-01 : f32
    %309 = vector.broadcast %cst_92 : f32 to vector<2x64xf32>
    %310 = arith.mulf %309, %308 : vector<2x64xf32>
    %311 = math.tanh %310 : vector<2x64xf32>
    %cst_93 = arith.constant 1.000000e+00 : f32
    %312 = vector.broadcast %cst_93 : f32 to vector<2x64xf32>
    %313 = arith.addf %311, %312 : vector<2x64xf32>
    %cst_94 = arith.constant 5.000000e-01 : f32
    %314 = vector.broadcast %cst_94 : f32 to vector<2x64xf32>
    %315 = arith.mulf %314, %313 : vector<2x64xf32>
    %316 = arith.mulf %305, %280 : vector<2x64xf32>
    %317 = arith.mulf %297, %307 : vector<2x64xf32>
    %318 = arith.addf %316, %317 : vector<2x64xf32>
    %319 = math.tanh %318 : vector<2x64xf32>
    %320 = arith.mulf %315, %319 : vector<2x64xf32>
    %321 = tpu.iota {dimensions = array<i32: 1>} : vector<2x64xi32>
    %c32_i32 = arith.constant 32 : i32
    %322 = vector.broadcast %c32_i32 : i32 to vector<2x64xi32>
    %323 = arith.cmpi slt, %321, %322 : vector<2x64xi32>
    %324 = arith.select %323, %54, %320 : vector<2x64xi1>, vector<2x64xf32>
    %c0_95 = arith.constant 0 : index
    %c0_96 = arith.constant 0 : index
    %c0_97 = arith.constant 0 : index
    %325 = vector.load %arg15[%c0_95, %c0_96, %c0_97] : memref<2x8x64xf32, #tpu.memory_space<vmem>>, vector<2x1x64xf32>
    %326 = vector.shape_cast %325 : vector<2x1x64xf32> to vector<2x64xf32>
    %327 = vector.shape_cast %324 : vector<2x64xf32> to vector<2x1x64xf32>
    tpu.vector_store %arg15[%c0_95, %c0_96, %c0_97], %327 {strides = array<i32>} : memref<2x8x64xf32, #tpu.memory_space<vmem>>, vector<2x1x64xf32>,
    %328 = arith.select %323, %92, %282 : vector<2x64xi1>, vector<2x64xf32>
    %c0_98 = arith.constant 0 : index
    %c1 = arith.constant 1 : index
    %c0_99 = arith.constant 0 : index
    %329 = vector.load %arg15[%c0_98, %c1, %c0_99] : memref<2x8x64xf32, #tpu.memory_space<vmem>>, vector<2x1x64xf32>
    %330 = vector.shape_cast %329 : vector<2x1x64xf32> to vector<2x64xf32>
    %331 = vector.shape_cast %328 : vector<2x64xf32> to vector<2x1x64xf32>
    tpu.vector_store %arg15[%c0_98, %c1, %c0_99], %331 {strides = array<i32>} : memref<2x8x64xf32, #tpu.memory_space<vmem>>, vector<2x1x64xf32>,
    %332 = arith.select %323, %130, %244 : vector<2x64xi1>, vector<2x64xf32>
    %c0_100 = arith.constant 0 : index
    %c2 = arith.constant 2 : index
    %c0_101 = arith.constant 0 : index
    %333 = vector.load %arg15[%c0_100, %c2, %c0_101] : memref<2x8x64xf32, #tpu.memory_space<vmem>>, vector<2x1x64xf32>
    %334 = vector.shape_cast %333 : vector<2x1x64xf32> to vector<2x64xf32>
    %335 = vector.shape_cast %332 : vector<2x64xf32> to vector<2x1x64xf32>
    tpu.vector_store %arg15[%c0_100, %c2, %c0_101], %335 {strides = array<i32>} : memref<2x8x64xf32, #tpu.memory_space<vmem>>, vector<2x1x64xf32>,
    %336 = arith.select %323, %168, %206 : vector<2x64xi1>, vector<2x64xf32>
    %c0_102 = arith.constant 0 : index
    %c3 = arith.constant 3 : index
    %c0_103 = arith.constant 0 : index
    %337 = vector.load %arg15[%c0_102, %c3, %c0_103] : memref<2x8x64xf32, #tpu.memory_space<vmem>>, vector<2x1x64xf32>
    %338 = vector.shape_cast %337 : vector<2x1x64xf32> to vector<2x64xf32>
    %339 = vector.shape_cast %336 : vector<2x64xf32> to vector<2x1x64xf32>
    tpu.vector_store %arg15[%c0_102, %c3, %c0_103], %339 {strides = array<i32>} : memref<2x8x64xf32, #tpu.memory_space<vmem>>, vector<2x1x64xf32>,
    %340 = arith.select %323, %206, %168 : vector<2x64xi1>, vector<2x64xf32>
    %c0_104 = arith.constant 0 : index
    %c4 = arith.constant 4 : index
    %c0_105 = arith.constant 0 : index
    %341 = vector.load %arg15[%c0_104, %c4, %c0_105] : memref<2x8x64xf32, #tpu.memory_space<vmem>>, vector<2x1x64xf32>
    %342 = vector.shape_cast %341 : vector<2x1x64xf32> to vector<2x64xf32>
    %343 = vector.shape_cast %340 : vector<2x64xf32> to vector<2x1x64xf32>
    tpu.vector_store %arg15[%c0_104, %c4, %c0_105], %343 {strides = array<i32>} : memref<2x8x64xf32, #tpu.memory_space<vmem>>, vector<2x1x64xf32>,
    %344 = arith.select %323, %244, %130 : vector<2x64xi1>, vector<2x64xf32>
    %c0_106 = arith.constant 0 : index
    %c5 = arith.constant 5 : index
    %c0_107 = arith.constant 0 : index
    %345 = vector.load %arg15[%c0_106, %c5, %c0_107] : memref<2x8x64xf32, #tpu.memory_space<vmem>>, vector<2x1x64xf32>
    %346 = vector.shape_cast %345 : vector<2x1x64xf32> to vector<2x64xf32>
    %347 = vector.shape_cast %344 : vector<2x64xf32> to vector<2x1x64xf32>
    tpu.vector_store %arg15[%c0_106, %c5, %c0_107], %347 {strides = array<i32>} : memref<2x8x64xf32, #tpu.memory_space<vmem>>, vector<2x1x64xf32>,
    %348 = arith.select %323, %282, %92 : vector<2x64xi1>, vector<2x64xf32>
    %c0_108 = arith.constant 0 : index
    %c6 = arith.constant 6 : index
    %c0_109 = arith.constant 0 : index
    %349 = vector.load %arg15[%c0_108, %c6, %c0_109] : memref<2x8x64xf32, #tpu.memory_space<vmem>>, vector<2x1x64xf32>
    %350 = vector.shape_cast %349 : vector<2x1x64xf32> to vector<2x64xf32>
    %351 = vector.shape_cast %348 : vector<2x64xf32> to vector<2x1x64xf32>
    tpu.vector_store %arg15[%c0_108, %c6, %c0_109], %351 {strides = array<i32>} : memref<2x8x64xf32, #tpu.memory_space<vmem>>, vector<2x1x64xf32>,
    %352 = arith.select %323, %320, %54 : vector<2x64xi1>, vector<2x64xf32>
    %c0_110 = arith.constant 0 : index
    %c7 = arith.constant 7 : index
    %c0_111 = arith.constant 0 : index
    %353 = vector.load %arg15[%c0_110, %c7, %c0_111] : memref<2x8x64xf32, #tpu.memory_space<vmem>>, vector<2x1x64xf32>
    %354 = vector.shape_cast %353 : vector<2x1x64xf32> to vector<2x64xf32>
    %355 = vector.shape_cast %352 : vector<2x64xf32> to vector<2x1x64xf32>
    tpu.vector_store %arg15[%c0_110, %c7, %c0_111], %355 {strides = array<i32>} : memref<2x8x64xf32, #tpu.memory_space<vmem>>, vector<2x1x64xf32>,
    %c0_112 = arith.constant 0 : index
    %c0_113 = arith.constant 0 : index
    %c0_114 = arith.constant 0 : index
    %356 = vector.load %arg15[%c0_112, %c0_113, %c0_114] : memref<2x8x64xf32, #tpu.memory_space<vmem>>, vector<2x8x64xf32>
    %357 = vector.shape_cast %356 : vector<2x8x64xf32> to vector<16x64xf32>
    %c0_115 = arith.constant 0 : index
    %c0_116 = arith.constant 0 : index
    %358 = vector.load %arg7[%c0_115, %c0_116] : memref<64x64xf32, #tpu.memory_space<vmem>>, vector<64x64xf32>
    %cst_117 = arith.constant dense<0.000000e+00> : vector<16x64xf32>
    %359 = tpu.matmul %357, %358, %cst_117 {dimension_numbers = #tpu.dot_dimension_numbers<[1], [0], [0], [1], [0, 0, 1, 1], [], []>} : vector<16x64xf32>, vector<64x64xf32>, vector<16x64xf32> -> vector<16x64xf32>
    %c0_118 = arith.constant 0 : index
    %c0_119 = arith.constant 0 : index
    %360 = vector.load %arg8[%c0_118, %c0_119] : memref<1x64xf32, #tpu.memory_space<vmem>>, vector<1x64xf32>
    %361 = vector.broadcast %360 : vector<1x64xf32> to vector<16x64xf32>
    %362 = arith.addf %359, %361 : vector<16x64xf32>
    %363 = math.tanh %362 : vector<16x64xf32>
    %c0_120 = arith.constant 0 : index
    %c0_121 = arith.constant 0 : index
    %364 = vector.load %arg9[%c0_120, %c0_121] : memref<64x32xf32, #tpu.memory_space<vmem>>, vector<64x32xf32>
    %cst_122 = arith.constant dense<0.000000e+00> : vector<16x32xf32>
    %365 = tpu.matmul %363, %364, %cst_122 {dimension_numbers = #tpu.dot_dimension_numbers<[1], [0], [0], [1], [0, 0, 1, 1], [], []>} : vector<16x64xf32>, vector<64x32xf32>, vector<16x32xf32> -> vector<16x32xf32>
    %c0_123 = arith.constant 0 : index
    %c0_124 = arith.constant 0 : index
    %366 = vector.load %arg10[%c0_123, %c0_124] : memref<1x32xf32, #tpu.memory_space<vmem>>, vector<1x32xf32>
    %367 = vector.broadcast %366 : vector<1x32xf32> to vector<16x32xf32>
    %368 = arith.addf %365, %367 : vector<16x32xf32>
    %369 = math.tanh %368 : vector<16x32xf32>
    %c0_125 = arith.constant 0 : index
    %c0_126 = arith.constant 0 : index
    %370 = vector.load %arg11[%c0_125, %c0_126] : memref<32x8xf32, #tpu.memory_space<vmem>>, vector<32x8xf32>
    %cst_127 = arith.constant dense<0.000000e+00> : vector<16x8xf32>
    %371 = tpu.matmul %369, %370, %cst_127 {dimension_numbers = #tpu.dot_dimension_numbers<[1], [0], [0], [1], [0, 0, 1, 1], [], []>} : vector<16x32xf32>, vector<32x8xf32>, vector<16x8xf32> -> vector<16x8xf32>
    %c0_128 = arith.constant 0 : index
    %c0_129 = arith.constant 0 : index
    %372 = vector.load %arg12[%c0_128, %c0_129] : memref<1x8xf32, #tpu.memory_space<vmem>>, vector<1x8xf32>
    %373 = vector.broadcast %372 : vector<1x8xf32> to vector<16x8xf32>
    %374 = arith.addf %371, %373 : vector<16x8xf32>
    %cst_130 = arith.constant dense<0xFF800000> : vector<16xf32>
    %375 = vector.multi_reduction <maximumf>, %374, %cst_130 [1] : vector<16x8xf32> to vector<16xf32>
    %376 = vector.shape_cast %375 : vector<16xf32> to vector<16x1xf32>
    %377 = vector.broadcast %376 : vector<16x1xf32> to vector<16x8xf32>
    %378 = arith.subf %374, %377 : vector<16x8xf32>
    %379 = math.exp %378 : vector<16x8xf32>
    %cst_131 = arith.constant dense<0.000000e+00> : vector<16xf32>
    %380 = vector.multi_reduction <add>, %379, %cst_131 [1] : vector<16x8xf32> to vector<16xf32>
    %381 = vector.shape_cast %380 : vector<16xf32> to vector<16x1xf32>
    %382 = tpu.reciprocal %381 {approx = true} : vector<16x1xf32> -> vector<16x1xf32>
    %383 = vector.broadcast %382 : vector<16x1xf32> to vector<16x8xf32>
    %384 = arith.mulf %379, %383 : vector<16x8xf32>
    %385 = vector.shape_cast %384 : vector<16x8xf32> to vector<2x8x8xf32>
    %c0_132 = arith.constant 0 : index
    %c0_133 = arith.constant 0 : index
    %386 = vector.load %arg1[%c0_132, %c0_133] : memref<2x8xi32, #tpu.memory_space<vmem>>, vector<2x8xi32>
    %c0_134 = arith.constant 0 : index
    %c0_135 = arith.constant 0 : index
    %387 = vector.load %arg13[%c0_134, %c0_135] : memref<8x8xf32, #tpu.memory_space<vmem>>, vector<8x8xf32>
    %cst_136 = arith.constant dense<0xFF800000> : vector<8xf32>
    %388 = vector.multi_reduction <maximumf>, %387, %cst_136 [1] : vector<8x8xf32> to vector<8xf32>
    %389 = vector.shape_cast %388 : vector<8xf32> to vector<8x1xf32>
    %390 = vector.broadcast %389 : vector<8x1xf32> to vector<8x8xf32>
    %391 = arith.subf %387, %390 : vector<8x8xf32>
    %392 = math.exp %391 : vector<8x8xf32>
    %cst_137 = arith.constant dense<0.000000e+00> : vector<8xf32>
    %393 = vector.multi_reduction <add>, %392, %cst_137 [1] : vector<8x8xf32> to vector<8xf32>
    %394 = vector.shape_cast %393 : vector<8xf32> to vector<8x1xf32>
    %395 = vector.broadcast %394 : vector<8x1xf32> to vector<8x8xf32>
    %396 = arith.divf %392, %395 : vector<8x8xf32>
    %397 = vector.shape_cast %386 : vector<2x8xi32> to vector<2x8x1xi32>
    %398 = tpu.iota {dimensions = array<i32: 2>} : vector<2x8x8xi32>
    %399 = vector.broadcast %397 : vector<2x8x1xi32> to vector<2x8x8xi32>
    %400 = arith.cmpi eq, %399, %398 : vector<2x8x8xi32>
    %401 = arith.extui %400 : vector<2x8x8xi1> to vector<2x8x8xi32>
    %402 = arith.sitofp %401 : vector<2x8x8xi32> to vector<2x8x8xf32>
    %403 = arith.mulf %385, %402 : vector<2x8x8xf32>
    %cst_138 = arith.constant dense<0.000000e+00> : vector<2x8xf32>
    %404 = vector.multi_reduction <add>, %403, %cst_138 [2] : vector<2x8x8xf32> to vector<2x8xf32>
    %cst_139 = arith.constant dense<0.000000e+00> : vector<2xf32>
    %405 = vector.multi_reduction <add>, %404, %cst_139 [1] : vector<2x8xf32> to vector<2xf32>
    %406 = vector.shape_cast %405 : vector<2xf32> to vector<2x1xf32>
    %407 = vector.shape_cast %402 : vector<2x8x8xf32> to vector<16x8xf32>
    %cst_140 = arith.constant dense<0.000000e+00> : vector<16x8xf32>
    %408 = tpu.matmul %407, %396, %cst_140 {dimension_numbers = #tpu.dot_dimension_numbers<[1], [0], [0], [1], [0, 0, 1, 1], [], []>} : vector<16x8xf32>, vector<8x8xf32>, vector<16x8xf32> -> vector<16x8xf32>
    %409 = vector.shape_cast %408 : vector<16x8xf32> to vector<2x8x8xf32>
    %410 = vector.extract_strided_slice %409 {offsets = [0, 0, 0], sizes = [2, 7, 8], strides = [1, 1, 1]} : vector<2x8x8xf32> to vector<2x7x8xf32>
    %411 = vector.extract_strided_slice %402 {offsets = [0, 1, 0], sizes = [2, 7, 8], strides = [1, 1, 1]} : vector<2x8x8xf32> to vector<2x7x8xf32>
    %412 = arith.mulf %410, %411 : vector<2x7x8xf32>
    %cst_141 = arith.constant dense<0.000000e+00> : vector<2x7xf32>
    %413 = vector.multi_reduction <add>, %412, %cst_141 [2] : vector<2x7x8xf32> to vector<2x7xf32>
    %cst_142 = arith.constant dense<0.000000e+00> : vector<2xf32>
    %414 = vector.multi_reduction <add>, %413, %cst_142 [1] : vector<2x7xf32> to vector<2xf32>
    %415 = vector.shape_cast %414 : vector<2xf32> to vector<2x1xf32>
    %416 = arith.addf %406, %415 : vector<2x1xf32>
    %417 = vector.extract_strided_slice %385 {offsets = [0, 0, 0], sizes = [2, 1, 8], strides = [1, 1, 1]} : vector<2x8x8xf32> to vector<2x1x8xf32>
    %418 = vector.shape_cast %417 : vector<2x1x8xf32> to vector<2x8xf32>
    %419 = vector.extract_strided_slice %396 {offsets = [0, 0], sizes = [1, 8], strides = [1, 1]} : vector<8x8xf32> to vector<1x8xf32>
    %420 = vector.broadcast %419 : vector<1x8xf32> to vector<2x8xf32>
    %421 = arith.addf %418, %420 : vector<2x8xf32>
    %422 = vector.shape_cast %421 : vector<2x8xf32> to vector<2x8x1xf32>
    %423 = vector.shape_cast %396 : vector<8x8xf32> to vector<1x8x8xf32>
    %424 = vector.broadcast %422 : vector<2x8x1xf32> to vector<2x8x8xf32>
    %425 = vector.broadcast %423 : vector<1x8x8xf32> to vector<2x8x8xf32>
    %426 = arith.addf %424, %425 : vector<2x8x8xf32>
    %427 = vector.extract_strided_slice %385 {offsets = [0, 1, 0], sizes = [2, 1, 8], strides = [1, 1, 1]} : vector<2x8x8xf32> to vector<2x1x8xf32>
    %428 = vector.shape_cast %427 : vector<2x1x8xf32> to vector<2x8xf32>
    %429 = vector.shape_cast %428 : vector<2x8xf32> to vector<2x1x8xf32>
    %430 = vector.broadcast %429 : vector<2x1x8xf32> to vector<2x8x8xf32>
    %431 = arith.addf %426, %430 : vector<2x8x8xf32>
    %cst_143 = arith.constant dense<0xFF800000> : vector<2x8xf32>
    %432 = vector.multi_reduction <maximumf>, %431, %cst_143 [1] : vector<2x8x8xf32> to vector<2x8xf32>
    %433 = vector.shape_cast %432 : vector<2x8xf32> to vector<2x1x8xf32>
    %434 = vector.broadcast %433 : vector<2x1x8xf32> to vector<2x8x8xf32>
    %435 = arith.subf %431, %434 : vector<2x8x8xf32>
    %436 = math.exp %435 : vector<2x8x8xf32>
    %cst_144 = arith.constant dense<0.000000e+00> : vector<2x8xf32>
    %437 = vector.multi_reduction <add>, %436, %cst_144 [1] : vector<2x8x8xf32> to vector<2x8xf32>
    %438 = math.log %437 : vector<2x8xf32>
    %439 = arith.addf %438, %432 : vector<2x8xf32>
    %440 = vector.shape_cast %439 : vector<2x8xf32> to vector<2x8x1xf32>
    %441 = vector.shape_cast %396 : vector<8x8xf32> to vector<1x8x8xf32>
    %442 = vector.broadcast %440 : vector<2x8x1xf32> to vector<2x8x8xf32>
    %443 = vector.broadcast %441 : vector<1x8x8xf32> to vector<2x8x8xf32>
    %444 = arith.addf %442, %443 : vector<2x8x8xf32>
    %445 = vector.extract_strided_slice %385 {offsets = [0, 2, 0], sizes = [2, 1, 8], strides = [1, 1, 1]} : vector<2x8x8xf32> to vector<2x1x8xf32>
    %446 = vector.shape_cast %445 : vector<2x1x8xf32> to vector<2x8xf32>
    %447 = vector.shape_cast %446 : vector<2x8xf32> to vector<2x1x8xf32>
    %448 = vector.broadcast %447 : vector<2x1x8xf32> to vector<2x8x8xf32>
    %449 = arith.addf %444, %448 : vector<2x8x8xf32>
    %cst_145 = arith.constant dense<0xFF800000> : vector<2x8xf32>
    %450 = vector.multi_reduction <maximumf>, %449, %cst_145 [1] : vector<2x8x8xf32> to vector<2x8xf32>
    %451 = vector.shape_cast %450 : vector<2x8xf32> to vector<2x1x8xf32>
    %452 = vector.broadcast %451 : vector<2x1x8xf32> to vector<2x8x8xf32>
    %453 = arith.subf %449, %452 : vector<2x8x8xf32>
    %454 = math.exp %453 : vector<2x8x8xf32>
    %cst_146 = arith.constant dense<0.000000e+00> : vector<2x8xf32>
    %455 = vector.multi_reduction <add>, %454, %cst_146 [1] : vector<2x8x8xf32> to vector<2x8xf32>
    %456 = math.log %455 : vector<2x8xf32>
    %457 = arith.addf %456, %450 : vector<2x8xf32>
    %458 = vector.shape_cast %457 : vector<2x8xf32> to vector<2x8x1xf32>
    %459 = vector.shape_cast %396 : vector<8x8xf32> to vector<1x8x8xf32>
    %460 = vector.broadcast %458 : vector<2x8x1xf32> to vector<2x8x8xf32>
    %461 = vector.broadcast %459 : vector<1x8x8xf32> to vector<2x8x8xf32>
    %462 = arith.addf %460, %461 : vector<2x8x8xf32>
    %463 = vector.extract_strided_slice %385 {offsets = [0, 3, 0], sizes = [2, 1, 8], strides = [1, 1, 1]} : vector<2x8x8xf32> to vector<2x1x8xf32>
    %464 = vector.shape_cast %463 : vector<2x1x8xf32> to vector<2x8xf32>
    %465 = vector.shape_cast %464 : vector<2x8xf32> to vector<2x1x8xf32>
    %466 = vector.broadcast %465 : vector<2x1x8xf32> to vector<2x8x8xf32>
    %467 = arith.addf %462, %466 : vector<2x8x8xf32>
    %cst_147 = arith.constant dense<0xFF800000> : vector<2x8xf32>
    %468 = vector.multi_reduction <maximumf>, %467, %cst_147 [1] : vector<2x8x8xf32> to vector<2x8xf32>
    %469 = vector.shape_cast %468 : vector<2x8xf32> to vector<2x1x8xf32>
    %470 = vector.broadcast %469 : vector<2x1x8xf32> to vector<2x8x8xf32>
    %471 = arith.subf %467, %470 : vector<2x8x8xf32>
    %472 = math.exp %471 : vector<2x8x8xf32>
    %cst_148 = arith.constant dense<0.000000e+00> : vector<2x8xf32>
    %473 = vector.multi_reduction <add>, %472, %cst_148 [1] : vector<2x8x8xf32> to vector<2x8xf32>
    %474 = math.log %473 : vector<2x8xf32>
    %475 = arith.addf %474, %468 : vector<2x8xf32>
    %476 = vector.shape_cast %475 : vector<2x8xf32> to vector<2x8x1xf32>
    %477 = vector.shape_cast %396 : vector<8x8xf32> to vector<1x8x8xf32>
    %478 = vector.broadcast %476 : vector<2x8x1xf32> to vector<2x8x8xf32>
    %479 = vector.broadcast %477 : vector<1x8x8xf32> to vector<2x8x8xf32>
    %480 = arith.addf %478, %479 : vector<2x8x8xf32>
    %481 = vector.extract_strided_slice %385 {offsets = [0, 4, 0], sizes = [2, 1, 8], strides = [1, 1, 1]} : vector<2x8x8xf32> to vector<2x1x8xf32>
    %482 = vector.shape_cast %481 : vector<2x1x8xf32> to vector<2x8xf32>
    %483 = vector.shape_cast %482 : vector<2x8xf32> to vector<2x1x8xf32>
    %484 = vector.broadcast %483 : vector<2x1x8xf32> to vector<2x8x8xf32>
    %485 = arith.addf %480, %484 : vector<2x8x8xf32>
    %cst_149 = arith.constant dense<0xFF800000> : vector<2x8xf32>
    %486 = vector.multi_reduction <maximumf>, %485, %cst_149 [1] : vector<2x8x8xf32> to vector<2x8xf32>
    %487 = vector.shape_cast %486 : vector<2x8xf32> to vector<2x1x8xf32>
    %488 = vector.broadcast %487 : vector<2x1x8xf32> to vector<2x8x8xf32>
    %489 = arith.subf %485, %488 : vector<2x8x8xf32>
    %490 = math.exp %489 : vector<2x8x8xf32>
    %cst_150 = arith.constant dense<0.000000e+00> : vector<2x8xf32>
    %491 = vector.multi_reduction <add>, %490, %cst_150 [1] : vector<2x8x8xf32> to vector<2x8xf32>
    %492 = math.log %491 : vector<2x8xf32>
    %493 = arith.addf %492, %486 : vector<2x8xf32>
    %494 = vector.shape_cast %493 : vector<2x8xf32> to vector<2x8x1xf32>
    %495 = vector.shape_cast %396 : vector<8x8xf32> to vector<1x8x8xf32>
    %496 = vector.broadcast %494 : vector<2x8x1xf32> to vector<2x8x8xf32>
    %497 = vector.broadcast %495 : vector<1x8x8xf32> to vector<2x8x8xf32>
    %498 = arith.addf %496, %497 : vector<2x8x8xf32>
    %499 = vector.extract_strided_slice %385 {offsets = [0, 5, 0], sizes = [2, 1, 8], strides = [1, 1, 1]} : vector<2x8x8xf32> to vector<2x1x8xf32>
    %500 = vector.shape_cast %499 : vector<2x1x8xf32> to vector<2x8xf32>
    %501 = vector.shape_cast %500 : vector<2x8xf32> to vector<2x1x8xf32>
    %502 = vector.broadcast %501 : vector<2x1x8xf32> to vector<2x8x8xf32>
    %503 = arith.addf %498, %502 : vector<2x8x8xf32>
    %cst_151 = arith.constant dense<0xFF800000> : vector<2x8xf32>
    %504 = vector.multi_reduction <maximumf>, %503, %cst_151 [1] : vector<2x8x8xf32> to vector<2x8xf32>
    %505 = vector.shape_cast %504 : vector<2x8xf32> to vector<2x1x8xf32>
    %506 = vector.broadcast %505 : vector<2x1x8xf32> to vector<2x8x8xf32>
    %507 = arith.subf %503, %506 : vector<2x8x8xf32>
    %508 = math.exp %507 : vector<2x8x8xf32>
    %cst_152 = arith.constant dense<0.000000e+00> : vector<2x8xf32>
    %509 = vector.multi_reduction <add>, %508, %cst_152 [1] : vector<2x8x8xf32> to vector<2x8xf32>
    %510 = math.log %509 : vector<2x8xf32>
    %511 = arith.addf %510, %504 : vector<2x8xf32>
    %512 = vector.shape_cast %511 : vector<2x8xf32> to vector<2x8x1xf32>
    %513 = vector.shape_cast %396 : vector<8x8xf32> to vector<1x8x8xf32>
    %514 = vector.broadcast %512 : vector<2x8x1xf32> to vector<2x8x8xf32>
    %515 = vector.broadcast %513 : vector<1x8x8xf32> to vector<2x8x8xf32>
    %516 = arith.addf %514, %515 : vector<2x8x8xf32>
    %517 = vector.extract_strided_slice %385 {offsets = [0, 6, 0], sizes = [2, 1, 8], strides = [1, 1, 1]} : vector<2x8x8xf32> to vector<2x1x8xf32>
    %518 = vector.shape_cast %517 : vector<2x1x8xf32> to vector<2x8xf32>
    %519 = vector.shape_cast %518 : vector<2x8xf32> to vector<2x1x8xf32>
    %520 = vector.broadcast %519 : vector<2x1x8xf32> to vector<2x8x8xf32>
    %521 = arith.addf %516, %520 : vector<2x8x8xf32>
    %cst_153 = arith.constant dense<0xFF800000> : vector<2x8xf32>
    %522 = vector.multi_reduction <maximumf>, %521, %cst_153 [1] : vector<2x8x8xf32> to vector<2x8xf32>
    %523 = vector.shape_cast %522 : vector<2x8xf32> to vector<2x1x8xf32>
    %524 = vector.broadcast %523 : vector<2x1x8xf32> to vector<2x8x8xf32>
    %525 = arith.subf %521, %524 : vector<2x8x8xf32>
    %526 = math.exp %525 : vector<2x8x8xf32>
    %cst_154 = arith.constant dense<0.000000e+00> : vector<2x8xf32>
    %527 = vector.multi_reduction <add>, %526, %cst_154 [1] : vector<2x8x8xf32> to vector<2x8xf32>
    %528 = math.log %527 : vector<2x8xf32>
    %529 = arith.addf %528, %522 : vector<2x8xf32>
    %530 = vector.shape_cast %529 : vector<2x8xf32> to vector<2x8x1xf32>
    %531 = vector.shape_cast %396 : vector<8x8xf32> to vector<1x8x8xf32>
    %532 = vector.broadcast %530 : vector<2x8x1xf32> to vector<2x8x8xf32>
    %533 = vector.broadcast %531 : vector<1x8x8xf32> to vector<2x8x8xf32>
    %534 = arith.addf %532, %533 : vector<2x8x8xf32>
    %535 = vector.extract_strided_slice %385 {offsets = [0, 7, 0], sizes = [2, 1, 8], strides = [1, 1, 1]} : vector<2x8x8xf32> to vector<2x1x8xf32>
    %536 = vector.shape_cast %535 : vector<2x1x8xf32> to vector<2x8xf32>
    %537 = vector.shape_cast %536 : vector<2x8xf32> to vector<2x1x8xf32>
    %538 = vector.broadcast %537 : vector<2x1x8xf32> to vector<2x8x8xf32>
    %539 = arith.addf %534, %538 : vector<2x8x8xf32>
    %cst_155 = arith.constant dense<0xFF800000> : vector<2x8xf32>
    %540 = vector.multi_reduction <maximumf>, %539, %cst_155 [1] : vector<2x8x8xf32> to vector<2x8xf32>
    %541 = vector.shape_cast %540 : vector<2x8xf32> to vector<2x1x8xf32>
    %542 = vector.broadcast %541 : vector<2x1x8xf32> to vector<2x8x8xf32>
    %543 = arith.subf %539, %542 : vector<2x8x8xf32>
    %544 = math.exp %543 : vector<2x8x8xf32>
    %cst_156 = arith.constant dense<0.000000e+00> : vector<2x8xf32>
    %545 = vector.multi_reduction <add>, %544, %cst_156 [1] : vector<2x8x8xf32> to vector<2x8xf32>
    %546 = math.log %545 : vector<2x8xf32>
    %547 = arith.addf %546, %540 : vector<2x8xf32>
    %548 = vector.extract_strided_slice %396 {offsets = [7, 0], sizes = [1, 8], strides = [1, 1]} : vector<8x8xf32> to vector<1x8xf32>
    %549 = vector.broadcast %548 : vector<1x8xf32> to vector<2x8xf32>
    %550 = arith.addf %547, %549 : vector<2x8xf32>
    %cst_157 = arith.constant dense<0xFF800000> : vector<2xf32>
    %551 = vector.multi_reduction <maximumf>, %550, %cst_157 [1] : vector<2x8xf32> to vector<2xf32>
    %552 = vector.shape_cast %551 : vector<2xf32> to vector<2x1xf32>
    %553 = vector.broadcast %552 : vector<2x1xf32> to vector<2x8xf32>
    %554 = arith.subf %550, %553 : vector<2x8xf32>
    %555 = math.exp %554 : vector<2x8xf32>
    %cst_158 = arith.constant dense<0.000000e+00> : vector<2xf32>
    %556 = vector.multi_reduction <add>, %555, %cst_158 [1] : vector<2x8xf32> to vector<2xf32>
    %557 = vector.shape_cast %556 : vector<2xf32> to vector<2x1xf32>
    %558 = math.log %557 : vector<2x1xf32>
    %559 = arith.addf %558, %552 : vector<2x1xf32>
    %560 = arith.subf %559, %416 : vector<2x1xf32>
    %cst_159 = arith.constant dense<0.000000e+00> : vector<1xf32>
    %561 = vector.multi_reduction <add>, %560, %cst_159 [0] : vector<2x1xf32> to vector<1xf32>
    %562 = vector.shape_cast %561 : vector<1xf32> to vector<1x1xf32>
    %c0_160 = arith.constant 0 : index
    %c0_161 = arith.constant 0 : index
    %563 = vector.load %arg14[%c0_160, %c0_161] : memref<1x1xf32, #tpu.memory_space<vmem>>, vector<1x1xf32>
    tpu.vector_store %arg14[%c0_160, %c0_161], %562 {strides = array<i32>} : memref<1x1xf32, #tpu.memory_space<vmem>>, vector<1x1xf32>,
    return
  }
}

</mosaic_0001>

<bundles_post_ra>
// kernel: rnn_forward.1
= control target key start
LH: loop header
LB: loop body
LE: loop exit
PB: predicated region body
PF: predicated region fallthrough
CT: control target
= control target key end

     0   :  { %19 = vsyncpa [#allocation4], 0  ;;  %s4148_s0 = inlined_call_operand.vmem [shape: f32[2,8,16], index: 0, kind: input, shape index: {}]   ;;  %s4149_s1 = inlined_call_operand.hbm [shape: s32[2,8], index: 1, kind: input, shape index: {}]   ;;  %s4150_s2 = inlined_call_operand.vmem [shape: f32[16,256], index: 2, kind: input, shape index: {}]   ;;  %s4151_s3 = inlined_call_operand.hbm [shape: f32[16,256], index: 3, kind: input, shape index: {}]   ;;  %s4152_s4 = inlined_call_operand.hbm [shape: f32[1,256], index: 4, kind: input, shape index: {}]   ;;  %s4153_s5 = inlined_call_operand.hbm [shape: f32[1,256], index: 5, kind: input, shape index: {}]   ;;  %s4154_s6 = inlined_call_operand.vmem [shape: f32[64,256], index: 6, kind: input, shape index: {}]   ;;  %s4155_s7 = inlined_call_operand.hbm [shape: f32[64,64], index: 7, kind: input, shape index: {}]   ;;  %s4156_s8 = inlined_call_operand.vmem [shape: f32[1,64], index: 8, kind: input, shape index: {}]   ;;  %s4157_s9 = inlined_call_operand.vmem [shape: f32[64,32], index: 9, kind: input, shape index: {}]   ;;  %s4158_s10 = inlined_call_operand.hbm [shape: f32[1,32], index: 10, kind: input, shape index: {}]   ;;  %s4159_s11 = inlined_call_operand.vmem [shape: f32[32,8], index: 11, kind: input, shape index: {}]   ;;  %s4160_s12 = inlined_call_operand.hbm [shape: f32[1,8], index: 12, kind: input, shape index: {}]   ;;  %s4161_s13 = inlined_call_operand.hbm [shape: f32[8,8], index: 13, kind: input, shape index: {}]   ;;  %s4162_s14 = inlined_call_operand.hbm [shape: f32[1,1], index: 14, kind: output, shape index: {}]  }
   0x1   :  { %20 = vsyncpa [#allocation7], 0 }
   0x2   :  { %21 = vsyncpa [#allocation10], 0 }
   0x3   :  { %22 = vsyncpa [#allocation13], 0 }
   0x4   :  { %23 = vsyncpa [#allocation16], 0 }
   0x5   :  { %24 = vsyncpa [#allocation5], 0  ;;  %s3409_s29 = smov [#allocation6]   ;;  %s3199_s17 = scalar_lea.hbm %s4151_s3, 512 }
   0x6   :  { %s44_s30 = sshll.u32 %s3409_s29, 4  ;;  %p3200_p0 = scmp.ne.s32.totalorder %s4151_s3, %s3199_s17  ;;  %s45_s30 = int_to_ptr.vmem [resolvable:$true] %s44_s30 }
   0x7   :  { %p3203_p1 = scmp.lt.u32.totalorder %s3199_s17, %s4151_s3 }
   0x9   :  { %p3205_p2 = pnand %p3203_p1, %p3200_p0 }
   0xb   :  { %3208 = shalt.err (!%p3205_p2)
}
   0xc   :  { %s3209_s22 = scalar_lea.vmem %s45_s30, 512  ;;  %p3214_p4 = scmp.lt.s32.totalorder %s45_s30, %s45_s30 }
   0xd   :  { %p3210_p3 = scmp.ne.s32.totalorder %s45_s30, %s3209_s22  ;;  %p3215_p5 = scmp.lt.s32.totalorder %s3209_s22, %s3209_s22 }
   0xf   :  { %p3216_p6 = por %p3215_p5, %p3214_p4 }
  0x11   :  { %p3217_p7 = pnand %p3216_p6, %p3210_p3 }
  0x13   :  { %3220 = shalt.err (!%p3217_p7)
}
  0x14   :  { %s3410_s23 = smov 256   ;;  %s3411_s24 = smov 16  }
  0x15   :  { %50 = dma.hbm_to_vmem [thread:$0]  %s4151_s3, 512, %s45_s30, [#allocation7], %s3410_s23, %s3410_s23, %s3411_s24  }
  0x16   :  { %s3412_s27 = smov [#allocation9]   ;;  %s3413_s29 = smov [#allocation12]  }
  0x17   :  { %s67_s28 = sshll.u32 %s3412_s27, 4  ;;  %s95_s15 = sshll.u32 %s3413_s29, 4  ;;  %s68_s28 = int_to_ptr.vmem [resolvable:$true] %s67_s28  ;;  %s96_s15 = int_to_ptr.vmem [resolvable:$true] %s95_s15 }
  0x18   :  { %s3221_s18 = scalar_lea.hbm %s4153_s5, 32 }
  0x19   :  { %p3222_p8 = scmp.ne.s32.totalorder %s4153_s5, %s3221_s18  ;;  %p3225_p9 = scmp.lt.u32.totalorder %s3221_s18, %s4153_s5 }
  0x1b   :  { %p3227_p10 = pnand %p3225_p9, %p3222_p8 }
  0x1d   :  { %3230 = shalt.err (!%p3227_p10)
}
  0x1e   :  { %s3231_s3 = scalar_lea.vmem %s68_s28, 32  ;;  %p3236_p12 = scmp.lt.s32.totalorder %s68_s28, %s68_s28 }
  0x1f   :  { %p3232_p11 = scmp.ne.s32.totalorder %s68_s28, %s3231_s3  ;;  %p3237_p13 = scmp.lt.s32.totalorder %s3231_s3, %s3231_s3 }
  0x21   :  { %p3238_p0 = por %p3237_p13, %p3236_p12 }
  0x23   :  { %p3239_p1 = pnand %p3238_p0, %p3232_p11 }
  0x25   :  { %3242 = shalt.err (!%p3239_p1)
}
  0x26   :  { %70 = dma.hbm_to_vmem [thread:$0]  %s4153_s5, 32, %s68_s28, [#allocation10]  }
  0x27   :  { %s3243_s26 = scalar_lea.hbm %s4158_s10, 16 }
  0x28   :  { %p3244_p2 = scmp.ne.s32.totalorder %s4158_s10, %s3243_s26  ;;  %p3247_p3 = scmp.lt.u32.totalorder %s3243_s26, %s4158_s10 }
  0x2a   :  { %p3249_p4 = pnand %p3247_p3, %p3244_p2 }
  0x2c   :  { %3252 = shalt.err (!%p3249_p4)
}
  0x2d   :  { %s3253_s18 = scalar_lea.vmem %s96_s15, 16  ;;  %s3257_s19 = scalar_lea.vmem %s96_s15, 32 }
  0x2e   :  { %p3254_p5 = scmp.ne.s32.totalorder %s96_s15, %s3253_s18  ;;  %p3258_p6 = scmp.lt.s32.totalorder %s96_s15, %s96_s15 }
  0x2f   :  { %p3259_p7 = scmp.lt.s32.totalorder %s3257_s19, %s3253_s18 }
  0x31   :  { %p3260_p8 = por %p3259_p7, %p3258_p6 }
  0x33   :  { %p3261_p9 = pnand %p3260_p8, %p3254_p5 }
  0x35   :  { %3264 = shalt.err (!%p3261_p9)
}
  0x36   :  { %98 = dma.hbm_to_vmem [thread:$0]  %s4158_s10, 16, %s96_s15, [#allocation13]  }
  0x37   :  { %s3414_s20 = smov [#allocation3]   ;;  %s3415_s22 = smov [#allocation8]  }
  0x38   :  { %s33_s21 = sshll.u32 %s3414_s20, 4  ;;  %s57_s3 = sshll.u32 %s3415_s22, 4  ;;  %s34_s21 = int_to_ptr.vmem [resolvable:$true] %s33_s21  ;;  %s58_s3 = int_to_ptr.vmem [resolvable:$true] %s57_s3 }
  0x39   :  { %s3265_s24 = scalar_lea.hbm %s4149_s1, 32 }
  0x3a   :  { %p3266_p10 = scmp.ne.s32.totalorder %s4149_s1, %s3265_s24  ;;  %p3269_p11 = scmp.lt.u32.totalorder %s3265_s24, %s4149_s1 }
  0x3c   :  { %p3271_p12 = pnand %p3269_p11, %p3266_p10 }
  0x3e   :  { %3274 = shalt.err (!%p3271_p12)
}
  0x3f   :  { %s3275_s10 = scalar_lea.vmem %s34_s21, 32  ;;  %p3280_p0 = scmp.lt.s32.totalorder %s34_s21, %s34_s21 }
  0x40   :  { %p3276_p13 = scmp.ne.s32.totalorder %s34_s21, %s3275_s10  ;;  %p3281_p1 = scmp.lt.s32.totalorder %s3275_s10, %s3275_s10 }
  0x42   :  { %p3282_p2 = por %p3281_p1, %p3280_p0 }
  0x44   :  { %p3283_p3 = pnand %p3282_p2, %p3276_p13 }
  0x46   :  { %3286 = shalt.err (!%p3283_p3)
}
  0x47   :  { %36 = dma.hbm_to_vmem [thread:$0]  %s4149_s1, 32, %s34_s21, [#allocation4]  }
  0x48   :  { %s3287_s19 = scalar_lea.hbm %s4152_s4, 32 }
  0x49   :  { %p3288_p4 = scmp.ne.s32.totalorder %s4152_s4, %s3287_s19  ;;  %p3291_p5 = scmp.lt.u32.totalorder %s3287_s19, %s4152_s4 }
  0x4b   :  { %p3293_p6 = pnand %p3291_p5, %p3288_p4 }
  0x4d   :  { %3296 = shalt.err (!%p3293_p6)
}
  0x4e   :  { %s3297_s30 = scalar_lea.vmem %s58_s3, 32  ;;  %p3302_p8 = scmp.lt.s32.totalorder %s58_s3, %s58_s3 }
  0x4f   :  { %p3298_p7 = scmp.ne.s32.totalorder %s58_s3, %s3297_s30  ;;  %p3303_p9 = scmp.lt.s32.totalorder %s3297_s30, %s3297_s30 }
  0x51   :  { %p3304_p10 = por %p3303_p9, %p3302_p8 }
  0x53   :  { %p3305_p11 = pnand %p3304_p10, %p3298_p7 }
  0x55   :  { %3308 = shalt.err (!%p3305_p11)
}
  0x56   :  { %60 = dma.hbm_to_vmem [thread:$0]  %s4152_s4, 32, %s58_s3, [#allocation7]  }
  0x57   :  { %s3416_s23 = smov [#allocation11]   ;;  %s3309_s27 = scalar_lea.hbm %s4155_s7, 1024 }
  0x58   :  { %s78_s24 = sshll.u32 %s3416_s23, 4  ;;  %p3310_p12 = scmp.ne.s32.totalorder %s4155_s7, %s3309_s27  ;;  %s79_s24 = int_to_ptr.vmem [resolvable:$true] %s78_s24 }
  0x59   :  { %p3313_p13 = scmp.lt.u32.totalorder %s3309_s27, %s4155_s7 }
  0x5b   :  { %p3315_p0 = pnand %p3313_p13, %p3310_p12 }
  0x5d   :  { %3318 = shalt.err (!%p3315_p0)
}
  0x5e   :  { %s3319_s17 = scalar_lea.vmem %s79_s24, 1024  ;;  %p3324_p2 = scmp.lt.s32.totalorder %s79_s24, %s79_s24 }
  0x5f   :  { %p3320_p1 = scmp.ne.s32.totalorder %s79_s24, %s3319_s17  ;;  %p3325_p3 = scmp.lt.s32.totalorder %s3319_s17, %s3319_s17 }
  0x61   :  { %p3326_p4 = por %p3325_p3, %p3324_p2 }
  0x63   :  { %p3327_p5 = pnand %p3326_p4, %p3320_p1 }
  0x65   :  { %3330 = shalt.err (!%p3327_p5)
}
  0x66   :  { %s3417_s4 = smov 128   ;;  %s3418_s3 = smov 8  }
  0x67   :  { %84 = dma.hbm_to_vmem [thread:$0]  %s4155_s7, 1024, %s79_s24, [#allocation10], %s3417_s4, %s3417_s4, %s3418_s3  }
  0x68   :  { %s3419_s5 = smov [#allocation14]   ;;  %s3420_s20 = smov [#allocation15]  }
  0x69   :  { %s107_s28 = sshll.u32 %s3419_s5, 4  ;;  %s117_s22 = sshll.u32 %s3420_s20, 4  ;;  %s108_s28 = int_to_ptr.vmem [resolvable:$true] %s107_s28  ;;  %s118_s22 = int_to_ptr.vmem [resolvable:$true] %s117_s22 }
  0x6a   :  { %s3331_s21 = scalar_lea.hbm %s4160_s12, 16 }
  0x6b   :  { %p3332_p6 = scmp.ne.s32.totalorder %s4160_s12, %s3331_s21  ;;  %p3335_p7 = scmp.lt.u32.totalorder %s3331_s21, %s4160_s12 }
  0x6d   :  { %p3337_p8 = pnand %p3335_p7, %p3332_p6 }
  0x6f   :  { %3340 = shalt.err (!%p3337_p8)
}
  0x70   :  { %s3341_s7 = scalar_lea.vmem %s108_s28, 16  ;;  %s3345_s24 = scalar_lea.vmem %s108_s28, 32 }
  0x71   :  { %p3342_p9 = scmp.ne.s32.totalorder %s108_s28, %s3341_s7  ;;  %p3346_p10 = scmp.lt.s32.totalorder %s108_s28, %s108_s28 }
  0x72   :  { %p3347_p11 = scmp.lt.s32.totalorder %s3345_s24, %s3341_s7 }
  0x74   :  { %p3348_p12 = por %p3347_p11, %p3346_p10 }
  0x76   :  { %p3349_p13 = pnand %p3348_p12, %p3342_p9 }
  0x78   :  { %3352 = shalt.err (!%p3349_p13)
}
  0x79   :  { %110 = dma.hbm_to_vmem [thread:$0]  %s4160_s12, 16, %s108_s28, [#allocation13]  }
  0x7a   :  { %s3353_s17 = scalar_lea.hbm %s4161_s13, 128 }
  0x7b   :  { %p3354_p0 = scmp.ne.s32.totalorder %s4161_s13, %s3353_s17  ;;  %p3357_p1 = scmp.lt.u32.totalorder %s3353_s17, %s4161_s13 }
  0x7d   :  { %p3359_p2 = pnand %p3357_p1, %p3354_p0 }
  0x7f   :  { %3362 = shalt.err (!%p3359_p2)
}
  0x80   :  { %s3363_s5 = scalar_lea.vmem %s118_s22, 128  ;;  %p3368_p4 = scmp.lt.s32.totalorder %s118_s22, %s118_s22 }
  0x81   :  { %p3364_p3 = scmp.ne.s32.totalorder %s118_s22, %s3363_s5  ;;  %p3369_p5 = scmp.lt.s32.totalorder %s3363_s5, %s3363_s5 }
  0x83   :  { %p3370_p6 = por %p3369_p5, %p3368_p4 }
  0x85   :  { %p3371_p7 = pnand %p3370_p6, %p3364_p3 }
  0x87   :  { %3374 = shalt.err (!%p3371_p7)
}
  0x88   :  { %120 = dma.hbm_to_vmem [thread:$0]  %s4161_s13, 128, %s118_s22, [#allocation16]  }
  0x89   :  { %3397 = dma.done.wait [#allocation4], 32  }
  0x8a   :  { %3398 = vsyncadd [#allocation4], 4294967264 }
  0x8b   :  { %3399 = dma.done.wait [#allocation7], 544  }
  0x8c   :  { %3400 = vsyncadd [#allocation7], 4294966752 }
  0x8d   :  { %3401 = dma.done.wait [#allocation10], 1056  }
  0x8e   :  { %3402 = vsyncadd [#allocation10], 4294966240 }
  0x8f   :  { %3403 = dma.done.wait [#allocation13], 32  }
  0x90   :  { %3404 = vsyncadd [#allocation13], 4294967264 }
  0x91   :  { %3405 = dma.done.wait [#allocation16], 128  }
  0x92   :  { %3406 = vsyncadd [#allocation16], 4294967168  ;;  %v3421_v0 = vmov 0.0   ;;  %v148_v1 = vld [vmem:[%s4150_s2 + $0x8] sm:$0xff]  ;;  %v150_v2 = vld [vmem:[%s4150_s2 + $0x18] sm:$0xff]  ;;  %vm163_vm0 = vcmask 130048   ;;  %v153_v39 = vlaneseq }
  0x93   :  { %234 = vmatprep.mubr.f32.mxu0 %v3421_v0  ;;  %327 = vmatprep.mubr.f32.mxu1 %v3421_v0  ;;  %v248_v3 = vld [vmem:[#allocation6 + $0x8] sm:$0xff]  ;;  %v2797_v4 = vpack.c.bf16 %v150_v2, %v148_v1  ;;  %v250_v5 = vld [vmem:[#allocation6 + $0x18] sm:$0xff]  ;;  %v247_v10 = vld [vmem:[#allocation6] sm:$0xff]  ;;  %vm510_vm1 = vcmask 1041409   ;;  %vm372_vm2 = vcmask 523264   ;;  %vm1518_vm4 = vcmask 516096  }
  0x94   :  { %v147_v6 = vld [vmem:[%s4150_s2] sm:$0xff]  ;;  %v149_v7 = vld [vmem:[%s4150_s2 + $0x10] sm:$0xff]  ;;  %v2801_v8 = vpack.c.bf16 %v250_v5, %v248_v3  ;;  %v341_v14 = vld [vmem:[%s4154_s6 + $0x8] sm:$0xff]  ;;  %v3717_v40 = vshrl.u32 %v153_v39, 7  ;;  %vm2014_vm5 = vcmask 64512   ;;  %vm1932_vm6 = vcmask 261120  }
  0x95   :  { %v2799_v9 = vpack.c.bf16 %v149_v7, %v147_v6  ;;  %v249_v11 = vld [vmem:[#allocation6 + $0x10] sm:$0xff]  ;;  %2798 = vmatprep.subr.bf16.mxu0 %v2797_v4  ;;  %v343_v15 = vld [vmem:[%s4154_s6 + $0x18] sm:$0xff]  ;;  %v342_v18 = vld [vmem:[%s4154_s6 + $0x10] sm:$0xff]  ;;  %vm2181_vm9 = vcmask 63488   ;;  %vm2090_vm10 = vcmask 58368   ;;  %vm2200_vm11 = vcmask 50176  }
  0x96   :  { %v145_v12 = vld [vmem:[%s4148_s0] sm:$0xff]  ;;  %v2803_v13 = vpack.c.bf16 %v249_v11, %v247_v10  ;;  %2802 = vmatprep.subr.bf16.mxu1 %v2801_v8  ;;  %v3622_v17 = vpack.c.bf16 %v343_v15, %v341_v14  ;;  %v345_v19 = vld [vmem:[%s4154_s6 + $0x28] sm:$0xff]  ;;  %v347_v20 = vld [vmem:[%s4154_s6 + $0x38] sm:$0xff]  ;;  %v3720_v41 = vsub.s32 0, %v3717_v40  ;;  %v3723_v44 = vsub.s32 1, %v3717_v40 }
  0x97   :  { %v340_v16 = vld [vmem:[%s4154_s6] sm:$0xff]  ;;  %2800 = vmatpush1.bf16.msra.mxu0 %v2799_v9  ;;  %v3635_v22 = vpack.c.bf16 %v347_v20, %v345_v19  ;;  %v346_v24 = vld [vmem:[%s4154_s6 + $0x30] sm:$0xff]  ;;  %v349_v25 = vld [vmem:[%s4154_s6 + $0x48] sm:$0xff]  ;;  %vm2661_vm12 = vcmask 1041408   ;;  %vm2669_vm13 = vcmask 0  }
  0x98   :  { %2804 = vmatpush1.bf16.msra.mxu1 %v2803_v13  ;;  %v3633_v21 = vpack.c.bf16 %v342_v18, %v340_v16  ;;  %v344_v23 = vld [vmem:[%s4154_s6 + $0x20] sm:$0xff]  ;;  %2806 = vmatprep.subr.bf16.mxu0 %v3622_v17  ;;  %v351_v26 = vld [vmem:[%s4154_s6 + $0x58] sm:$0xff]  ;;  %v146_v29 = vld [vmem:[%s4148_s0 + $0x8] sm:$0xff] }
  0x99   :  { %2822 = vmatprep.subr.bf16.mxu1 %v3622_v17  ;;  %v3654_v27 = vpack.c.bf16 %v346_v24, %v344_v23  ;;  %v3658_v28 = vpack.c.bf16 %v351_v26, %v349_v25  ;;  %v348_v30 = vld [vmem:[%s4154_s6 + $0x40] sm:$0xff]  ;;  %v350_v31 = vld [vmem:[%s4154_s6 + $0x50] sm:$0xff]  ;;  %v353_v32 = vld [vmem:[%s4154_s6 + $0x68] sm:$0xff] }
  0x9a   :  { %2690 = vmatmul.mubr.msk.f32.vlgmr.msra.gmra.mrb[0].mxu0 %vm163_vm0, %v145_v12  ;;  %v355_v33 = vld [vmem:[%s4154_s6 + $0x78] sm:$0xff]  ;;  %v3681_v34 = vpack.c.bf16 %v350_v31, %v348_v30  ;;  %v352_v36 = vld [vmem:[%s4154_s6 + $0x60] sm:$0xff]  ;;  %v354_v37 = vld [vmem:[%s4154_s6 + $0x70] sm:$0xff]  ;;  %s3422_s6 = smov 64  }
  0x9b   :  { %2692 = vmatmul.mubr.msk.f32.vlgmr.msra.gmra.mrb[0].mxu1 %vm163_vm0, %v145_v12  ;;  %2808 = vmatpush1.bf16.msra.mxu0 %v3633_v21  ;;  %v3684_v35 = vpack.c.bf16 %v355_v33, %v353_v32  ;;  %v3697_v38 = vpack.c.bf16 %v354_v37, %v352_v36  ;;  %v151_v42 = vld [vmem:[#allocation8] sm:$0x3]  ;;  %v251_v43 = vld [vmem:[#allocation9] sm:$0x3] }
  0x9c   :  { %2810 = vmatprep.subr.bf16.mxu0 %v3635_v22  ;;  %333 = vmatprep.mubr.f32.mxu1 %v3421_v0  ;;  %v156_v45 = vrot.slane %v151_v42, %v3720_v41  ;;  %v256_v46 = vrot.slane %v251_v43, %v3720_v41  ;;  %v160_v47 = vrot.slane %v151_v42, %v3723_v44 }
  0x9d   :  { %240 = vmatprep.mubr.f32.mxu0 %v3421_v0  ;;  %2824 = vmatpush1.bf16.msra.mxu1 %v3633_v21  ;;  %v260_v48 = vrot.slane %v251_v43, %v3723_v44 }
  0x9e   :  { %2691 = vmatmul.mubr.msk.f32.gmra.mrb[2].mxu0 %vm163_vm0, %v146_v29  ;;  %2826 = vmatprep.subr.bf16.mxu1 %v3635_v22 }
  0x9f   :  { %2812 = vmatpush1.bf16.msra.mxu0 %v3654_v27  ;;  %2693 = vmatmul.mubr.msk.f32.gmra.mrb[2].mxu1 %vm163_vm0, %v146_v29 }
  0xa0   :  { %2814 = vmatprep.subr.bf16.mxu0 %v3658_v28  ;;  %440 = vmatprep.mubr.f32.mxu0 %v3421_v0 }
  0xa1   :  { %2828 = vmatpush1.bf16.msra.mxu1 %v3654_v27  ;;  %580 = vmatprep.mubr.f32.mxu1 %v3421_v0 }
  0xa2   :  { %2830 = vmatprep.subr.bf16.mxu1 %v3658_v28 }
  0xa3   :  { %2816 = vmatpush1.bf16.msra.mxu0 %v3681_v34 }
  0xa4   :  { %2818 = vmatprep.subr.bf16.mxu0 %v3684_v35 }
  0xa5   :  { %2832 = vmatpush1.bf16.msra.mxu1 %v3681_v34 }
  0xa6   :  { %2834 = vmatprep.subr.bf16.mxu1 %v3684_v35 }
  0xa7   :  { %2820 = vmatpush1.bf16.msra.mxu0 %v3697_v38 }
  0xa8   :  { %2838 = vmatprep.subr.bf16.mxu0 %v3622_v17 }
  0xa9   :  { %2836 = vmatpush1.bf16.msra.mxu1 %v3697_v38 }
  0xaa   :  { %441 = vmatmul.mubr.f32.vlgmr.msra.gmra.mrb[4].mxu0 %v3421_v0  ;;  %2854 = vmatprep.subr.bf16.mxu1 %v3622_v17 }
  0xab   :  { %2840 = vmatpush1.bf16.msra.mxu0 %v3633_v21  ;;  %725 = vmatprep.mubr.f32.mxu0 %v3421_v0 }
  0xac   :  { %2842 = vmatprep.subr.bf16.mxu0 %v3635_v22 }
  0xaf   :  { %2844 = vmatpush1.bf16.msra.mxu0 %v3654_v27 }
  0xb0   :  { %2846 = vmatprep.subr.bf16.mxu0 %v3658_v28 }
  0xb3   :  { %2848 = vmatpush1.bf16.msra.mxu0 %v3681_v34 }
  0xb4   :  { %2850 = vmatprep.subr.bf16.mxu0 %v3684_v35 }
  0xb7   :  { %2852 = vmatpush1.bf16.msra.mxu0 %v3697_v38 }
  0xb8   :  { %2870 = vmatprep.subr.bf16.mxu0 %v3622_v17 }
 0x16d   :  { %v236_v49 = vpop.f32.mrb[0].mxu0 }
 0x16e   :  { %v329_v50 = vpop.f32.mrb[0].mxu1  ;;  %v238_v51 = vpop.f32.mrb[1].mxu0  ;;  %v237_v52 = vadd.f32 %v236_v49, %v156_v45 }
 0x16f   :  { %v330_v53 = vadd.f32 %v329_v50, %v256_v46  ;;  %v331_v54 = vpop.f32.mrb[1].mxu1  ;;  %v239_v55 = vadd.f32 %v238_v51, %v160_v47 }
 0x170   :  { %v332_v56 = vadd.f32 %v331_v54, %v260_v48 }
 0x171   :  { %v242_v57 = vpop.f32.mrb[2].mxu0  ;;  %v360_v58 = vrot.slane %v330_v53, 7  ;;  %v495_v59 = vrot.slane %v330_v53, 5  ;;  %v641_v60 = vrot.slane %v330_v53, 3  ;;  %v788_v61 = vrot.slane %v330_v53, 1 }
 0x172   :  { %v335_v62 = vpop.f32.mrb[2].mxu1  ;;  %v243_v63 = vadd.f32 %v242_v57, %v156_v45  ;;  %v244_v1 = vpop.f32.mrb[3].mxu0  ;;  %v361_v2 = vrot.slane %v332_v56, 7  ;;  %v496_v3 = vrot.slane %v332_v56, 5  ;;  %v642_v4 = vrot.slane %v332_v56, 3 }
 0x173   :  { %v336_v5 = vadd.f32 %v335_v62, %v256_v46  ;;  %v337_v6 = vpop.f32.mrb[3].mxu1  ;;  %v245_v7 = vadd.f32 %v244_v1, %v160_v47  ;;  %v3729_v8 = vadd.f32 %v360_v58, %v237_v52  ;;  %v3731_v9 = vadd.f32 %v495_v59, %v237_v52 }
 0x174   :  { %v338_v10 = vadd.f32 %v337_v6, %v260_v48  ;;  %v3733_v11 = vadd.f32 %v361_v2, %v239_v55  ;;  %v3735_v12 = vadd.f32 %v496_v3, %v239_v55  ;;  %v3737_v13 = vadd.f32 %v641_v60, %v237_v52 }
 0x175   :  { %v362_v14 = vrot.slane %v336_v5, 7  ;;  %v497_v15 = vrot.slane %v336_v5, 5  ;;  %v643_v16 = vrot.slane %v336_v5, 3  ;;  %v3739_v18 = vadd.f32 %v642_v4, %v239_v55 }
 0x176   :  { %v363_v19 = vrot.slane %v338_v10, 7  ;;  %v498_v20 = vrot.slane %v338_v10, 5  ;;  %v644_v23 = vrot.slane %v338_v10, 3  ;;  %v790_v24 = vrot.slane %v336_v5, 1 }
 0x177   :  { %v3741_v25 = vadd.f32 %v362_v14, %v243_v63  ;;  %v3743_v26 = vadd.f32 %v497_v15, %v243_v63  ;;  %v3745_v29 = vadd.f32 %v643_v16, %v243_v63  ;;  %v3747_v30 = vadd.f32 %v788_v61, %v237_v52 }
 0x178   :  { %v3749_v31 = vadd.f32 %v363_v19, %v245_v7  ;;  %v3751_v32 = vadd.f32 %v498_v20, %v245_v7  ;;  %v3753_v33 = vadd.f32 %v644_v23, %v245_v7  ;;  %v3755_v36 = vadd.f32 %v790_v24, %v243_v63 }
 0x179   :  { %v789_v37 = vrot.slane %v332_v56, 1  ;;  %v791_v42 = vrot.slane %v338_v10, 1 }
 0x17b   :  { %v3757_v43 = vadd.f32 %v789_v37, %v239_v55  ;;  %v3759_v45 = vadd.f32 %v791_v42, %v245_v7 }
 0x17d   :  { %v442_v46 = vpop.f32.mrb[4].mxu0 }
 0x17e   :  { %v449_v47 = vrot.slane %v442_v46, 1  ;;  %v455_v48 = vadd.f32 %v442_v46, %v3729_v8  ;;  %v444_v49 = vpop.f32.mrb[5].mxu0 }
 0x17f   :  { %v450_v52 = vrot.slane %v444_v49, 1  ;;  %v456_v54 = vadd.f32 %v444_v49, %v3733_v11 }
 0x180   :  { %v457_v50 = vadd.f32 %v449_v47, %v3741_v25  ;;  %v459_v51 = vmul.f32 0.5, %v455_v48 }
 0x181   :  { %v458_v56 = vadd.f32 %v450_v52, %v3749_v31  ;;  %v469_v4 = vmul.f32 0.5, %v456_v54 }
 0x182   :  { %v460_v53 = vmul.f32 0.5, %v457_v50  ;;  %2989 = vtanh.f32 %v459_v51 }
 0x183   :  { %v470_v3 = vmul.f32 0.5, %v458_v56 }
 0x184   :  { %2991 = vtanh.f32 %v460_v53 }
 0x185   :  { %2993 = vtanh.f32 %v456_v54 }
 0x186   :  { %2995 = vtanh.f32 %v458_v56 }
 0x187   :  { %2997 = vtanh.f32 %v470_v3 }
 0x188   :  { %2999 = vtanh.f32 %v469_v4 }
 0x18c   :  { %v2990_v55 = vpop.eup %2989 }
 0x18d   :  { %v463_v57 = vadd.f32 1.0, %v2990_v55 }
 0x18e   :  { %v2992_v58 = vpop.eup %2991 }
 0x18f   :  { %v464_v59 = vadd.f32 1.0, %v2992_v58  ;;  %v465_v60 = vmul.f32 0.5, %v463_v57  ;;  %v2994_v61 = vpop.eup %2993 }
 0x190   :  { %v2996_v1 = vpop.eup %2995 }
 0x191   :  { %v466_v62 = vmul.f32 0.5, %v464_v59  ;;  %v479_v63 = vmul.f32 %v2994_v61, %v465_v60  ;;  %v477_v10 = vmul.f32 0.0, %v465_v60  ;;  %v2998_v15 = vpop.eup %2997 }
 0x192   :  { %v474_v19 = vadd.f32 1.0, %v2998_v15  ;;  %v3000_v20 = vpop.eup %2999 }
 0x193   :  { %v480_v2 = vmul.f32 %v2996_v1, %v466_v62  ;;  %v478_v5 = vmul.f32 0.0, %v466_v62  ;;  %v473_v23 = vadd.f32 1.0, %v3000_v20 }
 0x194   :  { %v476_v24 = vmul.f32 0.5, %v474_v19 }
 0x195   :  { %485 = vrot.lane.b32.xlu0 %v480_v2, %s3422_s6  ;;  %v475_v46 = vmul.f32 0.5, %v473_v23 }
 0x199   :  { %483 = vrot.lane.b32.xlu0 %v479_v63, %s3422_s6 }
 0x207   :  { %v486_v6 = vpop.permute.xlu0 %485 }
 0x208   :  { %v490_v7 = vadd.f32 %v486_v6, %v478_v5 }
 0x20a   :  { %3001 = vtanh.f32 %v490_v7  ;;  %v620_v2 = vrot.slane %v490_v7, 7 }
 0x20b   :  { %v484_v14 = vpop.permute.xlu0 %483 }
 0x20c   :  { %v489_v16 = vadd.f32 %v484_v14, %v477_v10 }
 0x20e   :  { %3003 = vtanh.f32 %v489_v16  ;;  %v619_v6 = vrot.slane %v489_v16, 7 }
 0x214   :  { %v3002_v37 = vpop.eup %3001 }
 0x215   :  { %v494_v42 = vmul.f32 %v3002_v37, %v476_v24 }
 0x217   :  { %v509_v49 = vrot.slane %v494_v42, 7 }
 0x218   :  { %v3004_v47 = vpop.eup %3003 }
 0x219   :  { %v493_v48 = vmul.f32 %v3004_v47, %v475_v46 }
 0x21b   :  { %v511_v50 = vsel %vm510_vm1, %v509_v49, %v493_v48 }
 0x21c   :  { %512 = vrot.lane.b32.xlu1 %v511_v50, %s3422_s6 }
 0x28e   :  { %v3769_v51 = vpop.permute.xlu1 %512 }
 0x28f   :  { %2694 = vmatmul.mubr.msk.f32.vlgmr.msra.gmra.mrb[4].mxu1 %vm372_vm2, %v3769_v51 }
 0x290   :  { %2856 = vmatpush1.bf16.msra.mxu1 %v3633_v21  ;;  %873 = vmatprep.mubr.f32.mxu1 %v3421_v0 }
 0x291   :  { %2858 = vmatprep.subr.bf16.mxu1 %v3635_v22 }
 0x294   :  { %2860 = vmatpush1.bf16.msra.mxu1 %v3654_v27 }
 0x295   :  { %2862 = vmatprep.subr.bf16.mxu1 %v3658_v28 }
 0x298   :  { %2864 = vmatpush1.bf16.msra.mxu1 %v3681_v34 }
 0x299   :  { %2866 = vmatprep.subr.bf16.mxu1 %v3684_v35 }
 0x29c   :  { %2868 = vmatpush1.bf16.msra.mxu1 %v3697_v38 }
 0x29d   :  { %2886 = vmatprep.subr.bf16.mxu1 %v3622_v17 }
 0x362   :  { %v582_v52 = vpop.f32.mrb[4].mxu1 }
 0x363   :  { %v589_v53 = vrot.slane %v582_v52, 7  ;;  %v597_v54 = vadd.f32 %v582_v52, %v3743_v26  ;;  %v584_v56 = vpop.f32.mrb[5].mxu1 }
 0x364   :  { %v590_v58 = vrot.slane %v584_v56, 7  ;;  %v598_v60 = vadd.f32 %v584_v56, %v3751_v32 }
 0x365   :  { %v595_v55 = vadd.f32 %v589_v53, %v3731_v9  ;;  %v600_v57 = vmul.f32 0.5, %v597_v54 }
 0x366   :  { %v596_v61 = vadd.f32 %v590_v58, %v3735_v12  ;;  %v610_v24 = vmul.f32 0.5, %v598_v60 }
 0x367   :  { %v599_v59 = vmul.f32 0.5, %v595_v55  ;;  %3005 = vtanh.f32 %v600_v57 }
 0x368   :  { %v609_v37 = vmul.f32 0.5, %v596_v61 }
 0x369   :  { %3007 = vtanh.f32 %v599_v59 }
 0x36a   :  { %3009 = vtanh.f32 %v598_v60 }
 0x36b   :  { %3011 = vtanh.f32 %v596_v61 }
 0x36c   :  { %3013 = vtanh.f32 %v610_v24 }
 0x36d   :  { %3015 = vtanh.f32 %v609_v37 }
 0x371   :  { %v3006_v62 = vpop.eup %3005 }
 0x372   :  { %v604_v63 = vadd.f32 1.0, %v3006_v62 }
 0x373   :  { %v3008_v1 = vpop.eup %3007 }
 0x374   :  { %v606_v3 = vmul.f32 0.5, %v604_v63  ;;  %v603_v4 = vadd.f32 1.0, %v3008_v1  ;;  %v3010_v5 = vpop.eup %3009 }
 0x375   :  { %v3012_v19 = vpop.eup %3011 }
 0x376   :  { %v626_v10 = vmul.f32 %v3010_v5, %v606_v3  ;;  %v605_v14 = vmul.f32 0.5, %v603_v4  ;;  %v624_v15 = vmul.f32 %v620_v2, %v606_v3  ;;  %v3014_v16 = vpop.eup %3013 }
 0x377   :  { %v3016_v48 = vpop.eup %3015  ;;  %v614_v49 = vadd.f32 1.0, %v3014_v16 }
 0x378   :  { %631 = vrot.lane.b32.xlu0 %v626_v10, %s3422_s6  ;;  %v625_v20 = vmul.f32 %v3012_v19, %v605_v14  ;;  %v623_v23 = vmul.f32 %v619_v6, %v605_v14  ;;  %v613_v50 = vadd.f32 1.0, %v3016_v48 }
 0x379   :  { %v616_v52 = vmul.f32 0.5, %v614_v49 }
 0x37a   :  { %629 = vrot.lane.b32.xlu1 %v625_v20, %s3422_s6  ;;  %v615_v54 = vmul.f32 0.5, %v613_v50 }
 0x3ea   :  { %v632_v42 = vpop.permute.xlu0 %631 }
 0x3eb   :  { %v636_v7 = vadd.f32 %v632_v42, %v624_v15 }
 0x3ec   :  { %v630_v46 = vpop.permute.xlu1 %629 }
 0x3ed   :  { %3017 = vtanh.f32 %v636_v7  ;;  %v635_v47 = vadd.f32 %v630_v46, %v623_v23  ;;  %v767_v16 = vrot.slane %v636_v7, 7 }
 0x3ef   :  { %3019 = vtanh.f32 %v635_v47  ;;  %v766_v37 = vrot.slane %v635_v47, 7 }
 0x3f7   :  { %v3018_v53 = vpop.eup %3017 }
 0x3f8   :  { %v640_v56 = vmul.f32 %v3018_v53, %v616_v52 }
 0x3f9   :  { %v3020_v55 = vpop.eup %3019 }
 0x3fa   :  { %v639_v57 = vmul.f32 %v3020_v55, %v615_v54 }
 0x3fc   :  { %v655_v58 = vrot.slane %v639_v57, 1 }
 0x3fe   :  { %v656_v59 = vsel %vm510_vm1, %v640_v56, %v655_v58 }
 0x3ff   :  { %657 = vrot.lane.b32.xlu1 %v656_v59, %s3422_s6 }
 0x471   :  { %v3790_v60 = vpop.permute.xlu1 %657 }
 0x472   :  { %2695 = vmatmul.mubr.msk.f32.vlgmr.msra.gmra.mrb[6].mxu0 %vm372_vm2, %v3790_v60 }
 0x473   :  { %2872 = vmatpush1.bf16.msra.mxu0 %v3633_v21  ;;  %1009 = vmatprep.mubr.f32.mxu0 %v3421_v0 }
 0x474   :  { %2874 = vmatprep.subr.bf16.mxu0 %v3635_v22 }
 0x477   :  { %2876 = vmatpush1.bf16.msra.mxu0 %v3654_v27 }
 0x478   :  { %2878 = vmatprep.subr.bf16.mxu0 %v3658_v28 }
 0x47b   :  { %2880 = vmatpush1.bf16.msra.mxu0 %v3681_v34 }
 0x47c   :  { %2882 = vmatprep.subr.bf16.mxu0 %v3684_v35 }
 0x47f   :  { %2884 = vmatpush1.bf16.msra.mxu0 %v3697_v38 }
 0x480   :  { %2902 = vmatprep.subr.bf16.mxu0 %v3622_v17 }
 0x545   :  { %v727_v61 = vpop.f32.mrb[6].mxu0 }
 0x546   :  { %v734_v62 = vrot.slane %v727_v61, 6  ;;  %v736_v63 = vrot.slane %v727_v61, 7  ;;  %v729_v1 = vpop.f32.mrb[7].mxu0 }
 0x547   :  { %v735_v4 = vrot.slane %v729_v1, 6  ;;  %v737_v5 = vrot.slane %v729_v1, 7 }
 0x548   :  { %v742_v2 = vadd.f32 %v734_v62, %v3737_v13  ;;  %v744_v3 = vadd.f32 %v736_v63, %v3745_v29 }
 0x549   :  { %v743_v14 = vadd.f32 %v735_v4, %v3739_v18  ;;  %v745_v15 = vadd.f32 %v737_v5, %v3753_v33 }
 0x54a   :  { %v746_v6 = vmul.f32 0.5, %v742_v2  ;;  %v747_v10 = vmul.f32 0.5, %v744_v3 }
 0x54b   :  { %v756_v56 = vmul.f32 0.5, %v743_v14  ;;  %v757_v55 = vmul.f32 0.5, %v745_v15 }
 0x54c   :  { %3021 = vtanh.f32 %v746_v6 }
 0x54d   :  { %3023 = vtanh.f32 %v747_v10 }
 0x54e   :  { %3025 = vtanh.f32 %v743_v14 }
 0x54f   :  { %3027 = vtanh.f32 %v745_v15 }
 0x550   :  { %3029 = vtanh.f32 %v756_v56 }
 0x551   :  { %3031 = vtanh.f32 %v757_v55 }
 0x556   :  { %v3022_v19 = vpop.eup %3021 }
 0x557   :  { %v3024_v20 = vpop.eup %3023  ;;  %v750_v23 = vadd.f32 1.0, %v3022_v19 }
 0x558   :  { %v751_v24 = vadd.f32 1.0, %v3024_v20  ;;  %v3026_v46 = vpop.eup %3025 }
 0x559   :  { %v752_v42 = vmul.f32 0.5, %v750_v23  ;;  %v3028_v49 = vpop.eup %3027 }
 0x55a   :  { %v753_v48 = vmul.f32 0.5, %v751_v24  ;;  %v3030_v7 = vpop.eup %3029 }
 0x55b   :  { %v772_v50 = vmul.f32 %v3026_v46, %v752_v42  ;;  %v770_v52 = vmul.f32 %v766_v37, %v752_v42  ;;  %v3032_v61 = vpop.eup %3031  ;;  %v760_v62 = vadd.f32 1.0, %v3030_v7 }
 0x55c   :  { %v773_v53 = vmul.f32 %v3028_v49, %v753_v48  ;;  %v771_v54 = vmul.f32 %v767_v16, %v753_v48  ;;  %v761_v63 = vadd.f32 1.0, %v3032_v61 }
 0x55d   :  { %776 = vrot.lane.b32.xlu0 %v772_v50, %s3422_s6  ;;  %v762_v1 = vmul.f32 0.5, %v760_v62 }
 0x55e   :  { %778 = vrot.lane.b32.xlu1 %v773_v53, %s3422_s6  ;;  %v763_v3 = vmul.f32 0.5, %v761_v63 }
 0x5cf   :  { %v777_v57 = vpop.permute.xlu0 %776 }
 0x5d0   :  { %v779_v58 = vpop.permute.xlu1 %778  ;;  %v782_v47 = vadd.f32 %v777_v57, %v770_v52 }
 0x5d1   :  { %v783_v59 = vadd.f32 %v779_v58, %v771_v54 }
 0x5d2   :  { %3033 = vtanh.f32 %v782_v47  ;;  %v914_v57 = vrot.slane %v782_v47, 7 }
 0x5d3   :  { %3035 = vtanh.f32 %v783_v59  ;;  %v915_v61 = vrot.slane %v783_v59, 7 }
 0x5dc   :  { %v3034_v2 = vpop.eup %3033 }
 0x5dd   :  { %v3036_v4 = vpop.eup %3035  ;;  %v786_v5 = vmul.f32 %v3034_v2, %v762_v1 }
 0x5de   :  { %v787_v6 = vmul.f32 %v3036_v4, %v763_v3 }
 0x5df   :  { %v802_v10 = vrot.slane %v786_v5, 2 }
 0x5e0   :  { %v803_v14 = vrot.slane %v787_v6, 1 }
 0x5e2   :  { %v804_v15 = vsel %vm510_vm1, %v803_v14, %v802_v10 }
 0x5e3   :  { %805 = vrot.lane.b32.xlu0 %v804_v15, %s3422_s6 }
 0x655   :  { %v3811_v19 = vpop.permute.xlu0 %805 }
 0x656   :  { %2696 = vmatmul.mubr.msk.f32.vlgmr.msra.gmra.mrb[6].mxu1 %vm372_vm2, %v3811_v19 }
 0x657   :  { %2888 = vmatpush1.bf16.msra.mxu1 %v3633_v21  ;;  %1145 = vmatprep.mubr.f32.mxu1 %v3421_v0 }
 0x658   :  { %2890 = vmatprep.subr.bf16.mxu1 %v3635_v22 }
 0x65b   :  { %2892 = vmatpush1.bf16.msra.mxu1 %v3654_v27 }
 0x65c   :  { %2894 = vmatprep.subr.bf16.mxu1 %v3658_v28 }
 0x65f   :  { %2896 = vmatpush1.bf16.msra.mxu1 %v3681_v34 }
 0x660   :  { %2898 = vmatprep.subr.bf16.mxu1 %v3684_v35 }
 0x663   :  { %2900 = vmatpush1.bf16.msra.mxu1 %v3697_v38 }
 0x664   :  { %2918 = vmatprep.subr.bf16.mxu1 %v3622_v17 }
 0x729   :  { %v875_v20 = vpop.f32.mrb[6].mxu1 }
 0x72a   :  { %v882_v23 = vrot.slane %v875_v20, 5  ;;  %v884_v24 = vrot.slane %v875_v20, 6  ;;  %v877_v37 = vpop.f32.mrb[7].mxu1 }
 0x72b   :  { %v883_v16 = vrot.slane %v877_v37, 5  ;;  %v885_v48 = vrot.slane %v877_v37, 6 }
 0x72c   :  { %v890_v42 = vadd.f32 %v882_v23, %v3747_v30  ;;  %v892_v46 = vadd.f32 %v884_v24, %v3755_v36 }
 0x72d   :  { %v891_v52 = vadd.f32 %v883_v16, %v3757_v43  ;;  %v893_v53 = vadd.f32 %v885_v48, %v3759_v45 }
 0x72e   :  { %v894_v49 = vmul.f32 0.5, %v890_v42  ;;  %v895_v50 = vmul.f32 0.5, %v892_v46 }
 0x72f   :  { %v904_v5 = vmul.f32 0.5, %v891_v52  ;;  %v905_v6 = vmul.f32 0.5, %v893_v53 }
 0x730   :  { %3037 = vtanh.f32 %v894_v49 }
 0x731   :  { %3039 = vtanh.f32 %v895_v50 }
 0x732   :  { %3041 = vtanh.f32 %v891_v52 }
 0x733   :  { %3043 = vtanh.f32 %v893_v53 }
 0x734   :  { %3045 = vtanh.f32 %v904_v5 }
 0x735   :  { %3047 = vtanh.f32 %v905_v6 }
 0x73a   :  { %v3038_v17 = vpop.eup %3037 }
 0x73b   :  { %v3040_v54 = vpop.eup %3039  ;;  %v898_v56 = vadd.f32 1.0, %v3038_v17 }
 0x73c   :  { %v899_v55 = vadd.f32 1.0, %v3040_v54  ;;  %v3042_v7 = vpop.eup %3041 }
 0x73d   :  { %v900_v58 = vmul.f32 0.5, %v898_v56  ;;  %v3044_v63 = vpop.eup %3043 }
 0x73e   :  { %v901_v62 = vmul.f32 0.5, %v899_v55  ;;  %v3046_v59 = vpop.eup %3045 }
 0x73f   :  { %v920_v1 = vmul.f32 %v3042_v7, %v900_v58  ;;  %v918_v2 = vmul.f32 %v914_v57, %v900_v58  ;;  %v3048_v20 = vpop.eup %3047  ;;  %v908_v23 = vadd.f32 1.0, %v3046_v59 }
 0x740   :  { %v921_v3 = vmul.f32 %v3044_v63, %v901_v62  ;;  %v919_v4 = vmul.f32 %v915_v61, %v901_v62  ;;  %v909_v24 = vadd.f32 1.0, %v3048_v20 }
 0x741   :  { %924 = vrot.lane.b32.xlu1 %v920_v1, %s3422_s6  ;;  %v910_v37 = vmul.f32 0.5, %v908_v23 }
 0x742   :  { %926 = vrot.lane.b32.xlu0 %v921_v3, %s3422_s6  ;;  %v911_v46 = vmul.f32 0.5, %v909_v24 }
 0x7b3   :  { %v925_v10 = vpop.permute.xlu1 %924 }
 0x7b4   :  { %v927_v14 = vpop.permute.xlu0 %926  ;;  %v930_v47 = vadd.f32 %v925_v10, %v918_v2 }
 0x7b5   :  { %v931_v15 = vadd.f32 %v927_v14, %v919_v4 }
 0x7b6   :  { %3049 = vtanh.f32 %v930_v47  ;;  %v1050_v14 = vrot.slane %v930_v47, 7 }
 0x7b7   :  { %3051 = vtanh.f32 %v931_v15 }
 0x7c0   :  { %v3050_v42 = vpop.eup %3049 }
 0x7c1   :  { %v3052_v16 = vpop.eup %3051  ;;  %v934_v48 = vmul.f32 %v3050_v42, %v910_v37 }
 0x7c2   :  { %v935_v49 = vmul.f32 %v3052_v16, %v911_v46 }
 0x7c3   :  { %v938_v50 = vrot.slane %v934_v48, 3 }
 0x7c4   :  { %v939_v52 = vrot.slane %v935_v49, 2 }
 0x7c6   :  { %v940_v53 = vsel %vm510_vm1, %v939_v52, %v938_v50 }
 0x7c7   :  { %941 = vrot.lane.b32.xlu1 %v940_v53, %s3422_s6 }
 0x839   :  { %v3832_v17 = vpop.permute.xlu1 %941 }
 0x83a   :  { %2697 = vmatmul.mubr.msk.f32.vlgmr.msra.gmra.mrb[8].mxu0 %vm372_vm2, %v3832_v17 }
 0x83b   :  { %2904 = vmatpush1.bf16.msra.mxu0 %v3633_v21  ;;  %1281 = vmatprep.mubr.f32.mxu0 %v3421_v0 }
 0x83c   :  { %2906 = vmatprep.subr.bf16.mxu0 %v3635_v22 }
 0x83f   :  { %2908 = vmatpush1.bf16.msra.mxu0 %v3654_v27 }
 0x840   :  { %2910 = vmatprep.subr.bf16.mxu0 %v3658_v28 }
 0x843   :  { %2912 = vmatpush1.bf16.msra.mxu0 %v3681_v34 }
 0x844   :  { %2914 = vmatprep.subr.bf16.mxu0 %v3684_v35 }
 0x847   :  { %2916 = vmatpush1.bf16.msra.mxu0 %v3697_v38 }
 0x90d   :  { %v1011_v54 = vpop.f32.mrb[8].mxu0 }
 0x90e   :  { %v1018_v56 = vrot.slane %v1011_v54, 4  ;;  %v1020_v55 = vrot.slane %v1011_v54, 5  ;;  %v1013_v57 = vpop.f32.mrb[9].mxu0 }
 0x90f   :  { %v1019_v61 = vrot.slane %v1013_v57, 4  ;;  %v1021_v62 = vrot.slane %v1013_v57, 5 }
 0x910   :  { %v1026_v58 = vadd.f32 %v1018_v56, %v3729_v8  ;;  %v1028_v7 = vadd.f32 %v1020_v55, %v3741_v25  ;;  %v1051_v25 = vrot.slane %v931_v15, 7 }
 0x911   :  { %v1027_v2 = vadd.f32 %v1019_v61, %v3733_v11  ;;  %v1029_v3 = vadd.f32 %v1021_v62, %v3749_v31 }
 0x912   :  { %v1030_v63 = vmul.f32 0.5, %v1026_v58  ;;  %v1031_v1 = vmul.f32 0.5, %v1028_v7 }
 0x913   :  { %v1040_v11 = vmul.f32 0.5, %v1027_v2  ;;  %v1041_v31 = vmul.f32 0.5, %v1029_v3 }
 0x914   :  { %3053 = vtanh.f32 %v1030_v63 }
 0x915   :  { %3055 = vtanh.f32 %v1031_v1  ;;  %v3423_v1 = vmov 1966171168  }
 0x916   :  { %3057 = vtanh.f32 %v1027_v2  ;;  %v1495_v2 = vunpack.c.l.s4 %v3423_v1 }
 0x917   :  { %3059 = vtanh.f32 %v1029_v3 }
 0x918   :  { %3061 = vtanh.f32 %v1040_v11  ;;  %v1496_v3 = vunpack.c.0.s8 %v1495_v2 }
 0x919   :  { %3063 = vtanh.f32 %v1041_v31 }
 0x91e   :  { %v3054_v4 = vpop.eup %3053 }
 0x91f   :  { %v3056_v5 = vpop.eup %3055  ;;  %v1034_v6 = vadd.f32 1.0, %v3054_v4  ;;  %v3859_v4 = vand.u32 127, %v153_v39 }
 0x920   :  { %v1035_v10 = vadd.f32 1.0, %v3056_v5  ;;  %v3058_v59 = vpop.eup %3057  ;;  %v3862_v5 = vsub.s32 %v1496_v3, %v3717_v40 }
 0x921   :  { %v1036_v8 = vmul.f32 0.5, %v1034_v6  ;;  %v3060_v23 = vpop.eup %3059  ;;  %vm1482_vm3 = vcmp.lt.s32.totalorder %v3859_v4, 32 }
 0x922   :  { %v1037_v20 = vmul.f32 0.5, %v1035_v10  ;;  %v3062_v15 = vpop.eup %3061 }
 0x923   :  { %v1056_v24 = vmul.f32 %v3058_v59, %v1036_v8  ;;  %v1054_v37 = vmul.f32 %v1050_v14, %v1036_v8  ;;  %v3064_v50 = vpop.eup %3063  ;;  %v1044_v52 = vadd.f32 1.0, %v3062_v15 }
 0x924   :  { %v1057_v42 = vmul.f32 %v3060_v23, %v1037_v20  ;;  %v1055_v46 = vmul.f32 %v1051_v25, %v1037_v20  ;;  %v1045_v53 = vadd.f32 1.0, %v3064_v50 }
 0x925   :  { %1060 = vrot.lane.b32.xlu0 %v1056_v24, %s3422_s6  ;;  %v1046_v54 = vmul.f32 0.5, %v1044_v52 }
 0x926   :  { %1062 = vrot.lane.b32.xlu1 %v1057_v42, %s3422_s6  ;;  %v1047_v55 = vmul.f32 0.5, %v1045_v53 }
 0x997   :  { %v1061_v16 = vpop.permute.xlu0 %1060 }
 0x998   :  { %v1063_v48 = vpop.permute.xlu1 %1062  ;;  %v3850_v47 = vadd.f32 %v1061_v16, %v1054_v37 }
 0x999   :  { %v3852_v49 = vadd.f32 %v1063_v48, %v1055_v46 }
 0x99a   :  { %3065 = vtanh.f32 %v3850_v47 }
 0x99b   :  { %3067 = vtanh.f32 %v3852_v49  ;;  %v1187_v53 = vrot.slane %v3852_v49, 7 }
 0x9a4   :  { %v3066_v56 = vpop.eup %3065 }
 0x9a5   :  { %v3068_v57 = vpop.eup %3067  ;;  %v1070_v58 = vmul.f32 %v3066_v56, %v1046_v54 }
 0x9a6   :  { %v1071_v7 = vmul.f32 %v3068_v57, %v1047_v55 }
 0x9a7   :  { %v1074_v61 = vrot.slane %v1070_v58, 4 }
 0x9a8   :  { %v1075_v62 = vrot.slane %v1071_v7, 3 }
 0x9aa   :  { %v1076_v63 = vsel %vm510_vm1, %v1075_v62, %v1074_v61 }
 0x9ab   :  { %1077 = vrot.lane.b32.xlu0 %v1076_v63, %s3422_s6 }
 0xa1d   :  { %v1078_v6 = vpop.permute.xlu0 %1077 }
 0xa1e   :  { %v1583_v10 = vsel %vm1482_vm3, %v3832_v17, %v1078_v6  ;;  %v1611_v14 = vsel %vm1482_vm3, %v1078_v6, %v3832_v17  ;;  %2698 = vmatmul.mubr.msk.f32.vlgmr.msra.gmra.mrb[8].mxu1 %vm372_vm2, %v1078_v6 }
 0xa1f   :  { %v1591_v8 = vrot.slane %v1583_v10, %v3862_v5  ;;  %v1619_v39 = vrot.slane %v1611_v14, %v3862_v5  ;;  %2920 = vmatpush1.bf16.msra.mxu1 %v3633_v21  ;;  %1417 = vmatprep.mubr.f32.mxu1 %v3421_v0 }
 0xa20   :  { %2922 = vmatprep.subr.bf16.mxu1 %v3635_v22 }
 0xa21   :  { %v1592_v59 = vcombine.high %v1591_v8, %v1591_v8  ;;  %v1599_v25 = vrot.slane %v1591_v8, %v3862_v5  ;;  %v1620_v20 = vcombine.high %v1619_v39, %v1619_v39  ;;  %v1627_v23 = vrot.slane %v1619_v39, %v3862_v5 }
 0xa23   :  { %v1606_v17 = vrot.slane %v1592_v59, %v3862_v5  ;;  %1609 = vst.msk [vmem:[#allocation2 + $0x3] sm:$0x1] %vm1518_vm4, %v1599_v25  ;;  %v1634_v24 = vrot.slane %v1620_v20, %v3862_v5  ;;  %1637 = vst.msk [vmem:[#allocation2 + $0x4] sm:$0x1] %vm1518_vm4, %v1627_v23  ;;  %2924 = vmatpush1.bf16.msra.mxu1 %v3654_v27 }
 0xa24   :  { %2926 = vmatprep.subr.bf16.mxu1 %v3658_v28 }
 0xa25   :  { %1610 = vst.msk [vmem:[#allocation2 + $0xb] sm:$0x1] %vm1518_vm4, %v1606_v17  ;;  %1638 = vst.msk [vmem:[#allocation2 + $0xc] sm:$0x1] %vm1518_vm4, %v1634_v24 }
 0xa27   :  { %2928 = vmatpush1.bf16.msra.mxu1 %v3681_v34 }
 0xa28   :  { %2930 = vmatprep.subr.bf16.mxu1 %v3684_v35 }
 0xa2b   :  { %2932 = vmatpush1.bf16.msra.mxu1 %v3697_v38 }
 0xaf1   :  { %v1147_v21 = vpop.f32.mrb[8].mxu1 }
 0xaf2   :  { %v1154_v22 = vrot.slane %v1147_v21, 3  ;;  %v1156_v37 = vrot.slane %v1147_v21, 4  ;;  %v1149_v42 = vpop.f32.mrb[9].mxu1 }
 0xaf3   :  { %v1155_v11 = vrot.slane %v1149_v42, 3  ;;  %v1157_v28 = vrot.slane %v1149_v42, 4 }
 0xaf4   :  { %v1162_v46 = vadd.f32 %v1154_v22, %v3731_v9  ;;  %v1164_v27 = vadd.f32 %v1156_v37, %v3743_v26  ;;  %v1186_v9 = vrot.slane %v3850_v47, 7 }
 0xaf5   :  { %v1163_v48 = vadd.f32 %v1155_v11, %v3735_v12  ;;  %v1165_v34 = vadd.f32 %v1157_v28, %v3751_v32 }
 0xaf6   :  { %v1166_v31 = vmul.f32 0.5, %v1162_v46  ;;  %v1167_v16 = vmul.f32 0.5, %v1164_v27 }
 0xaf7   :  { %v1176_v32 = vmul.f32 0.5, %v1163_v48  ;;  %v1177_v7 = vmul.f32 0.5, %v1165_v34 }
 0xaf8   :  { %3069 = vtanh.f32 %v1166_v31 }
 0xaf9   :  { %3071 = vtanh.f32 %v1167_v16 }
 0xafa   :  { %3073 = vtanh.f32 %v1163_v48 }
 0xafb   :  { %3075 = vtanh.f32 %v1165_v34 }
 0xafc   :  { %3077 = vtanh.f32 %v1176_v32 }
 0xafd   :  { %3079 = vtanh.f32 %v1177_v7 }
 0xb02   :  { %v3070_v35 = vpop.eup %3069 }
 0xb03   :  { %v3072_v38 = vpop.eup %3071  ;;  %v1170_v15 = vadd.f32 1.0, %v3070_v35 }
 0xb04   :  { %v1171_v50 = vadd.f32 1.0, %v3072_v38  ;;  %v3074_v26 = vpop.eup %3073 }
 0xb05   :  { %v1172_v52 = vmul.f32 0.5, %v1170_v15  ;;  %v3076_v56 = vpop.eup %3075 }
 0xb06   :  { %v1173_v54 = vmul.f32 0.5, %v1171_v50  ;;  %v3078_v49 = vpop.eup %3077 }
 0xb07   :  { %v1192_v55 = vmul.f32 %v3074_v26, %v1172_v52  ;;  %v1190_v57 = vmul.f32 %v1186_v9, %v1172_v52  ;;  %v3080_v1 = vpop.eup %3079  ;;  %v1180_v2 = vadd.f32 1.0, %v3078_v49 }
 0xb08   :  { %v1193_v12 = vmul.f32 %v3076_v56, %v1173_v54  ;;  %v1191_v58 = vmul.f32 %v1187_v53, %v1173_v54  ;;  %v1181_v3 = vadd.f32 1.0, %v3080_v1 }
 0xb09   :  { %1196 = vrot.lane.b32.xlu1 %v1192_v55, %s3422_s6  ;;  %v1182_v6 = vmul.f32 0.5, %v1180_v2 }
 0xb0a   :  { %1198 = vrot.lane.b32.xlu0 %v1193_v12, %s3422_s6  ;;  %v1183_v14 = vmul.f32 0.5, %v1181_v3 }
 0xb7b   :  { %v1197_v61 = vpop.permute.xlu1 %1196 }
 0xb7c   :  { %v1199_v47 = vpop.permute.xlu0 %1198  ;;  %v1202_v62 = vadd.f32 %v1197_v61, %v1190_v57 }
 0xb7d   :  { %v3898_v63 = vadd.f32 %v1199_v47, %v1191_v58 }
 0xb7e   :  { %3081 = vtanh.f32 %v1202_v62  ;;  %v1322_v12 = vrot.slane %v1202_v62, 7 }
 0xb7f   :  { %3083 = vtanh.f32 %v3898_v63 }
 0xb88   :  { %v3082_v10 = vpop.eup %3081 }
 0xb89   :  { %v3084_v8 = vpop.eup %3083  ;;  %v1206_v39 = vmul.f32 %v3082_v10, %v1182_v6 }
 0xb8a   :  { %v1207_v59 = vmul.f32 %v3084_v8, %v1183_v14 }
 0xb8b   :  { %v1210_v25 = vrot.slane %v1206_v39, 5 }
 0xb8c   :  { %v1211_v20 = vrot.slane %v1207_v59, 4 }
 0xb8e   :  { %v1212_v23 = vsel %vm510_vm1, %v1211_v20, %v1210_v25 }
 0xb8f   :  { %1213 = vrot.lane.b32.xlu1 %v1212_v23, %s3422_s6 }
 0xc01   :  { %v1214_v17 = vpop.permute.xlu1 %1213 }
 0xc02   :  { %v1553_v24 = vsel %vm1482_vm3, %v3811_v19, %v1214_v17  ;;  %v1639_v21 = vsel %vm1482_vm3, %v1214_v17, %v3811_v19  ;;  %2699 = vmatmul.mubr.msk.f32.vlgmr.msra.gmra.mrb[10].mxu0 %vm372_vm2, %v1214_v17 }
 0xc03   :  { %v1561_v22 = vrot.slane %v1553_v24, %v3862_v5  ;;  %v1647_v37 = vrot.slane %v1639_v21, %v3862_v5 }
 0xc05   :  { %v1562_v42 = vcombine.high %v1561_v22, %v1561_v22  ;;  %v1569_v46 = vrot.slane %v1561_v22, %v3862_v5  ;;  %v1648_v27 = vcombine.high %v1647_v37, %v1647_v37  ;;  %v1655_v11 = vrot.slane %v1647_v37, %v3862_v5 }
 0xc07   :  { %v1576_v28 = vrot.slane %v1562_v42, %v3862_v5  ;;  %1579 = vst.msk [vmem:[#allocation2 + $0x2] sm:$0x1] %vm1518_vm4, %v1569_v46  ;;  %v1662_v31 = vrot.slane %v1648_v27, %v3862_v5  ;;  %1665 = vst.msk [vmem:[#allocation2 + $0x5] sm:$0x1] %vm1518_vm4, %v1655_v11 }
 0xc09   :  { %1580 = vst.msk [vmem:[#allocation2 + $0xa] sm:$0x1] %vm1518_vm4, %v1576_v28  ;;  %1666 = vst.msk [vmem:[#allocation2 + $0xd] sm:$0x1] %vm1518_vm4, %v1662_v31 }
 0xcd5   :  { %v1283_v19 = vpop.f32.mrb[10].mxu0 }
 0xcd6   :  { %v1290_v16 = vrot.slane %v1283_v19, 2  ;;  %v1292_v48 = vrot.slane %v1283_v19, 3  ;;  %v1285_v34 = vpop.f32.mrb[11].mxu0 }
 0xcd7   :  { %v1291_v15 = vrot.slane %v1285_v34, 2  ;;  %v1293_v50 = vrot.slane %v1285_v34, 3 }
 0xcd8   :  { %v1298_v35 = vadd.f32 %v1290_v16, %v3737_v13  ;;  %v1300_v38 = vadd.f32 %v1292_v48, %v3745_v29  ;;  %v1323_v29 = vrot.slane %v3898_v63, 7 }
 0xcd9   :  { %v1299_v26 = vadd.f32 %v1291_v15, %v3739_v18  ;;  %v1301_v53 = vadd.f32 %v1293_v50, %v3753_v33 }
 0xcda   :  { %v1302_v9 = vmul.f32 0.5, %v1298_v35  ;;  %v1303_v52 = vmul.f32 0.5, %v1300_v38 }
 0xcdb   :  { %v1312_v33 = vmul.f32 0.5, %v1299_v26  ;;  %v1313_v1 = vmul.f32 0.5, %v1301_v53 }
 0xcdc   :  { %3085 = vtanh.f32 %v1302_v9 }
 0xcdd   :  { %3087 = vtanh.f32 %v1303_v52 }
 0xcde   :  { %3089 = vtanh.f32 %v1299_v26 }
 0xcdf   :  { %3091 = vtanh.f32 %v1301_v53 }
 0xce0   :  { %3093 = vtanh.f32 %v1312_v33  ;;  %v1726_v33 = vld [vmem:[#allocation11 + $0x8] sm:$0xff] }
 0xce1   :  { %3095 = vtanh.f32 %v1313_v1 }
 0xce6   :  { %v3086_v54 = vpop.eup %3085 }
 0xce7   :  { %v3088_v56 = vpop.eup %3087  ;;  %v1306_v55 = vadd.f32 1.0, %v3086_v54 }
 0xce8   :  { %v1307_v57 = vadd.f32 1.0, %v3088_v56  ;;  %v3090_v58 = vpop.eup %3089 }
 0xce9   :  { %v1308_v13 = vmul.f32 0.5, %v1306_v55  ;;  %v3092_v7 = vpop.eup %3091 }
 0xcea   :  { %v1309_v32 = vmul.f32 0.5, %v1307_v57  ;;  %v3094_v63 = vpop.eup %3093 }
 0xceb   :  { %v1328_v61 = vmul.f32 %v3090_v58, %v1308_v13  ;;  %v1326_v47 = vmul.f32 %v1322_v12, %v1308_v13  ;;  %v3096_v10 = vpop.eup %3095  ;;  %v1316_v14 = vadd.f32 1.0, %v3094_v63 }
 0xcec   :  { %v1329_v49 = vmul.f32 %v3092_v7, %v1309_v32  ;;  %v1327_v18 = vmul.f32 %v1323_v29, %v1309_v32  ;;  %v1317_v8 = vadd.f32 1.0, %v3096_v10 }
 0xced   :  { %1332 = vrot.lane.b32.xlu0 %v1328_v61, %s3422_s6  ;;  %v1318_v39 = vmul.f32 0.5, %v1316_v14 }
 0xcee   :  { %1334 = vrot.lane.b32.xlu1 %v1329_v49, %s3422_s6  ;;  %v1319_v25 = vmul.f32 0.5, %v1317_v8 }
 0xd5f   :  { %v1333_v2 = vpop.permute.xlu0 %1332 }
 0xd60   :  { %v1335_v62 = vpop.permute.xlu1 %1334  ;;  %v1338_v3 = vadd.f32 %v1333_v2, %v1326_v47 }
 0xd61   :  { %v3927_v6 = vadd.f32 %v1335_v62, %v1327_v18 }
 0xd62   :  { %3097 = vtanh.f32 %v1338_v3  ;;  %v1458_v29 = vrot.slane %v1338_v3, 7 }
 0xd63   :  { %3099 = vtanh.f32 %v3927_v6 }
 0xd6c   :  { %v3098_v59 = vpop.eup %3097 }
 0xd6d   :  { %v3100_v20 = vpop.eup %3099  ;;  %v1342_v23 = vmul.f32 %v3098_v59, %v1318_v39 }
 0xd6e   :  { %v1343_v17 = vmul.f32 %v3100_v20, %v1319_v25  ;;  %v1727_v25 = vld [vmem:[#allocation11 + $0x10] sm:$0xff]  ;;  %v1728_v20 = vld [vmem:[#allocation11 + $0x18] sm:$0xff] }
 0xd6f   :  { %v1346_v24 = vrot.slane %v1342_v23, 6  ;;  %v2937_v23 = vpack.c.bf16 %v1728_v20, %v1727_v25 }
 0xd70   :  { %v1347_v21 = vrot.slane %v1343_v17, 5 }
 0xd72   :  { %v1348_v22 = vsel %vm510_vm1, %v1347_v21, %v1346_v24 }
 0xd73   :  { %1349 = vrot.lane.b32.xlu0 %v1348_v22, %s3422_s6  ;;  %v1729_v22 = vld [vmem:[#allocation11 + $0x20] sm:$0xff] }
 0xde5   :  { %v1350_v37 = vpop.permute.xlu0 %1349 }
 0xde6   :  { %v1523_v42 = vsel %vm1482_vm3, %v3790_v60, %v1350_v37  ;;  %v1667_v46 = vsel %vm1482_vm3, %v1350_v37, %v3790_v60  ;;  %2700 = vmatmul.mubr.msk.f32.vlgmr.msra.gmra.mrb[10].mxu1 %vm372_vm2, %v1350_v37  ;;  %v1730_v37 = vld [vmem:[#allocation11 + $0x28] sm:$0xff] }
 0xde7   :  { %v1531_v27 = vrot.slane %v1523_v42, %v3862_v5  ;;  %v1675_v11 = vrot.slane %v1667_v46, %v3862_v5 }
 0xde9   :  { %v1532_v28 = vcombine.high %v1531_v27, %v1531_v27  ;;  %v1539_v31 = vrot.slane %v1531_v27, %v3862_v5  ;;  %v1676_v19 = vcombine.high %v1675_v11, %v1675_v11  ;;  %v1683_v16 = vrot.slane %v1675_v11, %v3862_v5  ;;  %v1731_v11 = vld [vmem:[#allocation11 + $0x30] sm:$0xff] }
 0xdea   :  { %v2941_v27 = vpack.c.bf16 %v1730_v37, %v1729_v22 }
 0xdeb   :  { %v1546_v48 = vrot.slane %v1532_v28, %v3862_v5  ;;  %1549 = vst.msk [vmem:[#allocation2 + $0x1] sm:$0x1] %vm1518_vm4, %v1539_v31  ;;  %v1690_v34 = vrot.slane %v1676_v19, %v3862_v5  ;;  %1693 = vst.msk [vmem:[#allocation2 + $0x6] sm:$0x1] %vm1518_vm4, %v1683_v16  ;;  %v1732_v28 = vld [vmem:[#allocation11 + $0x38] sm:$0xff] }
 0xdec   :  { %v2945_v19 = vpack.c.bf16 %v1732_v28, %v1731_v11 }
 0xded   :  { %1550 = vst.msk [vmem:[#allocation2 + $0x9] sm:$0x1] %vm1518_vm4, %v1546_v48  ;;  %1694 = vst.msk [vmem:[#allocation2 + $0xe] sm:$0x1] %vm1518_vm4, %v1690_v34 }
 0xeb9   :  { %v1419_v60 = vpop.f32.mrb[10].mxu1 }
 0xeba   :  { %v1426_v35 = vrot.slane %v1419_v60, 1  ;;  %v1428_v38 = vrot.slane %v1419_v60, 2  ;;  %v1421_v15 = vpop.f32.mrb[11].mxu1 }
 0xebb   :  { %v1427_v52 = vrot.slane %v1421_v15, 1  ;;  %v1429_v26 = vrot.slane %v1421_v15, 2 }
 0xebc   :  { %v1434_v50 = vadd.f32 %v1426_v35, %v3747_v30  ;;  %v1436_v9 = vadd.f32 %v1428_v38, %v3755_v36  ;;  %v1459_v36 = vrot.slane %v3927_v6, 7 }
 0xebd   :  { %v1435_v56 = vadd.f32 %v1427_v52, %v3757_v43  ;;  %v1437_v55 = vadd.f32 %v1429_v26, %v3759_v45  ;;  %v1725_v45 = vld [vmem:[#allocation11] sm:$0xff] }
 0xebe   :  { %v1438_v53 = vmul.f32 0.5, %v1434_v50  ;;  %v1439_v54 = vmul.f32 0.5, %v1436_v9  ;;  %v2933_v1 = vpack.c.bf16 %v1726_v33, %v1725_v45 }
 0xebf   :  { %v1448_v2 = vmul.f32 0.5, %v1435_v56  ;;  %v1449_v62 = vmul.f32 0.5, %v1437_v55 }
 0xec0   :  { %3101 = vtanh.f32 %v1438_v53  ;;  %2934 = vmatprep.subr.bf16.mxu0 %v2933_v1 }
 0xec1   :  { %3103 = vtanh.f32 %v1439_v54  ;;  %2936 = vmatpush3.bf16.msra.mxu0 %v2933_v1 }
 0xec2   :  { %3105 = vtanh.f32 %v1435_v56  ;;  %2938 = vmatprep.subr.bf16.mxu0 %v2937_v23 }
 0xec3   :  { %3107 = vtanh.f32 %v1437_v55 }
 0xec4   :  { %3109 = vtanh.f32 %v1448_v2 }
 0xec5   :  { %3111 = vtanh.f32 %v1449_v62  ;;  %2940 = vmatpush3.bf16.msra.mxu0 %v2937_v23  ;;  %v1921_v62 = vld [vmem:[%s4159_s11] sm:$0xff] }
 0xec6   :  { %2942 = vmatprep.subr.bf16.mxu0 %v2941_v27 }
 0xec9   :  { %2944 = vmatpush3.bf16.msra.mxu0 %v2941_v27 }
 0xeca   :  { %v3102_v57 = vpop.eup %3101  ;;  %2946 = vmatprep.subr.bf16.mxu0 %v2945_v19 }
 0xecb   :  { %v3104_v12 = vpop.eup %3103  ;;  %v1442_v13 = vadd.f32 1.0, %v3102_v57  ;;  %v1823_v57 = vld [vmem:[%s4157_s9] sm:$0xff] }
 0xecc   :  { %v1443_v58 = vadd.f32 1.0, %v3104_v12  ;;  %v3106_v32 = vpop.eup %3105 }
 0xecd   :  { %v1444_v30 = vmul.f32 0.5, %v1442_v13  ;;  %v3108_v61 = vpop.eup %3107  ;;  %2948 = vmatpush3.bf16.msra.mxu0 %v2945_v19  ;;  %v1825_v13 = vld [vmem:[%s4157_s9 + $0x10] sm:$0xff] }
 0xece   :  { %v1445_v7 = vmul.f32 0.5, %v1443_v58  ;;  %v3110_v14 = vpop.eup %3109  ;;  %v1826_v58 = vld [vmem:[%s4157_s9 + $0x18] sm:$0xff] }
 0xecf   :  { %v1464_v47 = vmul.f32 %v3106_v32, %v1444_v30  ;;  %v1462_v49 = vmul.f32 %v1458_v29, %v1444_v30  ;;  %v3112_v8 = vpop.eup %3111  ;;  %v1452_v39 = vadd.f32 1.0, %v3110_v14  ;;  %v2953_v29 = vpack.c.bf16 %v1826_v58, %v1825_v13  ;;  %v1827_v30 = vld [vmem:[%s4157_s9 + $0x20] sm:$0xff]  ;;  %v1828_v32 = vld [vmem:[%s4157_s9 + $0x28] sm:$0xff] }
 0xed0   :  { %v1465_v18 = vmul.f32 %v3108_v61, %v1445_v7  ;;  %v1463_v43 = vmul.f32 %v1459_v36, %v1445_v7  ;;  %v1453_v59 = vadd.f32 1.0, %v3112_v8  ;;  %v2957_v36 = vpack.c.bf16 %v1828_v32, %v1827_v30  ;;  %v1829_v7 = vld [vmem:[%s4157_s9 + $0x30] sm:$0xff]  ;;  %v1830_v61 = vld [vmem:[%s4157_s9 + $0x38] sm:$0xff] }
 0xed1   :  { %1468 = vrot.lane.b32.xlu1 %v1464_v47, %s3422_s6  ;;  %v1454_v17 = vmul.f32 0.5, %v1452_v39  ;;  %v2961_v47 = vpack.c.bf16 %v1830_v61, %v1829_v7  ;;  %v2038_v8 = vld [vmem:[#allocation15] sm:$0xff] }
 0xed2   :  { %1470 = vrot.lane.b32.xlu0 %v1465_v18, %s3422_s6  ;;  %v1455_v21 = vmul.f32 0.5, %v1453_v59  ;;  %v2039_v39 = vsel %vm2014_vm5, %v2038_v8, -inf  ;;  %v2704_v59 = vld [vmem:[#allocation12] ss:$0 sm:$0xff] }
 0xef1   :  { %2040 = vmax.xlane.f32.xlu0 %v2039_v39 }
 0xf43   :  { %v1469_v3 = vpop.permute.xlu1 %1468 }
 0xf44   :  { %v1471_v6 = vpop.permute.xlu0 %1470  ;;  %v1474_v63 = vadd.f32 %v1469_v3, %v1462_v49  ;;  %v2701_v49 = vld [vmem:[%s4156_s8] ss:$0 sm:$0xff]  ;;  %v1922_v3 = vld [vmem:[%s4159_s11 + $0x8] sm:$0xff] }
 0xf45   :  { %v1475_v10 = vadd.f32 %v1471_v6, %v1463_v43  ;;  %v1923_v6 = vld [vmem:[%s4159_s11 + $0x10] sm:$0xff] }
 0xf46   :  { %3113 = vtanh.f32 %v1474_v63  ;;  %v2965_v63 = vpack.c.bf16 %v1922_v3, %v1921_v62 }
 0xf47   :  { %3115 = vtanh.f32 %v1475_v10  ;;  %v1924_v10 = vld [vmem:[%s4159_s11 + $0x18] sm:$0xff]  ;;  %s3424_s11 = smov [#allocation17]  }
 0xf48   :  { %v2969_v14 = vpack.c.bf16 %v1924_v10, %v1923_v6  ;;  %2966 = vmatprep.subr.bf16.mxu0 %v2965_v63  ;;  %s2677_s16 = sshll.u32 %s3424_s11, 4  ;;  %s2678_s16 = int_to_ptr.vmem [resolvable:$true] %s2677_s16 }
 0xf49   :  { %s3375_s17 = scalar_lea.vmem %s2678_s16, 16  ;;  %p3380_p9 = scmp.lt.s32.totalorder %s2678_s16, %s2678_s16 }
 0xf4a   :  { %p3376_p8 = scmp.ne.s32.totalorder %s2678_s16, %s3375_s17 }
 0xf50   :  { %v3114_v24 = vpop.eup %3113 }
 0xf51   :  { %v3116_v42 = vpop.eup %3115  ;;  %v1478_v46 = vmul.f32 %v3114_v24, %v1454_v17 }
 0xf52   :  { %v1479_v31 = vmul.f32 %v3116_v42, %v1455_v21 }
 0xf53   :  { %v1486_v16 = vrot.slane %v1478_v46, 7  ;;  %v2707_v46 = vld [vmem:[#allocation14] ss:$0 sm:$0xff] }
 0xf54   :  { %v1487_v48 = vrot.slane %v1479_v31, 6 }
 0xf56   :  { %v1488_v34 = vsel %vm510_vm1, %v1487_v48, %v1486_v16 }
 0xf57   :  { %1489 = vrot.lane.b32.xlu1 %v1488_v34, %s3422_s6  ;;  %s3379_s6 = scalar_lea.vmem %s2678_s16, 32 }
 0xf58   :  { %p3381_p10 = scmp.lt.s32.totalorder %s3379_s6, %s3375_s17 }
 0xf5a   :  { %p3382_p11 = por %p3381_p10, %p3380_p9 }
 0xf5c   :  { %p3383_p12 = pnand %p3382_p11, %p3376_p8 }
 0xf7e   :  { %v2041_v22 = vpop.xlane.xlu0 %2040 }
 0xf7f   :  { %v2042_v37 = vsub.f32 %v2038_v8, %v2041_v22 }
 0xf81   :  { %v2043_v42 = vmul.f32 1.442695, %v2042_v37 }
 0xfc9   :  { %v1490_v60 = vpop.permute.xlu1 %1489 }
 0xfca   :  { %v1492_v35 = vsel %vm1482_vm3, %v3769_v51, %v1490_v60  ;;  %v1695_v38 = vsel %vm1482_vm3, %v1490_v60, %v3769_v51 }
 0xfcb   :  { %v1500_v15 = vrot.slane %v1492_v35, %v3862_v5  ;;  %v1703_v50 = vrot.slane %v1695_v38, %v3862_v5 }
 0xfcd   :  { %v1501_v9 = vcombine.high %v1500_v15, %v1500_v15  ;;  %v1508_v52 = vrot.slane %v1500_v15, %v3862_v5  ;;  %v1704_v26 = vcombine.high %v1703_v50, %v1703_v50  ;;  %v1711_v53 = vrot.slane %v1703_v50, %v3862_v5 }
 0xfcf   :  { %v1515_v54 = vrot.slane %v1501_v9, %v3862_v5  ;;  %1519 = vst.msk [vmem:[#allocation2] sm:$0x1] %vm1518_vm4, %v1508_v52  ;;  %v1718_v56 = vrot.slane %v1704_v26, %v3862_v5  ;;  %1721 = vst.msk [vmem:[#allocation2 + $0x7] sm:$0x1] %vm1518_vm4, %v1711_v53  ;;  %v1824_v5 = vld [vmem:[%s4157_s9 + $0x8] sm:$0xff] }
 0xfd0   :  { %v2949_v12 = vpack.c.bf16 %v1824_v5, %v1823_v57 }
 0xfd1   :  { %1520 = vst.msk [vmem:[#allocation2 + $0x8] sm:$0x1] %vm1518_vm4, %v1515_v54  ;;  %1722 = vst.msk [vmem:[#allocation2 + $0xf] sm:$0x1] %vm1518_vm4, %v1718_v56 }
 0xfd2   :  { %2950 = vmatprep.subr.bf16.mxu1 %v2949_v12 }
 0xfd3   :  { %2952 = vmatpush3.bf16.msra.mxu1 %v2949_v12 }
 0xfd4   :  { %2954 = vmatprep.subr.bf16.mxu1 %v2953_v29 }
 0xfd6   :  { %v1723_v51 = vld [vmem:[#allocation2] sm:$0xff] }
 0xfd7   :  { %2759 = vmatprep.mubr.msk.f32.mxu0 %vm372_vm2, %v1723_v51  ;;  %2956 = vmatpush3.bf16.msra.mxu1 %v2953_v29 }
 0xfd8   :  { %v1724_v55 = vld [vmem:[#allocation2 + $0x8] sm:$0xff]  ;;  %2958 = vmatprep.subr.bf16.mxu1 %v2957_v36 }
 0xfd9   :  { %2760 = vmatmul.mubr.msk.f32.vlgmr.msra.gmra.mrb[12].mxu0 %vm372_vm2, %v1724_v55 }
 0xfda   :  { %2968 = vmatpush3.bf16.msra.mxu0 %v2965_v63 }
 0xfdb   :  { %2960 = vmatpush3.bf16.msra.mxu1 %v2957_v36  ;;  %2970 = vmatprep.subr.bf16.mxu0 %v2969_v14 }
 0xfdc   :  { %2962 = vmatprep.subr.bf16.mxu1 %v2961_v47 }
 0xfde   :  { %2972 = vmatpush3.bf16.msra.mxu0 %v2969_v14 }
 0xfdf   :  { %2964 = vmatpush3.bf16.msra.mxu1 %v2961_v47 }
0x10ac   :  { %v2761_v18 = vpop.f32.mrb[12].mxu0 }
0x10ad   :  { %v1818_v43 = vadd.f32 %v2761_v18, %v2701_v49  ;;  %v1812_v45 = vpop.f32.mrb[13].mxu0 }
0x10ae   :  { %v1813_v33 = vadd.f32 %v2701_v49, %v1812_v45 }
0x10b0   :  { %3117 = vtanh.f32 %v1813_v33 }
0x10b1   :  { %3119 = vtanh.f32 %v1818_v43 }
0x10ba   :  { %v3118_v1 = vpop.eup %3117 }
0x10bb   :  { %v3120_v2 = vpop.eup %3119  ;;  %2778 = vmatprep.mubr.msk.f32.mxu1 %vm372_vm2, %v3118_v1 }
0x10bc   :  { %2779 = vmatmul.mubr.msk.f32.vlgmr.msra.gmra.mrb[12].mxu1 %vm372_vm2, %v3120_v2 }
0x118f   :  { %v2780_v25 = vpop.f32.mrb[12].mxu1 }
0x1190   :  { %v1916_v20 = vadd.f32 %v2780_v25, %v2704_v59  ;;  %v1910_v23 = vpop.f32.mrb[13].mxu1 }
0x1191   :  { %v1911_v17 = vadd.f32 %v2704_v59, %v1910_v23 }
0x1193   :  { %3121 = vtanh.f32 %v1911_v17 }
0x1194   :  { %3123 = vtanh.f32 %v1916_v20 }
0x1195   :  { %3125 = vpow2.f32 %v2043_v42 }
0x119d   :  { %v3122_v24 = vpop.eup %3121 }
0x119e   :  { %v3124_v21 = vpop.eup %3123  ;;  %2789 = vmatprep.mubr.msk.f32.mxu0 %vm1932_vm6, %v3122_v24 }
0x119f   :  { %2790 = vmatmul.mubr.msk.f32.vlgmr.msra.gmra.mrb[14].mxu0 %vm1932_vm6, %v3124_v21  ;;  %v3126_v19 = vpop.eup %3125 }
0x11a0   :  { %v2045_v34 = vsel %vm2014_vm5, %v3126_v19, 0.0 }
0x1272   :  { %v2791_v27 = vpop.f32.mrb[14].mxu0 }
0x1273   :  { %v2011_v11 = vadd.f32 %v2791_v27, %v2707_v46  ;;  %v2005_v28 = vpop.f32.mrb[15].mxu0 }
0x1274   :  { %v2006_v31 = vadd.f32 %v2707_v46, %v2005_v28 }
0x1275   :  { %v2018_v16 = vsel %vm2014_vm5, %v2011_v11, -inf }
0x1276   :  { %2019 = vmax.xlane.f32.xlu1 %v2018_v16  ;;  %v2015_v48 = vsel %vm2014_vm5, %v2006_v31, -inf }
0x1277   :  { %2016 = vmax.xlane.f32.xlu0 %v2015_v48 }
0x127b   :  { %2046 = vadd.xlane.f32.xlu0 %v2045_v34 }
0x1303   :  { %v2020_v60 = vpop.xlane.xlu1 %2019 }
0x1304   :  { %v2022_v35 = vsub.f32 %v2011_v11, %v2020_v60  ;;  %v2017_v38 = vpop.xlane.xlu0 %2016 }
0x1305   :  { %v2021_v15 = vsub.f32 %v2006_v31, %v2017_v38 }
0x1306   :  { %v2025_v50 = vmul.f32 1.442695, %v2022_v35 }
0x1307   :  { %v2023_v9 = vmul.f32 1.442695, %v2021_v15 }
0x1308   :  { %3127 = vpow2.f32 %v2025_v50  ;;  %v2047_v52 = vpop.xlane.xlu0 %2046 }
0x1309   :  { %3129 = vpow2.f32 %v2023_v9 }
0x130a   :  { %3131 = vrcp.f32 %v2047_v52 }
0x1312   :  { %v3128_v26 = vpop.eup %3127 }
0x1313   :  { %v3130_v53 = vpop.eup %3129  ;;  %v2030_v54 = vsel %vm2014_vm5, %v3128_v26, 0.0 }
0x1314   :  { %v3132_v56 = vpop.eup %3131  ;;  %2031 = vadd.xlane.f32.xlu1 %v2030_v54  ;;  %v2027_v51 = vsel %vm2014_vm5, %v3130_v53, 0.0 }
0x1315   :  { %v4023_v55 = vmul.f32 %v3132_v56, %v3126_v19  ;;  %2028 = vadd.xlane.f32.xlu0 %v2027_v51 }
0x1317   :  { %2792 = vmatprep.subr.mxu1 %v4023_v55  ;;  %v2208_v29 = vrot.slane %v4023_v55, %v3720_v41 }
0x1318   :  { %2793 = vmatpush3.msra.mxu1 %v4023_v55 }
0x13a1   :  { %v2032_v57 = vpop.xlane.xlu1 %2031 }
0x13a2   :  { %3133 = vrcp.f32 %v2032_v57  ;;  %v2029_v5 = vpop.xlane.xlu0 %2028 }
0x13a3   :  { %3135 = vrcp.f32 %v2029_v5  ;;  %v2287_v5 = vsub.s32 2, %v3717_v40 }
0x13ac   :  { %v3134_v12 = vpop.eup %3133 }
0x13ad   :  { %v3136_v13 = vpop.eup %3135  ;;  %v4027_v58 = vmul.f32 %v3134_v12, %v3128_v26 }
0x13ae   :  { %v4031_v30 = vmul.f32 %v3136_v13, %v3130_v53 }
0x13af   :  { %v2210_v32 = vadd.f32 %v2208_v29, %v4027_v58  ;;  %v2234_v49 = vrot.slane %v4027_v58, %v3723_v44  ;;  %v2292_v13 = vrot.slane %v4027_v58, %v2287_v5 }
0x13b0   :  { %v2209_v36 = vadd.f32 %v2208_v29, %v4031_v30  ;;  %v2230_v45 = vrot.slane %v4031_v30, %v3723_v44 }
0x13b1   :  { %v2221_v7 = vrot.slane %v2210_v32, %v3720_v41 }
0x13b2   :  { %v2214_v61 = vrot.slane %v2209_v36, %v3720_v41 }
0x13b3   :  { %2223 = vbcast.lane.b32.xlu1 %v2221_v7, 256 }
0x13b4   :  { %2216 = vbcast.lane.b32.xlu0 %v2214_v61, 256  ;;  %v2288_v61 = vrot.slane %v4031_v30, %v2287_v5 }
0x1425   :  { %v2224_v47 = vpop.permute.xlu1 %2223 }
0x1426   :  { %v2226_v18 = vadd.f32 %v2224_v47, %v4023_v55  ;;  %v2217_v43 = vpop.permute.xlu0 %2216 }
0x1427   :  { %v2225_v33 = vadd.f32 %v2217_v43, %v4023_v55 }
0x1428   :  { %v2236_v1 = vadd.f32 %v2234_v49, %v2226_v18 }
0x1429   :  { %v2235_v2 = vadd.f32 %v2230_v45, %v2225_v33 }
0x142a   :  { %v2244_v62 = vsel %vm2014_vm5, %v2236_v1, -inf }
0x142b   :  { %v2245_v3 = vrot.slane %v2244_v62, 4  ;;  %v2237_v6 = vsel %vm2014_vm5, %v2235_v2, -inf }
0x142c   :  { %v2238_v63 = vrot.slane %v2237_v6, 4 }
0x142d   :  { %v2246_v10 = vmax.f32 %v2244_v62, %v2245_v3 }
0x142e   :  { %v2239_v14 = vmax.f32 %v2237_v6, %v2238_v63 }
0x142f   :  { %v2247_v8 = vrot.slane %v2246_v10, 2 }
0x1430   :  { %v2240_v39 = vrot.slane %v2239_v14, 2 }
0x1431   :  { %v2248_v59 = vmax.f32 %v2246_v10, %v2247_v8 }
0x1432   :  { %v2241_v25 = vmax.f32 %v2239_v14, %v2240_v39 }
0x1433   :  { %v2249_v20 = vrot.slane %v2248_v59, 1 }
0x1434   :  { %v2242_v23 = vrot.slane %v2241_v25, 1 }
0x1435   :  { %v2250_v17 = vmax.f32 %v2248_v59, %v2249_v20 }
0x1436   :  { %v2243_v24 = vmax.f32 %v2241_v25, %v2242_v23 }
0x1437   :  { %v2252_v21 = vsub.f32 %v2236_v1, %v2250_v17 }
0x1438   :  { %v2251_v22 = vsub.f32 %v2235_v2, %v2243_v24 }
0x1439   :  { %v2255_v37 = vmul.f32 1.442695, %v2252_v21 }
0x143a   :  { %v2253_v42 = vmul.f32 1.442695, %v2251_v22 }
0x143b   :  { %3137 = vpow2.f32 %v2255_v37 }
0x143c   :  { %3139 = vpow2.f32 %v2253_v42 }
0x1445   :  { %v3138_v46 = vpop.eup %3137 }
0x1446   :  { %v3140_v27 = vpop.eup %3139  ;;  %v2264_v11 = vsel %vm2014_vm5, %v3138_v46, 0.0 }
0x1447   :  { %v2265_v28 = vrot.slane %v2264_v11, 4  ;;  %v2257_v31 = vsel %vm2014_vm5, %v3140_v27, 0.0 }
0x1448   :  { %v2258_v19 = vrot.slane %v2257_v31, 4 }
0x1449   :  { %v2266_v16 = vadd.f32 %v2265_v28, %v2264_v11 }
0x144a   :  { %v2259_v48 = vadd.f32 %v2258_v19, %v2257_v31 }
0x144b   :  { %v2267_v34 = vrot.slane %v2266_v16, 2 }
0x144c   :  { %v2260_v60 = vrot.slane %v2259_v48, 2 }
0x144d   :  { %v2268_v35 = vadd.f32 %v2267_v34, %v2266_v16 }
0x144e   :  { %v2261_v38 = vadd.f32 %v2260_v60, %v2259_v48 }
0x144f   :  { %v2269_v15 = vrot.slane %v2268_v35, 1 }
0x1450   :  { %v2262_v50 = vrot.slane %v2261_v38, 1 }
0x1451   :  { %v2270_v9 = vadd.f32 %v2269_v15, %v2268_v35 }
0x1452   :  { %v2263_v52 = vadd.f32 %v2262_v50, %v2261_v38 }
0x1453   :  { %3141 = vlog2.f32 %v2270_v9 }
0x1454   :  { %3143 = vlog2.f32 %v2263_v52  ;;  %v2345_v52 = vsub.s32 3, %v3717_v40 }
0x1456   :  { %v2346_v5 = vrot.slane %v4031_v30, %v2345_v52 }
0x145d   :  { %v3142_v26 = vpop.eup %3141 }
0x145e   :  { %v3144_v53 = vpop.eup %3143  ;;  %v2274_v54 = vmul.f32 0.6931472, %v3142_v26 }
0x145f   :  { %v2272_v51 = vmul.f32 0.6931472, %v3144_v53  ;;  %v2350_v53 = vrot.slane %v4027_v58, %v2345_v52 }
0x1460   :  { %v2276_v56 = vadd.f32 %v2274_v54, %v2250_v17 }
0x1461   :  { %v2275_v57 = vadd.f32 %v2272_v51, %v2243_v24 }
0x1462   :  { %2281 = vbcast.lane.b32.xlu1 %v2276_v56, 256 }
0x1466   :  { %2278 = vbcast.lane.b32.xlu1 %v2275_v57, 256 }
0x14d4   :  { %v2282_v12 = vpop.permute.xlu1 %2281 }
0x14d5   :  { %v2284_v29 = vadd.f32 %v2282_v12, %v4023_v55 }
0x14d7   :  { %v2294_v32 = vadd.f32 %v2292_v13, %v2284_v29 }
0x14d8   :  { %v2279_v36 = vpop.permute.xlu1 %2278 }
0x14d9   :  { %v2302_v7 = vsel %vm2014_vm5, %v2294_v32, -inf  ;;  %v2283_v47 = vadd.f32 %v2279_v36, %v4023_v55 }
0x14da   :  { %v2303_v49 = vrot.slane %v2302_v7, 4 }
0x14db   :  { %v2293_v18 = vadd.f32 %v2288_v61, %v2283_v47 }
0x14dc   :  { %v2304_v43 = vmax.f32 %v2302_v7, %v2303_v49 }
0x14dd   :  { %v2295_v45 = vsel %vm2014_vm5, %v2293_v18, -inf }
0x14de   :  { %v2296_v33 = vrot.slane %v2295_v45, 4  ;;  %v2305_v1 = vrot.slane %v2304_v43, 2 }
0x14e0   :  { %v2297_v2 = vmax.f32 %v2295_v45, %v2296_v33  ;;  %v2306_v62 = vmax.f32 %v2304_v43, %v2305_v1 }
0x14e2   :  { %v2307_v3 = vrot.slane %v2306_v62, 1  ;;  %v2298_v6 = vrot.slane %v2297_v2, 2 }
0x14e4   :  { %v2308_v63 = vmax.f32 %v2306_v62, %v2307_v3  ;;  %v2299_v10 = vmax.f32 %v2297_v2, %v2298_v6 }
0x14e6   :  { %v2310_v14 = vsub.f32 %v2294_v32, %v2308_v63  ;;  %v2300_v8 = vrot.slane %v2299_v10, 1 }
0x14e8   :  { %v2313_v39 = vmul.f32 1.442695, %v2310_v14  ;;  %v2301_v59 = vmax.f32 %v2299_v10, %v2300_v8 }
0x14ea   :  { %3145 = vpow2.f32 %v2313_v39  ;;  %v2309_v25 = vsub.f32 %v2293_v18, %v2301_v59 }
0x14ec   :  { %v2311_v20 = vmul.f32 1.442695, %v2309_v25 }
0x14ee   :  { %3147 = vpow2.f32 %v2311_v20 }
0x14f4   :  { %v3146_v23 = vpop.eup %3145 }
0x14f5   :  { %v2322_v17 = vsel %vm2014_vm5, %v3146_v23, 0.0 }
0x14f6   :  { %v2323_v24 = vrot.slane %v2322_v17, 4 }
0x14f8   :  { %v3148_v21 = vpop.eup %3147  ;;  %v2324_v22 = vadd.f32 %v2323_v24, %v2322_v17 }
0x14f9   :  { %v2315_v37 = vsel %vm2014_vm5, %v3148_v21, 0.0 }
0x14fa   :  { %v2325_v42 = vrot.slane %v2324_v22, 2  ;;  %v2316_v46 = vrot.slane %v2315_v37, 4 }
0x14fc   :  { %v2326_v27 = vadd.f32 %v2325_v42, %v2324_v22  ;;  %v2317_v11 = vadd.f32 %v2316_v46, %v2315_v37 }
0x14fe   :  { %v2327_v28 = vrot.slane %v2326_v27, 1  ;;  %v2318_v31 = vrot.slane %v2317_v11, 2 }
0x1500   :  { %v2328_v19 = vadd.f32 %v2327_v28, %v2326_v27  ;;  %v2319_v16 = vadd.f32 %v2318_v31, %v2317_v11 }
0x1502   :  { %3149 = vlog2.f32 %v2328_v19  ;;  %v2320_v48 = vrot.slane %v2319_v16, 1 }
0x1504   :  { %v2321_v34 = vadd.f32 %v2320_v48, %v2319_v16 }
0x1506   :  { %3151 = vlog2.f32 %v2321_v34  ;;  %v2403_v34 = vsub.s32 4, %v3717_v40 }
0x1508   :  { %v2404_v52 = vrot.slane %v4031_v30, %v2403_v34 }
0x150c   :  { %v3150_v60 = vpop.eup %3149 }
0x150d   :  { %v2332_v35 = vmul.f32 0.6931472, %v3150_v60 }
0x150f   :  { %v2334_v38 = vadd.f32 %v2332_v35, %v2308_v63  ;;  %v2408_v35 = vrot.slane %v4027_v58, %v2403_v34 }
0x1510   :  { %v3152_v15 = vpop.eup %3151 }
0x1511   :  { %2339 = vbcast.lane.b32.xlu0 %v2334_v38, 256  ;;  %v2330_v50 = vmul.f32 0.6931472, %v3152_v15 }
0x1513   :  { %v2333_v9 = vadd.f32 %v2330_v50, %v2301_v59 }
0x1515   :  { %2336 = vbcast.lane.b32.xlu1 %v2333_v9, 256 }
0x1583   :  { %v2340_v26 = vpop.permute.xlu0 %2339 }
0x1584   :  { %v2342_v54 = vadd.f32 %v2340_v26, %v4023_v55 }
0x1586   :  { %v2352_v56 = vadd.f32 %v2350_v53, %v2342_v54 }
0x1587   :  { %v2337_v51 = vpop.permute.xlu1 %2336 }
0x1588   :  { %v2360_v57 = vsel %vm2014_vm5, %v2352_v56, -inf  ;;  %v2341_v12 = vadd.f32 %v2337_v51, %v4023_v55 }
0x1589   :  { %v2361_v13 = vrot.slane %v2360_v57, 4 }
0x158a   :  { %v2351_v29 = vadd.f32 %v2346_v5, %v2341_v12 }
0x158b   :  { %v2362_v32 = vmax.f32 %v2360_v57, %v2361_v13 }
0x158c   :  { %v2353_v36 = vsel %vm2014_vm5, %v2351_v29, -inf }
0x158d   :  { %v2354_v7 = vrot.slane %v2353_v36, 4  ;;  %v2363_v61 = vrot.slane %v2362_v32, 2 }
0x158f   :  { %v2355_v47 = vmax.f32 %v2353_v36, %v2354_v7  ;;  %v2364_v49 = vmax.f32 %v2362_v32, %v2363_v61 }
0x1591   :  { %v2365_v18 = vrot.slane %v2364_v49, 1  ;;  %v2356_v43 = vrot.slane %v2355_v47, 2 }
0x1593   :  { %v2366_v45 = vmax.f32 %v2364_v49, %v2365_v18  ;;  %v2357_v33 = vmax.f32 %v2355_v47, %v2356_v43 }
0x1595   :  { %v2368_v1 = vsub.f32 %v2352_v56, %v2366_v45  ;;  %v2358_v2 = vrot.slane %v2357_v33, 1 }
0x1597   :  { %v2371_v62 = vmul.f32 1.442695, %v2368_v1  ;;  %v2359_v3 = vmax.f32 %v2357_v33, %v2358_v2 }
0x1599   :  { %3153 = vpow2.f32 %v2371_v62  ;;  %v2367_v6 = vsub.f32 %v2351_v29, %v2359_v3 }
0x159b   :  { %v2369_v63 = vmul.f32 1.442695, %v2367_v6 }
0x159d   :  { %3155 = vpow2.f32 %v2369_v63 }
0x15a3   :  { %v3154_v10 = vpop.eup %3153 }
0x15a4   :  { %v2380_v14 = vsel %vm2014_vm5, %v3154_v10, 0.0 }
0x15a5   :  { %v2381_v8 = vrot.slane %v2380_v14, 4 }
0x15a7   :  { %v3156_v39 = vpop.eup %3155  ;;  %v2382_v59 = vadd.f32 %v2381_v8, %v2380_v14 }
0x15a8   :  { %v2373_v25 = vsel %vm2014_vm5, %v3156_v39, 0.0 }
0x15a9   :  { %v2383_v20 = vrot.slane %v2382_v59, 2  ;;  %v2374_v23 = vrot.slane %v2373_v25, 4 }
0x15ab   :  { %v2384_v17 = vadd.f32 %v2383_v20, %v2382_v59  ;;  %v2375_v24 = vadd.f32 %v2374_v23, %v2373_v25 }
0x15ad   :  { %v2385_v21 = vrot.slane %v2384_v17, 1  ;;  %v2376_v22 = vrot.slane %v2375_v24, 2 }
0x15af   :  { %v2386_v37 = vadd.f32 %v2385_v21, %v2384_v17  ;;  %v2377_v42 = vadd.f32 %v2376_v22, %v2375_v24  ;;  %v2037_v22 = vld [vmem:[#allocation3] sm:$0x3] }
0x15b1   :  { %3157 = vlog2.f32 %v2386_v37  ;;  %v2378_v46 = vrot.slane %v2377_v42, 1 }
0x15b3   :  { %v2379_v27 = vadd.f32 %v2378_v46, %v2377_v42 }
0x15b5   :  { %3159 = vlog2.f32 %v2379_v27  ;;  %v2053_v27 = vrot.slane %v2037_v22, %v3720_v41 }
0x15bb   :  { %v3158_v11 = vpop.eup %3157 }
0x15bc   :  { %v2390_v28 = vmul.f32 0.6931472, %v3158_v11 }
0x15be   :  { %v2392_v31 = vadd.f32 %v2390_v28, %v2366_v45  ;;  %v2060_v28 = vrot.slane %v2037_v22, %v3723_v44 }
0x15bf   :  { %v3160_v19 = vpop.eup %3159 }
0x15c0   :  { %2397 = vbcast.lane.b32.xlu0 %v2392_v31, 256  ;;  %v2388_v16 = vmul.f32 0.6931472, %v3160_v19  ;;  %v2461_v31 = vsub.s32 5, %v3717_v40 }
0x15c2   :  { %v2391_v48 = vadd.f32 %v2388_v16, %v2359_v3  ;;  %v2466_v16 = vrot.slane %v4027_v58, %v2461_v31  ;;  %v2462_v41 = vrot.slane %v4031_v30, %v2461_v31 }
0x15c4   :  { %2394 = vbcast.lane.b32.xlu1 %v2391_v48, 256 }
0x1632   :  { %v2398_v60 = vpop.permute.xlu0 %2397 }
0x1633   :  { %v2400_v38 = vadd.f32 %v2398_v60, %v4023_v55 }
0x1635   :  { %v2410_v15 = vadd.f32 %v2408_v35, %v2400_v38 }
0x1636   :  { %v2395_v50 = vpop.permute.xlu1 %2394 }
0x1637   :  { %v2418_v9 = vsel %vm2014_vm5, %v2410_v15, -inf  ;;  %v2399_v26 = vadd.f32 %v2395_v50, %v4023_v55 }
0x1638   :  { %v2419_v53 = vrot.slane %v2418_v9, 4 }
0x1639   :  { %v2409_v54 = vadd.f32 %v2404_v52, %v2399_v26 }
0x163a   :  { %v2420_v56 = vmax.f32 %v2418_v9, %v2419_v53 }
0x163b   :  { %v2411_v51 = vsel %vm2014_vm5, %v2409_v54, -inf }
0x163c   :  { %v2412_v57 = vrot.slane %v2411_v51, 4  ;;  %v2421_v5 = vrot.slane %v2420_v56, 2 }
0x163e   :  { %v2413_v12 = vmax.f32 %v2411_v51, %v2412_v57  ;;  %v2422_v13 = vmax.f32 %v2420_v56, %v2421_v5 }
0x1640   :  { %v2423_v29 = vrot.slane %v2422_v13, 1  ;;  %v2414_v32 = vrot.slane %v2413_v12, 2 }
0x1642   :  { %v2424_v36 = vmax.f32 %v2422_v13, %v2423_v29  ;;  %v2415_v7 = vmax.f32 %v2413_v12, %v2414_v32 }
0x1644   :  { %v2426_v61 = vsub.f32 %v2410_v15, %v2424_v36  ;;  %v2416_v47 = vrot.slane %v2415_v7, 1 }
0x1646   :  { %v2429_v49 = vmul.f32 1.442695, %v2426_v61  ;;  %v2417_v18 = vmax.f32 %v2415_v7, %v2416_v47 }
0x1648   :  { %3161 = vpow2.f32 %v2429_v49  ;;  %v2425_v43 = vsub.f32 %v2409_v54, %v2417_v18 }
0x164a   :  { %v2427_v45 = vmul.f32 1.442695, %v2425_v43 }
0x164c   :  { %3163 = vpow2.f32 %v2427_v45 }
0x1652   :  { %v3162_v33 = vpop.eup %3161 }
0x1653   :  { %v2438_v1 = vsel %vm2014_vm5, %v3162_v33, 0.0 }
0x1654   :  { %v2439_v2 = vrot.slane %v2438_v1, 4 }
0x1656   :  { %v3164_v62 = vpop.eup %3163  ;;  %v2440_v3 = vadd.f32 %v2439_v2, %v2438_v1 }
0x1657   :  { %v2431_v6 = vsel %vm2014_vm5, %v3164_v62, 0.0 }
0x1658   :  { %v2441_v63 = vrot.slane %v2440_v3, 2  ;;  %v2432_v10 = vrot.slane %v2431_v6, 4 }
0x165a   :  { %v2442_v14 = vadd.f32 %v2441_v63, %v2440_v3  ;;  %v2433_v8 = vadd.f32 %v2432_v10, %v2431_v6 }
0x165c   :  { %v2443_v39 = vrot.slane %v2442_v14, 1  ;;  %v2434_v59 = vrot.slane %v2433_v8, 2 }
0x165e   :  { %v2444_v25 = vadd.f32 %v2443_v39, %v2442_v14  ;;  %v2435_v20 = vadd.f32 %v2434_v59, %v2433_v8 }
0x1660   :  { %3165 = vlog2.f32 %v2444_v25  ;;  %v2436_v23 = vrot.slane %v2435_v20, 1 }
0x1662   :  { %v2437_v17 = vadd.f32 %v2436_v23, %v2435_v20 }
0x1664   :  { %3167 = vlog2.f32 %v2437_v17 }
0x166a   :  { %v3166_v24 = vpop.eup %3165 }
0x166b   :  { %v2448_v21 = vmul.f32 0.6931472, %v3166_v24 }
0x166d   :  { %v2450_v37 = vadd.f32 %v2448_v21, %v2424_v36 }
0x166e   :  { %v3168_v42 = vpop.eup %3167 }
0x166f   :  { %2455 = vbcast.lane.b32.xlu0 %v2450_v37, 256  ;;  %v2446_v46 = vmul.f32 0.6931472, %v3168_v42  ;;  %v2519_v37 = vsub.s32 6, %v3717_v40 }
0x1671   :  { %v2449_v11 = vadd.f32 %v2446_v46, %v2417_v18  ;;  %v2524_v46 = vrot.slane %v4027_v58, %v2519_v37 }
0x1673   :  { %2452 = vbcast.lane.b32.xlu1 %v2449_v11, 256  ;;  %2055 = vbcast.lane.b32.xlu0 %v2053_v27, 256 }
0x1677   :  { %2062 = vbcast.lane.b32.xlu1 %v2060_v28, 256 }
0x16e1   :  { %v2456_v19 = vpop.permute.xlu0 %2455 }
0x16e2   :  { %v2458_v48 = vadd.f32 %v2456_v19, %v4023_v55  ;;  %v2520_v19 = vrot.slane %v4031_v30, %v2519_v37 }
0x16e4   :  { %v2468_v34 = vadd.f32 %v2466_v16, %v2458_v48 }
0x16e5   :  { %v2453_v60 = vpop.permute.xlu1 %2452  ;;  %v2056_v35 = vpop.permute.xlu0 %2055 }
0x16e6   :  { %v2476_v38 = vsel %vm2014_vm5, %v2468_v34, -inf  ;;  %v2457_v15 = vadd.f32 %v2453_v60, %v4023_v55  ;;  %vm2064_vm7 = vcmp.eq.s32.totalorder %v2056_v35, %v3859_v4 }
0x16e7   :  { %v2477_v44 = vrot.slane %v2476_v38, 4  ;;  %v4084_v50 = vsel %vm2064_vm7, 1.0, %v3421_v0 }
0x16e8   :  { %v2467_v9 = vadd.f32 %v2462_v41, %v2457_v15  ;;  %2794 = vmatprep.mubr.msk.f32.mxu1 %vm2014_vm5, %v4084_v50 }
0x16e9   :  { %v2478_v52 = vmax.f32 %v2476_v38, %v2477_v44  ;;  %v2063_v26 = vpop.permute.xlu1 %2062 }
0x16ea   :  { %v2469_v53 = vsel %vm2014_vm5, %v2467_v9, -inf  ;;  %vm2065_vm8 = vcmp.eq.s32.totalorder %v2063_v26, %v3859_v4 }
0x16eb   :  { %v2470_v54 = vrot.slane %v2469_v53, 4  ;;  %v4091_v56 = vsel %vm2065_vm8, 1.0, %v3421_v0  ;;  %v2479_v51 = vrot.slane %v2478_v52, 2 }
0x16ec   :  { %2795 = vmatmul.mubr.msk.f32.vlgmr.msra.gmra.mrb[14].mxu1 %vm2014_vm5, %v4091_v56 }
0x16ed   :  { %v2471_v57 = vmax.f32 %v2469_v53, %v2470_v54  ;;  %v2480_v5 = vmax.f32 %v2478_v52, %v2479_v51 }
0x16ef   :  { %v2481_v12 = vrot.slane %v2480_v5, 1  ;;  %v2472_v13 = vrot.slane %v2471_v57, 2 }
0x16f1   :  { %v2482_v29 = vmax.f32 %v2480_v5, %v2481_v12  ;;  %v2473_v32 = vmax.f32 %v2471_v57, %v2472_v13 }
0x16f3   :  { %v2484_v36 = vsub.f32 %v2468_v34, %v2482_v29  ;;  %v2474_v7 = vrot.slane %v2473_v32, 1 }
0x16f5   :  { %v2487_v61 = vmul.f32 1.442695, %v2484_v36  ;;  %v2475_v47 = vmax.f32 %v2473_v32, %v2474_v7 }
0x16f7   :  { %3169 = vpow2.f32 %v2487_v61  ;;  %v2483_v49 = vsub.f32 %v2467_v9, %v2475_v47 }
0x16f9   :  { %v2485_v18 = vmul.f32 1.442695, %v2483_v49 }
0x16fb   :  { %3171 = vpow2.f32 %v2485_v18 }
0x1701   :  { %v3170_v0 = vpop.eup %3169 }
0x1702   :  { %v2496_v43 = vsel %vm2014_vm5, %v3170_v0, 0.0 }
0x1703   :  { %v2497_v45 = vrot.slane %v2496_v43, 4 }
0x1705   :  { %v3172_v33 = vpop.eup %3171  ;;  %v2498_v1 = vadd.f32 %v2497_v45, %v2496_v43 }
0x1706   :  { %v2489_v2 = vsel %vm2014_vm5, %v3172_v33, 0.0 }
0x1707   :  { %v2499_v62 = vrot.slane %v2498_v1, 2  ;;  %v2490_v3 = vrot.slane %v2489_v2, 4 }
0x1709   :  { %v2500_v6 = vadd.f32 %v2499_v62, %v2498_v1  ;;  %v2491_v63 = vadd.f32 %v2490_v3, %v2489_v2  ;;  %v2176_v62 = vrot.slane %v4091_v56, 1 }
0x170b   :  { %v2501_v10 = vrot.slane %v2500_v6, 1  ;;  %v2492_v14 = vrot.slane %v2491_v63, 2 }
0x170d   :  { %v2502_v8 = vadd.f32 %v2501_v10, %v2500_v6  ;;  %v2493_v39 = vadd.f32 %v2492_v14, %v2491_v63  ;;  %v2175_v63 = vrot.slane %v4084_v50, 1 }
0x170f   :  { %3173 = vlog2.f32 %v2502_v8  ;;  %v2494_v59 = vrot.slane %v2493_v39, 1 }
0x1711   :  { %v2495_v25 = vadd.f32 %v2494_v59, %v2493_v39 }
0x1713   :  { %3175 = vlog2.f32 %v2495_v25 }
0x1719   :  { %v3174_v20 = vpop.eup %3173 }
0x171a   :  { %v2506_v23 = vmul.f32 0.6931472, %v3174_v20 }
0x171c   :  { %v2508_v17 = vadd.f32 %v2506_v23, %v2482_v29 }
0x171d   :  { %v3176_v24 = vpop.eup %3175 }
0x171e   :  { %2513 = vbcast.lane.b32.xlu0 %v2508_v17, 256  ;;  %v2504_v21 = vmul.f32 0.6931472, %v3176_v24 }
0x1720   :  { %v2507_v22 = vadd.f32 %v2504_v21, %v2475_v47 }
0x1722   :  { %2510 = vbcast.lane.b32.xlu1 %v2507_v22, 256  ;;  %v2070_v22 = vmul.f32 %v4084_v50, %v4031_v30 }
0x1724   :  { %v2072_v37 = vsel %vm2014_vm5, %v2070_v22, 0.0  ;;  %v2071_v22 = vmul.f32 %v4091_v56, %v4027_v58 }
0x1790   :  { %v2514_v42 = vpop.permute.xlu0 %2513 }
0x1791   :  { %v2516_v27 = vadd.f32 %v2514_v42, %v4023_v55 }
0x1793   :  { %v2526_v11 = vadd.f32 %v2524_v46, %v2516_v27  ;;  %v2577_v46 = vsub.s32 7, %v3717_v40 }
0x1794   :  { %v2511_v28 = vpop.permute.xlu1 %2510 }
0x1795   :  { %v2534_v31 = vsel %vm2014_vm5, %v2526_v11, -inf  ;;  %v2515_v16 = vadd.f32 %v2511_v28, %v4023_v55 }
0x1796   :  { %v2535_v48 = vrot.slane %v2534_v31, 4 }
0x1797   :  { %v2525_v34 = vadd.f32 %v2520_v19, %v2515_v16 }
0x1798   :  { %v2536_v60 = vmax.f32 %v2534_v31, %v2535_v48  ;;  %v2578_v48 = vrot.slane %v4031_v30, %v2577_v46 }
0x1799   :  { %v2527_v35 = vsel %vm2014_vm5, %v2525_v34, -inf }
0x179a   :  { %v2528_v38 = vrot.slane %v2527_v35, 4  ;;  %v2537_v41 = vrot.slane %v2536_v60, 2 }
0x179c   :  { %v2529_v15 = vmax.f32 %v2527_v35, %v2528_v38  ;;  %v2538_v44 = vmax.f32 %v2536_v60, %v2537_v41 }
0x179e   :  { %v2539_v9 = vrot.slane %v2538_v44, 1  ;;  %v2530_v52 = vrot.slane %v2529_v15, 2 }
0x17a0   :  { %v2540_v26 = vmax.f32 %v2538_v44, %v2539_v9  ;;  %v2531_v53 = vmax.f32 %v2529_v15, %v2530_v52 }
0x17a2   :  { %v2542_v54 = vsub.f32 %v2526_v11, %v2540_v26  ;;  %v2532_v51 = vrot.slane %v2531_v53, 1  ;;  %v2582_v11 = vrot.slane %v4027_v58, %v2577_v46 }
0x17a4   :  { %v2545_v57 = vmul.f32 1.442695, %v2542_v54  ;;  %v2533_v5 = vmax.f32 %v2531_v53, %v2532_v51 }
0x17a6   :  { %3177 = vpow2.f32 %v2545_v57  ;;  %v2541_v12 = vsub.f32 %v2525_v34, %v2533_v5 }
0x17a8   :  { %v2543_v13 = vmul.f32 1.442695, %v2541_v12 }
0x17aa   :  { %3179 = vpow2.f32 %v2543_v13 }
0x17b0   :  { %v3178_v29 = vpop.eup %3177 }
0x17b1   :  { %v2554_v32 = vsel %vm2014_vm5, %v3178_v29, 0.0 }
0x17b2   :  { %v2555_v36 = vrot.slane %v2554_v32, 4 }
0x17b4   :  { %v3180_v7 = vpop.eup %3179  ;;  %v2556_v61 = vadd.f32 %v2555_v36, %v2554_v32 }
0x17b5   :  { %v2547_v47 = vsel %vm2014_vm5, %v3180_v7, 0.0 }
0x17b6   :  { %v2557_v49 = vrot.slane %v2556_v61, 2  ;;  %v2548_v18 = vrot.slane %v2547_v47, 4 }
0x17b8   :  { %v2558_v0 = vadd.f32 %v2557_v49, %v2556_v61  ;;  %v2549_v43 = vadd.f32 %v2548_v18, %v2547_v47 }
0x17ba   :  { %v2559_v45 = vrot.slane %v2558_v0, 1  ;;  %v2550_v33 = vrot.slane %v2549_v43, 2 }
0x17bc   :  { %v2560_v1 = vadd.f32 %v2559_v45, %v2558_v0  ;;  %v2551_v2 = vadd.f32 %v2550_v33, %v2549_v43 }
0x17be   :  { %3181 = vlog2.f32 %v2560_v1  ;;  %v2552_v3 = vrot.slane %v2551_v2, 1 }
0x17bf   :  { %v2796_v6 = vpop.f32.mrb[14].mxu1 }
0x17c0   :  { %v2180_v10 = vmul.f32 %v2796_v6, %v2176_v62  ;;  %v2166_v14 = vpop.f32.mrb[15].mxu1  ;;  %v2553_v8 = vadd.f32 %v2552_v3, %v2551_v2 }
0x17c1   :  { %v2179_v39 = vmul.f32 %v2175_v63, %v2166_v14  ;;  %v2628_v14 = vrot.slane %v4023_v55, %v2577_v46 }
0x17c2   :  { %3183 = vlog2.f32 %v2553_v8  ;;  %v2185_v42 = vsel %vm2181_vm9, %v2180_v10, 0.0 }
0x17c3   :  { %v4108_v59 = vsel %vm2181_vm9, %v2179_v39, 0.0 }
0x17c8   :  { %v3182_v25 = vpop.eup %3181 }
0x17c9   :  { %v2564_v20 = vmul.f32 0.6931472, %v3182_v25 }
0x17cb   :  { %v2566_v23 = vadd.f32 %v2564_v20, %v2540_v26 }
0x17cc   :  { %v3184_v17 = vpop.eup %3183 }
0x17cd   :  { %2571 = vbcast.lane.b32.xlu0 %v2566_v23, 256  ;;  %v2562_v24 = vmul.f32 0.6931472, %v3184_v17 }
0x17cf   :  { %v2565_v21 = vadd.f32 %v2562_v24, %v2533_v5 }
0x17d1   :  { %2568 = vbcast.lane.b32.xlu1 %v2565_v21, 256 }
0x17f5   :  { %2073 = vadd.xlane.f32.xlu1 %v2072_v37  ;;  %v2075_v37 = vsel %vm2014_vm5, %v2071_v22, 0.0 }
0x17f9   :  { %2186 = vadd.xlane.f32.xlu1 %v2185_v42  ;;  %v2082_v42 = vsub.s32 %v3859_v4, %v3717_v40 }
0x183f   :  { %v2572_v27 = vpop.permute.xlu0 %2571 }
0x1840   :  { %v2574_v28 = vadd.f32 %v2572_v27, %v4023_v55 }
0x1842   :  { %v2584_v31 = vadd.f32 %v2582_v11, %v2574_v28 }
0x1843   :  { %v2569_v19 = vpop.permute.xlu1 %2568 }
0x1844   :  { %v2592_v16 = vsel %vm2014_vm5, %v2584_v31, -inf  ;;  %v2573_v50 = vadd.f32 %v2569_v19, %v4023_v55 }
0x1845   :  { %v2593_v34 = vrot.slane %v2592_v16, 4 }
0x1846   :  { %v2583_v60 = vadd.f32 %v2578_v48, %v2573_v50 }
0x1847   :  { %v2594_v35 = vmax.f32 %v2592_v16, %v2593_v34 }
0x1848   :  { %v2585_v38 = vsel %vm2014_vm5, %v2583_v60, -inf }
0x1849   :  { %v2595_v41 = vrot.slane %v2594_v35, 2  ;;  %v2586_v15 = vrot.slane %v2585_v38, 4 }
0x184b   :  { %v2596_v44 = vmax.f32 %v2594_v35, %v2595_v41  ;;  %v2587_v9 = vmax.f32 %v2585_v38, %v2586_v15 }
0x184d   :  { %v2597_v52 = vrot.slane %v2596_v44, 1  ;;  %v2588_v26 = vrot.slane %v2587_v9, 2 }
0x184f   :  { %v2598_v53 = vmax.f32 %v2596_v44, %v2597_v52  ;;  %v2589_v54 = vmax.f32 %v2587_v9, %v2588_v26 }
0x1851   :  { %v2600_v51 = vsub.f32 %v2584_v31, %v2598_v53  ;;  %v2590_v57 = vrot.slane %v2589_v54, 1 }
0x1853   :  { %v2603_v5 = vmul.f32 1.442695, %v2600_v51  ;;  %v2591_v12 = vmax.f32 %v2589_v54, %v2590_v57 }
0x1855   :  { %3185 = vpow2.f32 %v2603_v5  ;;  %v2599_v30 = vsub.f32 %v2583_v60, %v2591_v12 }
0x1857   :  { %v2601_v13 = vmul.f32 1.442695, %v2599_v30 }
0x1859   :  { %3187 = vpow2.f32 %v2601_v13 }
0x185f   :  { %v3186_v29 = vpop.eup %3185 }
0x1860   :  { %v2612_v32 = vsel %vm2014_vm5, %v3186_v29, 0.0 }
0x1861   :  { %v2613_v36 = vrot.slane %v2612_v32, 4 }
0x1863   :  { %v3188_v7 = vpop.eup %3187  ;;  %v2614_v61 = vadd.f32 %v2613_v36, %v2612_v32 }
0x1864   :  { %v2605_v47 = vsel %vm2014_vm5, %v3188_v7, 0.0 }
0x1865   :  { %v2615_v49 = vrot.slane %v2614_v61, 2  ;;  %v2606_v18 = vrot.slane %v2605_v47, 4 }
0x1867   :  { %v2616_v0 = vadd.f32 %v2615_v49, %v2614_v61  ;;  %v2607_v43 = vadd.f32 %v2606_v18, %v2605_v47 }
0x1869   :  { %v2617_v45 = vrot.slane %v2616_v0, 1  ;;  %v2608_v33 = vrot.slane %v2607_v43, 2 }
0x186b   :  { %v2618_v1 = vadd.f32 %v2617_v45, %v2616_v0  ;;  %v2609_v2 = vadd.f32 %v2608_v33, %v2607_v43 }
0x186d   :  { %3189 = vlog2.f32 %v2618_v1  ;;  %v2610_v62 = vrot.slane %v2609_v2, 1 }
0x186f   :  { %v2611_v3 = vadd.f32 %v2610_v62, %v2609_v2 }
0x1871   :  { %3191 = vlog2.f32 %v2611_v3 }
0x1877   :  { %v3190_v6 = vpop.eup %3189 }
0x1878   :  { %v2622_v63 = vmul.f32 0.6931472, %v3190_v6 }
0x187a   :  { %v2624_v10 = vadd.f32 %v2622_v63, %v2598_v53 }
0x187b   :  { %v3192_v8 = vpop.eup %3191 }
0x187c   :  { %v2620_v39 = vmul.f32 0.6931472, %v3192_v8  ;;  %v2630_v25 = vadd.f32 %v2628_v14, %v2624_v10 }
0x187e   :  { %v2623_v20 = vadd.f32 %v2620_v39, %v2591_v12  ;;  %v2633_v17 = vrot.slane %v2630_v25, 7 }
0x1880   :  { %v2629_v23 = vadd.f32 %v2628_v14, %v2623_v20 }
0x1882   :  { %v2634_v24 = vsel %vm510_vm1, %v2633_v17, %v2629_v23  ;;  %v2074_v11 = vpop.xlane.xlu1 %2073 }
0x1883   :  { %v2636_v21 = vsel %vm2090_vm10, %v2634_v24, -inf  ;;  %v2083_v19 = vrot.slane %v2074_v11, %v2082_v42 }
0x1884   :  { %2637 = vmax.xlane.f32.xlu0 %v2636_v21 }
0x1886   :  { %v2187_v60 = vpop.xlane.xlu1 %2186 }
0x1887   :  { %v2197_v38 = vrot.slane %v2187_v60, %v2082_v42 }
0x1888   :  { %2076 = vadd.xlane.f32.xlu0 %v2075_v37 }
0x188c   :  { %2183 = vadd.xlane.f32.xlu0 %v4108_v59 }
0x1911   :  { %v2638_v55 = vpop.xlane.xlu0 %2637 }
0x1912   :  { %v2640_v46 = vrot.slane %v2638_v55, 1  ;;  %v2643_v27 = vsub.f32 %v2629_v23, %v2638_v55 }
0x1914   :  { %v2644_v28 = vsub.f32 %v2630_v25, %v2640_v46  ;;  %v2645_v16 = vmul.f32 1.442695, %v2643_v27 }
0x1915   :  { %v2077_v31 = vpop.xlane.xlu0 %2076 }
0x1916   :  { %v2647_v48 = vmul.f32 1.442695, %v2644_v28  ;;  %v2087_v50 = vrot.slane %v2077_v31, %v2082_v42 }
0x1918   :  { %3193 = vpow2.f32 %v2647_v48  ;;  %v2088_v58 = vsel %vm510_vm1, %v2087_v50, %v2083_v19 }
0x1919   :  { %v2091_v56 = vsel %vm2090_vm10, %v2088_v58, 0.0  ;;  %3195 = vpow2.f32 %v2645_v16  ;;  %v2184_v59 = vpop.xlane.xlu0 %2183 }
0x191a   :  { %2092 = vadd.xlane.f32.xlu1 %v2091_v56  ;;  %v2193_v40 = vrot.slane %v2184_v59, %v2082_v42 }
0x191c   :  { %v2198_v44 = vsel %vm510_vm1, %v2197_v38, %v2193_v40 }
0x191d   :  { %v2201_v9 = vsel %vm2200_vm11, %v2198_v44, 0.0 }
0x1922   :  { %v3194_v34 = vpop.eup %3193 }
0x1923   :  { %v2651_v4 = vrot.slane %v3194_v34, 7  ;;  %v3196_v35 = vpop.eup %3195 }
0x1925   :  { %v2652_v41 = vsel %vm510_vm1, %v2651_v4, %v3196_v35 }
0x1926   :  { %v2654_v15 = vsel %vm2090_vm10, %v2652_v41, 0.0 }
0x1927   :  { %2655 = vadd.xlane.f32.xlu0 %v2654_v15 }
0x192b   :  { %2202 = vadd.xlane.f32.xlu0 %v2201_v9 }
0x19a7   :  { %v2093_v51 = vpop.xlane.xlu1 %2092 }
0x19b4   :  { %v2656_v52 = vpop.xlane.xlu0 %2655 }
0x19b5   :  { %3197 = vlog2.f32 %v2656_v52 }
0x19b8   :  { %v2203_v53 = vpop.xlane.xlu0 %2202 }
0x19b9   :  { %v2204_v5 = vadd.f32 %v2203_v53, %v2093_v51 }
0x19bf   :  { %v3198_v26 = vpop.eup %3197 }
0x19c0   :  { %v2658_v54 = vmul.f32 0.6931472, %v3198_v26 }
0x19c2   :  { %v2659_v57 = vadd.f32 %v2658_v54, %v2638_v55 }
0x19c4   :  { %v2660_v12 = vsub.f32 %v2659_v57, %v2204_v5 }
0x19c6   :  { %v2662_v30 = vsel %vm2661_vm12, %v2660_v12, 0.0 }
0x19c7   :  { %v2663_v13 = vrot.slane %v2662_v30, 4 }
0x19c9   :  { %v2664_v29 = vadd.f32 %v2663_v13, %v2662_v30 }
0x19cb   :  { %v2665_v32 = vrot.slane %v2664_v29, 2 }
0x19cd   :  { %v2666_v36 = vadd.f32 %v2665_v32, %v2664_v29 }
0x19cf   :  { %v2667_v7 = vrot.slane %v2666_v36, 1 }
0x19d1   :  { %v2668_v61 = vadd.f32 %v2667_v7, %v2666_v36 }
0x19d3   :  { %2670 = vst.msk [vmem:[#allocation17] sm:$0x1] %vm2669_vm13, %v2668_v61 }
0x19d4   :  { %3386 = shalt.err (!%p3383_p12)
}
0x19d5   :  { %s3387_s18 = scalar_lea.hbm %s4162_s14, 16 }
0x19d6   :  { %p3388_p13 = scmp.ne.s32.totalorder %s4162_s14, %s3387_s18  ;;  %p3391_p0 = scmp.lt.u32.totalorder %s3387_s18, %s4162_s14 }
0x19d8   :  { %p3393_p1 = pnand %p3391_p0, %p3388_p13 }
0x19da   :  { %3396 = shalt.err (!%p3393_p1)
}
0x19db   :  { %2680 = dma.vmem_to_hbm [thread:$0]  %s2678_s16, 16, %s4162_s14, [#allocation5]  }
0x19dc   :  { %3407 = dma.done.wait [#allocation5], 16  }
0x19dd   :  { %3408 = vsyncadd [#allocation5], 4294967280 }
0x19de   :  { %2684 = vsyncpa [#allocation4], 1 }
0x19df   :  { %2685 = vsyncpa [#allocation7], 1 }
0x19e0   :  { %2686 = vsyncpa [#allocation10], 1 }
0x19e1   :  { %2687 = vsyncpa [#allocation13], 1 }
0x19e2   :  { %2688 = vsyncpa [#allocation16], 1 }
0x19e3   :  { %2689 = vsyncpa [#allocation5], 1 }

</bundles_post_ra>
